<compile_context>
chip_gen: v6e
topology: v6e:2x2x1
jax: 0.10.0
libtpu: 0.0.40
codegen_flags: <defaults>
</compile_context>

<pallas_src>
import functools

import jax
import jax.numpy as jnp
from jax.experimental import pallas as pl
from jax.experimental.pallas import tpu as pltpu


# ------------------------------ fused kernel ------------------------------- #

def _cnn_kernel(x1_ref, w1_ref, b1_ref, w2_ref, b2_ref, w3_ref, b3_ref,
                wf1_ref, bf1_ref, wf2_ref, bf2_ref, wf3_ref, bf3_ref,
                o_ref,
                pool1_ref, pool2_ref, pool3_ref, xpad2_ref, xpad3_ref,
                *, bn):
    f32, bf16 = jnp.float32, jnp.bfloat16

    def pool2x2(z, H, W, C, pool_ref):
        """2x2 max-pool of a (bn*H*W, C) conv output, rows ordered (b, h, w)."""
        # H-half: layout-preserving leading-dim split (W % 8 == 0 keeps tiling).
        zr = z.reshape(bn * (H // 2), 2, W, C)
        zh = jnp.maximum(zr[:, 0], zr[:, 1])                  # (bn*H/2, W, C)
        pool_ref[...] = zh.reshape(bn * (H // 2) * W, C)
        # W-half: row parity == w parity, so stride-2 sublane reads compact it.
        r = bn * (H // 2) * (W // 2)
        return jnp.maximum(pool_ref[pl.ds(0, r, 2), :],
                           pool_ref[pl.ds(1, r, 2), :])       # (bn*H/2*W/2, C)

    def fill_halo(xpad_ref, p, H, W, C):
        """Write the pooled activation into the zero-haloed scratch of the next
        conv.  Interior starts at (row 1, col 8): col 8 keeps the store
        sublane-aligned while cols 7 and 8+W stay zero for the kx=0/2 taps."""
        xpad_ref[...] = jnp.zeros(xpad_ref.shape, xpad_ref.dtype)
        xpad_ref[:, 1:H + 1, 8:8 + W, :] = p.reshape(bn, H, W, C)

    def conv_block(xpad_ref, w_ref, b_ref, H, W, Cin, Cout, pool_ref):
        """3x3 'same' conv + bias + ReLU + 2x2 maxpool from a haloed scratch."""
        xv = xpad_ref[...].astype(bf16)           # single convert pass per layer
        M = bn * H * W
        acc = jnp.zeros((M, Cout), f32)
        for ky in range(3):                       # per-ky fused im2col: K = 3*Cin
            panel = jnp.concatenate(
                [xv[:, ky:ky + H, 7 + kx:7 + kx + W, :] for kx in range(3)],
                axis=-1).reshape(M, 3 * Cin)
            acc = acc + jnp.dot(panel, w_ref[ky], preferred_element_type=f32)
        z = jnp.maximum(acc + b_ref[...], 0.0)
        return pool2x2(z, H, W, Cout, pool_ref)

    # layer 1: pre-built im2col panel -> one K=32 matmul (no Cin=3 lane waste)
    z1 = jnp.dot(x1_ref[...], w1_ref[...], preferred_element_type=f32)
    z1 = jnp.maximum(z1 + b1_ref[...], 0.0)                   # (bn*1024, 32)
    p1 = pool2x2(z1, 32, 32, 32, pool1_ref)                   # (bn*256, 32)
    fill_halo(xpad2_ref, p1, 16, 16, 32)

    # layer 2
    p2 = conv_block(xpad2_ref, w2_ref, b2_ref, 16, 16, 32, 64, pool2_ref)
    fill_halo(xpad3_ref, p2, 8, 8, 64)

    # layer 3
    p3 = conv_block(xpad3_ref, w3_ref, b3_ref, 8, 8, 64, 128, pool3_ref)

    # flatten in NHWC order (wf1 rows were pre-permuted to match) + fused fc head
    p3r = p3.astype(bf16).reshape(bn, 16, 128)
    lhs = jnp.concatenate([p3r[:, s, :] for s in range(16)], axis=-1)  # (bn, 2048)
    h = jnp.dot(lhs, wf1_ref[...], preferred_element_type=f32)
    h = jnp.maximum(h + bf1_ref[...], 0.0)
    h = jnp.dot(h.astype(bf16), wf2_ref[...], preferred_element_type=f32)
    h = jnp.maximum(h + bf2_ref[...], 0.0)
    h = jnp.dot(h.astype(bf16), wf3_ref[...], preferred_element_type=f32)
    h = h + bf3_ref[...]
    o_ref[...] = h.reshape(1, bn, 128).astype(o_ref.dtype)


# -------------------------------- wrapper ----------------------------------- #

def _pick_bn(n):
    """Samples per grid step: VMEM-budgeted (<= a few MiB of live f32 temps)
    and >= 2 grid steps when possible so v7x's two TensorCores both get work."""
    for bn in (4, 2, 1):
        if n % bn == 0 and n // bn >= 2:
            return bn
    return 1


def cnnmodel_forward(params, x_nchw):
    """Forward pass of `cnnmodel`; input is NCHW like the PyTorch module."""
    n, c, hh, ww = x_nchw.shape
    assert (c, hh, ww) == (3, 32, 32), "fc1 expects 128*4*4 => 32x32x3 input"
    bn = _pick_bn(n)
    bf16, f32 = jnp.bfloat16, jnp.float32

    # layer-1 im2col panel (built once from the tiny network input, bf16,
    # K padded 27 -> 32); removes the Cin=3 lane-sparse matmuls entirely.
    x = jnp.transpose(x_nchw, (0, 2, 3, 1)).astype(bf16)          # (N,32,32,3)
    xp = jnp.pad(x, ((0, 0), (1, 1), (1, 1), (0, 0)))
    panel = jnp.concatenate(
        [xp[:, ky:ky + 32, kx:kx + 32, :] for ky in range(3) for kx in range(3)],
        axis=-1).reshape(n * 1024, 27)
    panel = jnp.pad(panel, ((0, 0), (0, 5)))                      # (N*1024, 32)

    # weights: conv taps grouped per ky (K = 3*Cin), fc3 padded to lane-dense
    # N=128, fc1 rows permuted (c,h,w)->(h,w,c) to absorb the NCHW flatten.
    w1 = jnp.pad(params["w1"].reshape(27, 32), ((0, 5), (0, 0))).astype(bf16)
    b1 = params["b1"].reshape(1, 32).astype(f32)
    w2 = params["w2"].reshape(3, 96, 64).astype(bf16)
    b2 = params["b2"].reshape(1, 64).astype(f32)
    w3 = params["w3"].reshape(3, 192, 128).astype(bf16)
    b3 = params["b3"].reshape(1, 128).astype(f32)
    wf1 = (params["wf1"].reshape(128, 4, 4, 256)
           .transpose(1, 2, 0, 3).reshape(2048, 256).astype(bf16))
    bf1 = params["bf1"].reshape(1, 256).astype(f32)
    wf2 = params["wf2"].astype(bf16)
    bf2 = params["bf2"].reshape(1, 128).astype(f32)
    wf3 = jnp.zeros((128, 128), f32).at[:, :10].set(params["wf3"]).astype(bf16)
    bf3 = jnp.zeros((1, 128), f32).at[0, :10].set(params["bf3"])

    out = pl.pallas_call(
        functools.partial(_cnn_kernel, bn=bn),
        out_shape=jax.ShapeDtypeStruct((n // bn, bn, 128), f32),
        grid_spec=pltpu.PrefetchScalarGridSpec(
            num_scalar_prefetch=0,
            grid=(n // bn,),
            in_specs=[
                pl.BlockSpec((bn * 1024, 32), lambda i: (i, 0)),    # conv1 panel
                pl.BlockSpec((32, 32), lambda i: (0, 0)),           # w1
                pl.BlockSpec((1, 32), lambda i: (0, 0)),            # b1
                pl.BlockSpec((3, 96, 64), lambda i: (0, 0, 0)),     # w2 (per-ky)
                pl.BlockSpec((1, 64), lambda i: (0, 0)),            # b2
                pl.BlockSpec((3, 192, 128), lambda i: (0, 0, 0)),   # w3 (per-ky)
                pl.BlockSpec((1, 128), lambda i: (0, 0)),           # b3
                pl.BlockSpec((2048, 256), lambda i: (0, 0)),        # wf1 (NHWC rows)
                pl.BlockSpec((1, 256), lambda i: (0, 0)),           # bf1
                pl.BlockSpec((256, 128), lambda i: (0, 0)),         # wf2
                pl.BlockSpec((1, 128), lambda i: (0, 0)),           # bf2
                pl.BlockSpec((128, 128), lambda i: (0, 0)),         # wf3 (padded)
                pl.BlockSpec((1, 128), lambda i: (0, 0)),           # bf3 (padded)
            ],
            out_specs=pl.BlockSpec((1, bn, 128), lambda i: (i, 0, 0)),
            scratch_shapes=[
                pltpu.VMEM((bn * 512, 32), f32),    # layer-1 H-pooled rows
                pltpu.VMEM((bn * 128, 64), f32),    # layer-2 H-pooled rows
                pltpu.VMEM((bn * 32, 128), f32),    # layer-3 H-pooled rows
                pltpu.VMEM((bn, 18, 32, 32), f32),  # conv2 zero-haloed input
                pltpu.VMEM((bn, 10, 24, 64), f32),  # conv3 zero-haloed input
            ]),
        compiler_params=pltpu.CompilerParams(
            dimension_semantics=("parallel",),
            vmem_limit_bytes=32 * 1024 * 1024),
    )(panel, w1, b1, w2, b2, w3, b3, wf1, bf1, wf2, bf2, wf3, bf3)
    return out.reshape(n, 128)[:, :10]


# ------------------------------ params / ref -------------------------------- #

def init_params(key):
    ks = jax.random.split(key, 12)

    def conv_w(k, cin, cout):
        std = (2.0 / (9 * cin)) ** 0.5
        return jax.random.normal(k, (3, 3, cin, cout), jnp.float32) * std

    def lin_w(k, fin, fout):
        std = (2.0 / fin) ** 0.5
        return jax.random.normal(k, (fin, fout), jnp.float32) * std

    def bias(k, m):
        return jax.random.normal(k, (m,), jnp.float32) * 0.01

    return {
        "w1": conv_w(ks[0], 3, 32), "b1": bias(ks[1], 32),
        "w2": conv_w(ks[2], 32, 64), "b2": bias(ks[3], 64),
        "w3": conv_w(ks[4], 64, 128), "b3": bias(ks[5], 128),
        "wf1": lin_w(ks[6], 128 * 4 * 4, 256), "bf1": bias(ks[7], 256),
        "wf2": lin_w(ks[8], 256, 128), "bf2": bias(ks[9], 128),
        "wf3": lin_w(ks[10], 128, 10), "bf3": bias(ks[11], 10),
    }


def _reference_forward(params, x_nchw):
    """Pure-XLA f32 reference of the PyTorch module (for the self-check)."""
    dn = ("NHWC", "HWIO", "NHWC")

    def conv(x, w, b):
        return jax.lax.conv_general_dilated(x, w, (1, 1), "SAME",
                                            dimension_numbers=dn) + b

    def pool(x):
        return jax.lax.reduce_window(x, -jnp.inf, jax.lax.max,
                                     (1, 2, 2, 1), (1, 2, 2, 1), "VALID")

    x = jnp.transpose(x_nchw, (0, 2, 3, 1))
    x = pool(jax.nn.relu(conv(x, params["w1"], params["b1"])))
    x = pool(jax.nn.relu(conv(x, params["w2"], params["b2"])))
    x = pool(jax.nn.relu(conv(x, params["w3"], params["b3"])))
    n = x.shape[0]
    xf = jnp.transpose(x, (0, 3, 1, 2)).reshape(n, 128 * 4 * 4)   # NCHW flatten
    h = jax.nn.relu(xf @ params["wf1"] + params["bf1"])
    h = jax.nn.relu(h @ params["wf2"] + params["bf2"])
    return h @ params["wf3"] + params["bf3"]


# ---------------------------------- main ------------------------------------ #

if __name__ == "__main__":
    key = jax.random.PRNGKey(0)
    pkey, xkey = jax.random.split(key)
    params = init_params(pkey)
    # Spatial must be 32x32 so the flatten reaches 128*4*4, matching fc1.
    x = jax.random.normal(xkey, (2, 3, 32, 32), jnp.float32)

    out = jax.jit(cnnmodel_forward)(params, x)
    out = jax.block_until_ready(out)
    assert out.shape == (2, 10) and out.dtype == jnp.float32

    # Loose check vs the f32 XLA reference (kernel matmuls are bf16 / f32-acc).
    ref = jax.block_until_ready(jax.jit(_reference_forward)(params, x))
    err = float(jnp.max(jnp.abs(out - ref)))
    scale = float(jnp.max(jnp.abs(ref))) + 1.0
    assert err <= 0.08 * scale, f"mismatch: max|err|={err}, scale={scale}"
    print("KERNEL_OK")
</pallas_src>

<mosaic_0001>
module attributes {stable_mosaic.version = 11 : i64} {
  func.func @_cnn_kernel(%arg0: i32, %arg1: memref<1024x32xbf16, #tpu.memory_space<vmem>>, %arg2: memref<32x32xbf16, #tpu.memory_space<vmem>>, %arg3: memref<1x32xf32, #tpu.memory_space<vmem>>, %arg4: memref<3x96x64xbf16, #tpu.memory_space<vmem>>, %arg5: memref<1x64xf32, #tpu.memory_space<vmem>>, %arg6: memref<3x192x128xbf16, #tpu.memory_space<vmem>>, %arg7: memref<1x128xf32, #tpu.memory_space<vmem>>, %arg8: memref<2048x256xbf16, #tpu.memory_space<vmem>>, %arg9: memref<1x256xf32, #tpu.memory_space<vmem>>, %arg10: memref<256x128xbf16, #tpu.memory_space<vmem>>, %arg11: memref<1x128xf32, #tpu.memory_space<vmem>>, %arg12: memref<128x128xbf16, #tpu.memory_space<vmem>>, %arg13: memref<1x128xf32, #tpu.memory_space<vmem>>, %arg14: memref<1x1x128xf32, #tpu.memory_space<vmem>>, %arg15: memref<512x32xf32, #tpu.memory_space<vmem>>, %arg16: memref<128x64xf32, #tpu.memory_space<vmem>>, %arg17: memref<32x128xf32, #tpu.memory_space<vmem>>, %arg18: memref<1x18x32x32xf32, #tpu.memory_space<vmem>>, %arg19: memref<1x10x24x64xf32, #tpu.memory_space<vmem>>) attributes {dimension_semantics = [#tpu.dimension_semantics<parallel>], iteration_bounds = array<i64: 2>, scalar_prefetch = 0 : i64, scratch_operands = 5 : i64, tpu.core_type = #tpu.core_type<tc>, window_params = [{transform_indices = @transform_0, window_bounds = array<i64: 1024, 32>}, {pipeline_mode = #tpu.pipeline_mode<synchronous>, transform_indices = @transform_1, window_bounds = array<i64: 32, 32>}, {pipeline_mode = #tpu.pipeline_mode<synchronous>, transform_indices = @transform_2, window_bounds = array<i64: 1, 32>}, {pipeline_mode = #tpu.pipeline_mode<synchronous>, transform_indices = @transform_3, window_bounds = array<i64: 3, 96, 64>}, {pipeline_mode = #tpu.pipeline_mode<synchronous>, transform_indices = @transform_4, window_bounds = array<i64: 1, 64>}, {pipeline_mode = #tpu.pipeline_mode<synchronous>, transform_indices = @transform_5, window_bounds = array<i64: 3, 192, 128>}, {pipeline_mode = #tpu.pipeline_mode<synchronous>, transform_indices = @transform_6, window_bounds = array<i64: 1, 128>}, {pipeline_mode = #tpu.pipeline_mode<synchronous>, transform_indices = @transform_7, window_bounds = array<i64: 2048, 256>}, {pipeline_mode = #tpu.pipeline_mode<synchronous>, transform_indices = @transform_8, window_bounds = array<i64: 1, 256>}, {pipeline_mode = #tpu.pipeline_mode<synchronous>, transform_indices = @transform_9, window_bounds = array<i64: 256, 128>}, {pipeline_mode = #tpu.pipeline_mode<synchronous>, transform_indices = @transform_10, window_bounds = array<i64: 1, 128>}, {pipeline_mode = #tpu.pipeline_mode<synchronous>, transform_indices = @transform_11, window_bounds = array<i64: 128, 128>}, {pipeline_mode = #tpu.pipeline_mode<synchronous>, transform_indices = @transform_12, window_bounds = array<i64: 1, 128>}, {transform_indices = @transform_13, window_bounds = array<i64: 1, 1, 128>}]} {
    %c0 = arith.constant 0 : index
    %c0_0 = arith.constant 0 : index
    %0 = vector.load %arg1[%c0, %c0_0] : memref<1024x32xbf16, #tpu.memory_space<vmem>>, vector<1024x32xbf16>
    %c0_1 = arith.constant 0 : index
    %c0_2 = arith.constant 0 : index
    %1 = vector.load %arg2[%c0_1, %c0_2] : memref<32x32xbf16, #tpu.memory_space<vmem>>, vector<32x32xbf16>
    %cst = arith.constant dense<0.000000e+00> : vector<1024x32xf32>
    %2 = tpu.matmul %0, %1, %cst {dimension_numbers = #tpu.dot_dimension_numbers<[1], [0], [0], [1], [0, 0, 1, 1], [], []>} : vector<1024x32xbf16>, vector<32x32xbf16>, vector<1024x32xf32> -> vector<1024x32xf32>
    %c0_3 = arith.constant 0 : index
    %c0_4 = arith.constant 0 : index
    %3 = vector.load %arg3[%c0_3, %c0_4] : memref<1x32xf32, #tpu.memory_space<vmem>>, vector<1x32xf32>
    %4 = vector.broadcast %3 : vector<1x32xf32> to vector<1024x32xf32>
    %5 = arith.addf %2, %4 : vector<1024x32xf32>
    %cst_5 = arith.constant 0.000000e+00 : f32
    %6 = vector.broadcast %cst_5 : f32 to vector<1024x32xf32>
    %7 = arith.maximumf %5, %6 : vector<1024x32xf32>
    %8 = vector.shape_cast %7 : vector<1024x32xf32> to vector<16x2x32x32xf32>
    %9 = vector.extract_strided_slice %8 {offsets = [0, 0, 0, 0], sizes = [16, 1, 32, 32], strides = [1, 1, 1, 1]} : vector<16x2x32x32xf32> to vector<16x1x32x32xf32>
    %10 = vector.shape_cast %9 : vector<16x1x32x32xf32> to vector<16x32x32xf32>
    %11 = vector.extract_strided_slice %8 {offsets = [0, 1, 0, 0], sizes = [16, 1, 32, 32], strides = [1, 1, 1, 1]} : vector<16x2x32x32xf32> to vector<16x1x32x32xf32>
    %12 = vector.shape_cast %11 : vector<16x1x32x32xf32> to vector<16x32x32xf32>
    %13 = arith.maximumf %10, %12 : vector<16x32x32xf32>
    %14 = vector.shape_cast %13 : vector<16x32x32xf32> to vector<512x32xf32>
    %c0_6 = arith.constant 0 : index
    %c0_7 = arith.constant 0 : index
    %15 = vector.load %arg15[%c0_6, %c0_7] : memref<512x32xf32, #tpu.memory_space<vmem>>, vector<512x32xf32>
    tpu.vector_store %arg15[%c0_6, %c0_7], %14 {strides = array<i32>} : memref<512x32xf32, #tpu.memory_space<vmem>>, vector<512x32xf32>,
    %c0_8 = arith.constant 0 : index
    %c0_9 = arith.constant 0 : index
    %16 = tpu.strided_load %arg15[%c0_8, %c0_9] {strides = array<i32: 2, 1>} : memref<512x32xf32, #tpu.memory_space<vmem>>, vector<256x32xf32>
    %c1 = arith.constant 1 : index
    %c0_10 = arith.constant 0 : index
    %17 = tpu.strided_load %arg15[%c1, %c0_10] {strides = array<i32: 2, 1>} : memref<512x32xf32, #tpu.memory_space<vmem>>, vector<256x32xf32>
    %18 = arith.maximumf %16, %17 : vector<256x32xf32>
    %cst_11 = arith.constant 0.000000e+00 : f32
    %19 = vector.broadcast %cst_11 : f32 to vector<1x18x32x32xf32>
    %c0_12 = arith.constant 0 : index
    %c0_13 = arith.constant 0 : index
    %c0_14 = arith.constant 0 : index
    %c0_15 = arith.constant 0 : index
    %20 = vector.load %arg18[%c0_12, %c0_13, %c0_14, %c0_15] : memref<1x18x32x32xf32, #tpu.memory_space<vmem>>, vector<1x18x32x32xf32>
    tpu.vector_store %arg18[%c0_12, %c0_13, %c0_14, %c0_15], %19 {strides = array<i32>} : memref<1x18x32x32xf32, #tpu.memory_space<vmem>>, vector<1x18x32x32xf32>,
    %21 = vector.shape_cast %18 : vector<256x32xf32> to vector<1x16x16x32xf32>
    %c0_16 = arith.constant 0 : index
    %c1_17 = arith.constant 1 : index
    %c8 = arith.constant 8 : index
    %c0_18 = arith.constant 0 : index
    %22 = vector.load %arg18[%c0_16, %c1_17, %c8, %c0_18] : memref<1x18x32x32xf32, #tpu.memory_space<vmem>>, vector<1x16x16x32xf32>
    tpu.vector_store %arg18[%c0_16, %c1_17, %c8, %c0_18], %21 {strides = array<i32>} : memref<1x18x32x32xf32, #tpu.memory_space<vmem>>, vector<1x16x16x32xf32>,
    %c0_19 = arith.constant 0 : index
    %c0_20 = arith.constant 0 : index
    %c0_21 = arith.constant 0 : index
    %c0_22 = arith.constant 0 : index
    %23 = vector.load %arg18[%c0_19, %c0_20, %c0_21, %c0_22] : memref<1x18x32x32xf32, #tpu.memory_space<vmem>>, vector<1x18x32x32xf32>
    %24 = arith.truncf %23 : vector<1x18x32x32xf32> to vector<1x18x32x32xbf16>
    %cst_23 = arith.constant 0.000000e+00 : f32
    %25 = vector.broadcast %cst_23 : f32 to vector<256x64xf32>
    %26 = vector.extract_strided_slice %24 {offsets = [0, 0, 7, 0], sizes = [1, 16, 16, 32], strides = [1, 1, 1, 1]} : vector<1x18x32x32xbf16> to vector<1x16x16x32xbf16>
    %27 = vector.extract_strided_slice %24 {offsets = [0, 0, 8, 0], sizes = [1, 16, 16, 32], strides = [1, 1, 1, 1]} : vector<1x18x32x32xbf16> to vector<1x16x16x32xbf16>
    %28 = vector.extract_strided_slice %24 {offsets = [0, 0, 9, 0], sizes = [1, 16, 16, 32], strides = [1, 1, 1, 1]} : vector<1x18x32x32xbf16> to vector<1x16x16x32xbf16>
    %29 = tpu.concatenate %26, %27, %28 in 3 : vector<1x16x16x32xbf16>, vector<1x16x16x32xbf16>, vector<1x16x16x32xbf16> -> vector<1x16x16x96xbf16>
    %30 = vector.shape_cast %29 : vector<1x16x16x96xbf16> to vector<256x96xbf16>
    %c0_24 = arith.constant 0 : index
    %c0_25 = arith.constant 0 : index
    %c0_26 = arith.constant 0 : index
    %31 = vector.load %arg4[%c0_24, %c0_25, %c0_26] : memref<3x96x64xbf16, #tpu.memory_space<vmem>>, vector<1x96x64xbf16>
    %32 = vector.shape_cast %31 : vector<1x96x64xbf16> to vector<96x64xbf16>
    %cst_27 = arith.constant dense<0.000000e+00> : vector<256x64xf32>
    %33 = tpu.matmul %30, %32, %cst_27 {dimension_numbers = #tpu.dot_dimension_numbers<[1], [0], [0], [1], [0, 0, 1, 1], [], []>} : vector<256x96xbf16>, vector<96x64xbf16>, vector<256x64xf32> -> vector<256x64xf32>
    %34 = arith.addf %25, %33 : vector<256x64xf32>
    %35 = vector.extract_strided_slice %24 {offsets = [0, 1, 7, 0], sizes = [1, 16, 16, 32], strides = [1, 1, 1, 1]} : vector<1x18x32x32xbf16> to vector<1x16x16x32xbf16>
    %36 = vector.extract_strided_slice %24 {offsets = [0, 1, 8, 0], sizes = [1, 16, 16, 32], strides = [1, 1, 1, 1]} : vector<1x18x32x32xbf16> to vector<1x16x16x32xbf16>
    %37 = vector.extract_strided_slice %24 {offsets = [0, 1, 9, 0], sizes = [1, 16, 16, 32], strides = [1, 1, 1, 1]} : vector<1x18x32x32xbf16> to vector<1x16x16x32xbf16>
    %38 = tpu.concatenate %35, %36, %37 in 3 : vector<1x16x16x32xbf16>, vector<1x16x16x32xbf16>, vector<1x16x16x32xbf16> -> vector<1x16x16x96xbf16>
    %39 = vector.shape_cast %38 : vector<1x16x16x96xbf16> to vector<256x96xbf16>
    %c1_28 = arith.constant 1 : index
    %c0_29 = arith.constant 0 : index
    %c0_30 = arith.constant 0 : index
    %40 = vector.load %arg4[%c1_28, %c0_29, %c0_30] : memref<3x96x64xbf16, #tpu.memory_space<vmem>>, vector<1x96x64xbf16>
    %41 = vector.shape_cast %40 : vector<1x96x64xbf16> to vector<96x64xbf16>
    %cst_31 = arith.constant dense<0.000000e+00> : vector<256x64xf32>
    %42 = tpu.matmul %39, %41, %cst_31 {dimension_numbers = #tpu.dot_dimension_numbers<[1], [0], [0], [1], [0, 0, 1, 1], [], []>} : vector<256x96xbf16>, vector<96x64xbf16>, vector<256x64xf32> -> vector<256x64xf32>
    %43 = arith.addf %34, %42 : vector<256x64xf32>
    %44 = vector.extract_strided_slice %24 {offsets = [0, 2, 7, 0], sizes = [1, 16, 16, 32], strides = [1, 1, 1, 1]} : vector<1x18x32x32xbf16> to vector<1x16x16x32xbf16>
    %45 = vector.extract_strided_slice %24 {offsets = [0, 2, 8, 0], sizes = [1, 16, 16, 32], strides = [1, 1, 1, 1]} : vector<1x18x32x32xbf16> to vector<1x16x16x32xbf16>
    %46 = vector.extract_strided_slice %24 {offsets = [0, 2, 9, 0], sizes = [1, 16, 16, 32], strides = [1, 1, 1, 1]} : vector<1x18x32x32xbf16> to vector<1x16x16x32xbf16>
    %47 = tpu.concatenate %44, %45, %46 in 3 : vector<1x16x16x32xbf16>, vector<1x16x16x32xbf16>, vector<1x16x16x32xbf16> -> vector<1x16x16x96xbf16>
    %48 = vector.shape_cast %47 : vector<1x16x16x96xbf16> to vector<256x96xbf16>
    %c2 = arith.constant 2 : index
    %c0_32 = arith.constant 0 : index
    %c0_33 = arith.constant 0 : index
    %49 = vector.load %arg4[%c2, %c0_32, %c0_33] : memref<3x96x64xbf16, #tpu.memory_space<vmem>>, vector<1x96x64xbf16>
    %50 = vector.shape_cast %49 : vector<1x96x64xbf16> to vector<96x64xbf16>
    %cst_34 = arith.constant dense<0.000000e+00> : vector<256x64xf32>
    %51 = tpu.matmul %48, %50, %cst_34 {dimension_numbers = #tpu.dot_dimension_numbers<[1], [0], [0], [1], [0, 0, 1, 1], [], []>} : vector<256x96xbf16>, vector<96x64xbf16>, vector<256x64xf32> -> vector<256x64xf32>
    %52 = arith.addf %43, %51 : vector<256x64xf32>
    %c0_35 = arith.constant 0 : index
    %c0_36 = arith.constant 0 : index
    %53 = vector.load %arg5[%c0_35, %c0_36] : memref<1x64xf32, #tpu.memory_space<vmem>>, vector<1x64xf32>
    %54 = vector.broadcast %53 : vector<1x64xf32> to vector<256x64xf32>
    %55 = arith.addf %52, %54 : vector<256x64xf32>
    %cst_37 = arith.constant 0.000000e+00 : f32
    %56 = vector.broadcast %cst_37 : f32 to vector<256x64xf32>
    %57 = arith.maximumf %55, %56 : vector<256x64xf32>
    %58 = vector.shape_cast %57 : vector<256x64xf32> to vector<8x2x16x64xf32>
    %59 = vector.extract_strided_slice %58 {offsets = [0, 0, 0, 0], sizes = [8, 1, 16, 64], strides = [1, 1, 1, 1]} : vector<8x2x16x64xf32> to vector<8x1x16x64xf32>
    %60 = vector.shape_cast %59 : vector<8x1x16x64xf32> to vector<8x16x64xf32>
    %61 = vector.extract_strided_slice %58 {offsets = [0, 1, 0, 0], sizes = [8, 1, 16, 64], strides = [1, 1, 1, 1]} : vector<8x2x16x64xf32> to vector<8x1x16x64xf32>
    %62 = vector.shape_cast %61 : vector<8x1x16x64xf32> to vector<8x16x64xf32>
    %63 = arith.maximumf %60, %62 : vector<8x16x64xf32>
    %64 = vector.shape_cast %63 : vector<8x16x64xf32> to vector<128x64xf32>
    %c0_38 = arith.constant 0 : index
    %c0_39 = arith.constant 0 : index
    %65 = vector.load %arg16[%c0_38, %c0_39] : memref<128x64xf32, #tpu.memory_space<vmem>>, vector<128x64xf32>
    tpu.vector_store %arg16[%c0_38, %c0_39], %64 {strides = array<i32>} : memref<128x64xf32, #tpu.memory_space<vmem>>, vector<128x64xf32>,
    %c0_40 = arith.constant 0 : index
    %c0_41 = arith.constant 0 : index
    %66 = tpu.strided_load %arg16[%c0_40, %c0_41] {strides = array<i32: 2, 1>} : memref<128x64xf32, #tpu.memory_space<vmem>>, vector<64x64xf32>
    %c1_42 = arith.constant 1 : index
    %c0_43 = arith.constant 0 : index
    %67 = tpu.strided_load %arg16[%c1_42, %c0_43] {strides = array<i32: 2, 1>} : memref<128x64xf32, #tpu.memory_space<vmem>>, vector<64x64xf32>
    %68 = arith.maximumf %66, %67 : vector<64x64xf32>
    %cst_44 = arith.constant 0.000000e+00 : f32
    %69 = vector.broadcast %cst_44 : f32 to vector<1x10x24x64xf32>
    %c0_45 = arith.constant 0 : index
    %c0_46 = arith.constant 0 : index
    %c0_47 = arith.constant 0 : index
    %c0_48 = arith.constant 0 : index
    %70 = vector.load %arg19[%c0_45, %c0_46, %c0_47, %c0_48] : memref<1x10x24x64xf32, #tpu.memory_space<vmem>>, vector<1x10x24x64xf32>
    tpu.vector_store %arg19[%c0_45, %c0_46, %c0_47, %c0_48], %69 {strides = array<i32>} : memref<1x10x24x64xf32, #tpu.memory_space<vmem>>, vector<1x10x24x64xf32>,
    %71 = vector.shape_cast %68 : vector<64x64xf32> to vector<1x8x8x64xf32>
    %c0_49 = arith.constant 0 : index
    %c1_50 = arith.constant 1 : index
    %c8_51 = arith.constant 8 : index
    %c0_52 = arith.constant 0 : index
    %72 = vector.load %arg19[%c0_49, %c1_50, %c8_51, %c0_52] : memref<1x10x24x64xf32, #tpu.memory_space<vmem>>, vector<1x8x8x64xf32>
    tpu.vector_store %arg19[%c0_49, %c1_50, %c8_51, %c0_52], %71 {strides = array<i32>} : memref<1x10x24x64xf32, #tpu.memory_space<vmem>>, vector<1x8x8x64xf32>,
    %c0_53 = arith.constant 0 : index
    %c0_54 = arith.constant 0 : index
    %c0_55 = arith.constant 0 : index
    %c0_56 = arith.constant 0 : index
    %73 = vector.load %arg19[%c0_53, %c0_54, %c0_55, %c0_56] : memref<1x10x24x64xf32, #tpu.memory_space<vmem>>, vector<1x10x24x64xf32>
    %74 = arith.truncf %73 : vector<1x10x24x64xf32> to vector<1x10x24x64xbf16>
    %cst_57 = arith.constant 0.000000e+00 : f32
    %75 = vector.broadcast %cst_57 : f32 to vector<64x128xf32>
    %76 = vector.extract_strided_slice %74 {offsets = [0, 0, 7, 0], sizes = [1, 8, 8, 64], strides = [1, 1, 1, 1]} : vector<1x10x24x64xbf16> to vector<1x8x8x64xbf16>
    %77 = vector.extract_strided_slice %74 {offsets = [0, 0, 8, 0], sizes = [1, 8, 8, 64], strides = [1, 1, 1, 1]} : vector<1x10x24x64xbf16> to vector<1x8x8x64xbf16>
    %78 = vector.extract_strided_slice %74 {offsets = [0, 0, 9, 0], sizes = [1, 8, 8, 64], strides = [1, 1, 1, 1]} : vector<1x10x24x64xbf16> to vector<1x8x8x64xbf16>
    %79 = tpu.concatenate %76, %77, %78 in 3 : vector<1x8x8x64xbf16>, vector<1x8x8x64xbf16>, vector<1x8x8x64xbf16> -> vector<1x8x8x192xbf16>
    %80 = vector.shape_cast %79 : vector<1x8x8x192xbf16> to vector<64x192xbf16>
    %c0_58 = arith.constant 0 : index
    %c0_59 = arith.constant 0 : index
    %c0_60 = arith.constant 0 : index
    %81 = vector.load %arg6[%c0_58, %c0_59, %c0_60] : memref<3x192x128xbf16, #tpu.memory_space<vmem>>, vector<1x192x128xbf16>
    %82 = vector.shape_cast %81 : vector<1x192x128xbf16> to vector<192x128xbf16>
    %cst_61 = arith.constant dense<0.000000e+00> : vector<64x128xf32>
    %83 = tpu.matmul %80, %82, %cst_61 {dimension_numbers = #tpu.dot_dimension_numbers<[1], [0], [0], [1], [0, 0, 1, 1], [], []>} : vector<64x192xbf16>, vector<192x128xbf16>, vector<64x128xf32> -> vector<64x128xf32>
    %84 = arith.addf %75, %83 : vector<64x128xf32>
    %85 = vector.extract_strided_slice %74 {offsets = [0, 1, 7, 0], sizes = [1, 8, 8, 64], strides = [1, 1, 1, 1]} : vector<1x10x24x64xbf16> to vector<1x8x8x64xbf16>
    %86 = vector.extract_strided_slice %74 {offsets = [0, 1, 8, 0], sizes = [1, 8, 8, 64], strides = [1, 1, 1, 1]} : vector<1x10x24x64xbf16> to vector<1x8x8x64xbf16>
    %87 = vector.extract_strided_slice %74 {offsets = [0, 1, 9, 0], sizes = [1, 8, 8, 64], strides = [1, 1, 1, 1]} : vector<1x10x24x64xbf16> to vector<1x8x8x64xbf16>
    %88 = tpu.concatenate %85, %86, %87 in 3 : vector<1x8x8x64xbf16>, vector<1x8x8x64xbf16>, vector<1x8x8x64xbf16> -> vector<1x8x8x192xbf16>
    %89 = vector.shape_cast %88 : vector<1x8x8x192xbf16> to vector<64x192xbf16>
    %c1_62 = arith.constant 1 : index
    %c0_63 = arith.constant 0 : index
    %c0_64 = arith.constant 0 : index
    %90 = vector.load %arg6[%c1_62, %c0_63, %c0_64] : memref<3x192x128xbf16, #tpu.memory_space<vmem>>, vector<1x192x128xbf16>
    %91 = vector.shape_cast %90 : vector<1x192x128xbf16> to vector<192x128xbf16>
    %cst_65 = arith.constant dense<0.000000e+00> : vector<64x128xf32>
    %92 = tpu.matmul %89, %91, %cst_65 {dimension_numbers = #tpu.dot_dimension_numbers<[1], [0], [0], [1], [0, 0, 1, 1], [], []>} : vector<64x192xbf16>, vector<192x128xbf16>, vector<64x128xf32> -> vector<64x128xf32>
    %93 = arith.addf %84, %92 : vector<64x128xf32>
    %94 = vector.extract_strided_slice %74 {offsets = [0, 2, 7, 0], sizes = [1, 8, 8, 64], strides = [1, 1, 1, 1]} : vector<1x10x24x64xbf16> to vector<1x8x8x64xbf16>
    %95 = vector.extract_strided_slice %74 {offsets = [0, 2, 8, 0], sizes = [1, 8, 8, 64], strides = [1, 1, 1, 1]} : vector<1x10x24x64xbf16> to vector<1x8x8x64xbf16>
    %96 = vector.extract_strided_slice %74 {offsets = [0, 2, 9, 0], sizes = [1, 8, 8, 64], strides = [1, 1, 1, 1]} : vector<1x10x24x64xbf16> to vector<1x8x8x64xbf16>
    %97 = tpu.concatenate %94, %95, %96 in 3 : vector<1x8x8x64xbf16>, vector<1x8x8x64xbf16>, vector<1x8x8x64xbf16> -> vector<1x8x8x192xbf16>
    %98 = vector.shape_cast %97 : vector<1x8x8x192xbf16> to vector<64x192xbf16>
    %c2_66 = arith.constant 2 : index
    %c0_67 = arith.constant 0 : index
    %c0_68 = arith.constant 0 : index
    %99 = vector.load %arg6[%c2_66, %c0_67, %c0_68] : memref<3x192x128xbf16, #tpu.memory_space<vmem>>, vector<1x192x128xbf16>
    %100 = vector.shape_cast %99 : vector<1x192x128xbf16> to vector<192x128xbf16>
    %cst_69 = arith.constant dense<0.000000e+00> : vector<64x128xf32>
    %101 = tpu.matmul %98, %100, %cst_69 {dimension_numbers = #tpu.dot_dimension_numbers<[1], [0], [0], [1], [0, 0, 1, 1], [], []>} : vector<64x192xbf16>, vector<192x128xbf16>, vector<64x128xf32> -> vector<64x128xf32>
    %102 = arith.addf %93, %101 : vector<64x128xf32>
    %c0_70 = arith.constant 0 : index
    %c0_71 = arith.constant 0 : index
    %103 = vector.load %arg7[%c0_70, %c0_71] : memref<1x128xf32, #tpu.memory_space<vmem>>, vector<1x128xf32>
    %104 = vector.broadcast %103 : vector<1x128xf32> to vector<64x128xf32>
    %105 = arith.addf %102, %104 : vector<64x128xf32>
    %cst_72 = arith.constant 0.000000e+00 : f32
    %106 = vector.broadcast %cst_72 : f32 to vector<64x128xf32>
    %107 = arith.maximumf %105, %106 : vector<64x128xf32>
    %108 = vector.shape_cast %107 : vector<64x128xf32> to vector<4x2x8x128xf32>
    %109 = vector.extract_strided_slice %108 {offsets = [0, 0, 0, 0], sizes = [4, 1, 8, 128], strides = [1, 1, 1, 1]} : vector<4x2x8x128xf32> to vector<4x1x8x128xf32>
    %110 = vector.shape_cast %109 : vector<4x1x8x128xf32> to vector<4x8x128xf32>
    %111 = vector.extract_strided_slice %108 {offsets = [0, 1, 0, 0], sizes = [4, 1, 8, 128], strides = [1, 1, 1, 1]} : vector<4x2x8x128xf32> to vector<4x1x8x128xf32>
    %112 = vector.shape_cast %111 : vector<4x1x8x128xf32> to vector<4x8x128xf32>
    %113 = arith.maximumf %110, %112 : vector<4x8x128xf32>
    %114 = vector.shape_cast %113 : vector<4x8x128xf32> to vector<32x128xf32>
    %c0_73 = arith.constant 0 : index
    %c0_74 = arith.constant 0 : index
    %115 = vector.load %arg17[%c0_73, %c0_74] : memref<32x128xf32, #tpu.memory_space<vmem>>, vector<32x128xf32>
    tpu.vector_store %arg17[%c0_73, %c0_74], %114 {strides = array<i32>} : memref<32x128xf32, #tpu.memory_space<vmem>>, vector<32x128xf32>,
    %c0_75 = arith.constant 0 : index
    %c0_76 = arith.constant 0 : index
    %116 = tpu.strided_load %arg17[%c0_75, %c0_76] {strides = array<i32: 2, 1>} : memref<32x128xf32, #tpu.memory_space<vmem>>, vector<16x128xf32>
    %c1_77 = arith.constant 1 : index
    %c0_78 = arith.constant 0 : index
    %117 = tpu.strided_load %arg17[%c1_77, %c0_78] {strides = array<i32: 2, 1>} : memref<32x128xf32, #tpu.memory_space<vmem>>, vector<16x128xf32>
    %118 = arith.maximumf %116, %117 : vector<16x128xf32>
    %119 = arith.truncf %118 : vector<16x128xf32> to vector<16x128xbf16>
    %120 = vector.shape_cast %119 : vector<16x128xbf16> to vector<1x16x128xbf16>
    %121 = vector.extract_strided_slice %120 {offsets = [0, 0, 0], sizes = [1, 1, 128], strides = [1, 1, 1]} : vector<1x16x128xbf16> to vector<1x1x128xbf16>
    %122 = vector.shape_cast %121 : vector<1x1x128xbf16> to vector<1x128xbf16>
    %123 = vector.extract_strided_slice %120 {offsets = [0, 1, 0], sizes = [1, 1, 128], strides = [1, 1, 1]} : vector<1x16x128xbf16> to vector<1x1x128xbf16>
    %124 = vector.shape_cast %123 : vector<1x1x128xbf16> to vector<1x128xbf16>
    %125 = vector.extract_strided_slice %120 {offsets = [0, 2, 0], sizes = [1, 1, 128], strides = [1, 1, 1]} : vector<1x16x128xbf16> to vector<1x1x128xbf16>
    %126 = vector.shape_cast %125 : vector<1x1x128xbf16> to vector<1x128xbf16>
    %127 = vector.extract_strided_slice %120 {offsets = [0, 3, 0], sizes = [1, 1, 128], strides = [1, 1, 1]} : vector<1x16x128xbf16> to vector<1x1x128xbf16>
    %128 = vector.shape_cast %127 : vector<1x1x128xbf16> to vector<1x128xbf16>
    %129 = vector.extract_strided_slice %120 {offsets = [0, 4, 0], sizes = [1, 1, 128], strides = [1, 1, 1]} : vector<1x16x128xbf16> to vector<1x1x128xbf16>
    %130 = vector.shape_cast %129 : vector<1x1x128xbf16> to vector<1x128xbf16>
    %131 = vector.extract_strided_slice %120 {offsets = [0, 5, 0], sizes = [1, 1, 128], strides = [1, 1, 1]} : vector<1x16x128xbf16> to vector<1x1x128xbf16>
    %132 = vector.shape_cast %131 : vector<1x1x128xbf16> to vector<1x128xbf16>
    %133 = vector.extract_strided_slice %120 {offsets = [0, 6, 0], sizes = [1, 1, 128], strides = [1, 1, 1]} : vector<1x16x128xbf16> to vector<1x1x128xbf16>
    %134 = vector.shape_cast %133 : vector<1x1x128xbf16> to vector<1x128xbf16>
    %135 = vector.extract_strided_slice %120 {offsets = [0, 7, 0], sizes = [1, 1, 128], strides = [1, 1, 1]} : vector<1x16x128xbf16> to vector<1x1x128xbf16>
    %136 = vector.shape_cast %135 : vector<1x1x128xbf16> to vector<1x128xbf16>
    %137 = vector.extract_strided_slice %120 {offsets = [0, 8, 0], sizes = [1, 1, 128], strides = [1, 1, 1]} : vector<1x16x128xbf16> to vector<1x1x128xbf16>
    %138 = vector.shape_cast %137 : vector<1x1x128xbf16> to vector<1x128xbf16>
    %139 = vector.extract_strided_slice %120 {offsets = [0, 9, 0], sizes = [1, 1, 128], strides = [1, 1, 1]} : vector<1x16x128xbf16> to vector<1x1x128xbf16>
    %140 = vector.shape_cast %139 : vector<1x1x128xbf16> to vector<1x128xbf16>
    %141 = vector.extract_strided_slice %120 {offsets = [0, 10, 0], sizes = [1, 1, 128], strides = [1, 1, 1]} : vector<1x16x128xbf16> to vector<1x1x128xbf16>
    %142 = vector.shape_cast %141 : vector<1x1x128xbf16> to vector<1x128xbf16>
    %143 = vector.extract_strided_slice %120 {offsets = [0, 11, 0], sizes = [1, 1, 128], strides = [1, 1, 1]} : vector<1x16x128xbf16> to vector<1x1x128xbf16>
    %144 = vector.shape_cast %143 : vector<1x1x128xbf16> to vector<1x128xbf16>
    %145 = vector.extract_strided_slice %120 {offsets = [0, 12, 0], sizes = [1, 1, 128], strides = [1, 1, 1]} : vector<1x16x128xbf16> to vector<1x1x128xbf16>
    %146 = vector.shape_cast %145 : vector<1x1x128xbf16> to vector<1x128xbf16>
    %147 = vector.extract_strided_slice %120 {offsets = [0, 13, 0], sizes = [1, 1, 128], strides = [1, 1, 1]} : vector<1x16x128xbf16> to vector<1x1x128xbf16>
    %148 = vector.shape_cast %147 : vector<1x1x128xbf16> to vector<1x128xbf16>
    %149 = vector.extract_strided_slice %120 {offsets = [0, 14, 0], sizes = [1, 1, 128], strides = [1, 1, 1]} : vector<1x16x128xbf16> to vector<1x1x128xbf16>
    %150 = vector.shape_cast %149 : vector<1x1x128xbf16> to vector<1x128xbf16>
    %151 = vector.extract_strided_slice %120 {offsets = [0, 15, 0], sizes = [1, 1, 128], strides = [1, 1, 1]} : vector<1x16x128xbf16> to vector<1x1x128xbf16>
    %152 = vector.shape_cast %151 : vector<1x1x128xbf16> to vector<1x128xbf16>
    %153 = tpu.concatenate %122, %124, %126, %128, %130, %132, %134, %136, %138, %140, %142, %144, %146, %148, %150, %152 in 1 : vector<1x128xbf16>, vector<1x128xbf16>, vector<1x128xbf16>, vector<1x128xbf16>, vector<1x128xbf16>, vector<1x128xbf16>, vector<1x128xbf16>, vector<1x128xbf16>, vector<1x128xbf16>, vector<1x128xbf16>, vector<1x128xbf16>, vector<1x128xbf16>, vector<1x128xbf16>, vector<1x128xbf16>, vector<1x128xbf16>, vector<1x128xbf16> -> vector<1x2048xbf16>
    %c0_79 = arith.constant 0 : index
    %c0_80 = arith.constant 0 : index
    %154 = vector.load %arg8[%c0_79, %c0_80] : memref<2048x256xbf16, #tpu.memory_space<vmem>>, vector<2048x256xbf16>
    %cst_81 = arith.constant dense<0.000000e+00> : vector<1x256xf32>
    %155 = tpu.matmul %153, %154, %cst_81 {dimension_numbers = #tpu.dot_dimension_numbers<[1], [0], [0], [1], [0, 0, 1, 1], [], []>} : vector<1x2048xbf16>, vector<2048x256xbf16>, vector<1x256xf32> -> vector<1x256xf32>
    %c0_82 = arith.constant 0 : index
    %c0_83 = arith.constant 0 : index
    %156 = vector.load %arg9[%c0_82, %c0_83] : memref<1x256xf32, #tpu.memory_space<vmem>>, vector<1x256xf32>
    %157 = arith.addf %155, %156 : vector<1x256xf32>
    %cst_84 = arith.constant 0.000000e+00 : f32
    %158 = vector.broadcast %cst_84 : f32 to vector<1x256xf32>
    %159 = arith.maximumf %157, %158 : vector<1x256xf32>
    %160 = arith.truncf %159 : vector<1x256xf32> to vector<1x256xbf16>
    %c0_85 = arith.constant 0 : index
    %c0_86 = arith.constant 0 : index
    %161 = vector.load %arg10[%c0_85, %c0_86] : memref<256x128xbf16, #tpu.memory_space<vmem>>, vector<256x128xbf16>
    %cst_87 = arith.constant dense<0.000000e+00> : vector<1x128xf32>
    %162 = tpu.matmul %160, %161, %cst_87 {dimension_numbers = #tpu.dot_dimension_numbers<[1], [0], [0], [1], [0, 0, 1, 1], [], []>} : vector<1x256xbf16>, vector<256x128xbf16>, vector<1x128xf32> -> vector<1x128xf32>
    %c0_88 = arith.constant 0 : index
    %c0_89 = arith.constant 0 : index
    %163 = vector.load %arg11[%c0_88, %c0_89] : memref<1x128xf32, #tpu.memory_space<vmem>>, vector<1x128xf32>
    %164 = arith.addf %162, %163 : vector<1x128xf32>
    %cst_90 = arith.constant 0.000000e+00 : f32
    %165 = vector.broadcast %cst_90 : f32 to vector<1x128xf32>
    %166 = arith.maximumf %164, %165 : vector<1x128xf32>
    %167 = arith.truncf %166 : vector<1x128xf32> to vector<1x128xbf16>
    %c0_91 = arith.constant 0 : index
    %c0_92 = arith.constant 0 : index
    %168 = vector.load %arg12[%c0_91, %c0_92] : memref<128x128xbf16, #tpu.memory_space<vmem>>, vector<128x128xbf16>
    %cst_93 = arith.constant dense<0.000000e+00> : vector<1x128xf32>
    %169 = tpu.matmul %167, %168, %cst_93 {dimension_numbers = #tpu.dot_dimension_numbers<[1], [0], [0], [1], [0, 0, 1, 1], [], []>} : vector<1x128xbf16>, vector<128x128xbf16>, vector<1x128xf32> -> vector<1x128xf32>
    %c0_94 = arith.constant 0 : index
    %c0_95 = arith.constant 0 : index
    %170 = vector.load %arg13[%c0_94, %c0_95] : memref<1x128xf32, #tpu.memory_space<vmem>>, vector<1x128xf32>
    %171 = arith.addf %169, %170 : vector<1x128xf32>
    %172 = vector.shape_cast %171 : vector<1x128xf32> to vector<1x1x128xf32>
    %c0_96 = arith.constant 0 : index
    %c0_97 = arith.constant 0 : index
    %c0_98 = arith.constant 0 : index
    %173 = vector.load %arg14[%c0_96, %c0_97, %c0_98] : memref<1x1x128xf32, #tpu.memory_space<vmem>>, vector<1x1x128xf32>
    tpu.vector_store %arg14[%c0_96, %c0_97, %c0_98], %172 {strides = array<i32>} : memref<1x1x128xf32, #tpu.memory_space<vmem>>, vector<1x1x128xf32>,
    return
  }
  func.func @transform_0(%arg0: i32) -> (i32, i32) {
    %c0_i32 = arith.constant 0 : i32
    %c0_i32_0 = arith.constant 0 : i32
    return %arg0, %c0_i32 : i32, i32
  }
  func.func @transform_1(%arg0: i32) -> (i32, i32) {
    %c0_i32 = arith.constant 0 : i32
    %c0_i32_0 = arith.constant 0 : i32
    %c0_i32_1 = arith.constant 0 : i32
    return %c0_i32, %c0_i32_0 : i32, i32
  }
  func.func @transform_2(%arg0: i32) -> (i32, i32) {
    %c0_i32 = arith.constant 0 : i32
    %c0_i32_0 = arith.constant 0 : i32
    %c0_i32_1 = arith.constant 0 : i32
    return %c0_i32, %c0_i32_0 : i32, i32
  }
  func.func @transform_3(%arg0: i32) -> (i32, i32, i32) {
    %c0_i32 = arith.constant 0 : i32
    %c0_i32_0 = arith.constant 0 : i32
    %c0_i32_1 = arith.constant 0 : i32
    %c0_i32_2 = arith.constant 0 : i32
    return %c0_i32, %c0_i32_0, %c0_i32_1 : i32, i32, i32
  }
  func.func @transform_4(%arg0: i32) -> (i32, i32) {
    %c0_i32 = arith.constant 0 : i32
    %c0_i32_0 = arith.constant 0 : i32
    %c0_i32_1 = arith.constant 0 : i32
    return %c0_i32, %c0_i32_0 : i32, i32
  }
  func.func @transform_5(%arg0: i32) -> (i32, i32, i32) {
    %c0_i32 = arith.constant 0 : i32
    %c0_i32_0 = arith.constant 0 : i32
    %c0_i32_1 = arith.constant 0 : i32
    %c0_i32_2 = arith.constant 0 : i32
    return %c0_i32, %c0_i32_0, %c0_i32_1 : i32, i32, i32
  }
  func.func @transform_6(%arg0: i32) -> (i32, i32) {
    %c0_i32 = arith.constant 0 : i32
    %c0_i32_0 = arith.constant 0 : i32
    %c0_i32_1 = arith.constant 0 : i32
    return %c0_i32, %c0_i32_0 : i32, i32
  }
  func.func @transform_7(%arg0: i32) -> (i32, i32) {
    %c0_i32 = arith.constant 0 : i32
    %c0_i32_0 = arith.constant 0 : i32
    %c0_i32_1 = arith.constant 0 : i32
    return %c0_i32, %c0_i32_0 : i32, i32
  }
  func.func @transform_8(%arg0: i32) -> (i32, i32) {
    %c0_i32 = arith.constant 0 : i32
    %c0_i32_0 = arith.constant 0 : i32
    %c0_i32_1 = arith.constant 0 : i32
    return %c0_i32, %c0_i32_0 : i32, i32
  }
  func.func @transform_9(%arg0: i32) -> (i32, i32) {
    %c0_i32 = arith.constant 0 : i32
    %c0_i32_0 = arith.constant 0 : i32
    %c0_i32_1 = arith.constant 0 : i32
    return %c0_i32, %c0_i32_0 : i32, i32
  }
  func.func @transform_10(%arg0: i32) -> (i32, i32) {
    %c0_i32 = arith.constant 0 : i32
    %c0_i32_0 = arith.constant 0 : i32
    %c0_i32_1 = arith.constant 0 : i32
    return %c0_i32, %c0_i32_0 : i32, i32
  }
  func.func @transform_11(%arg0: i32) -> (i32, i32) {
    %c0_i32 = arith.constant 0 : i32
    %c0_i32_0 = arith.constant 0 : i32
    %c0_i32_1 = arith.constant 0 : i32
    return %c0_i32, %c0_i32_0 : i32, i32
  }
  func.func @transform_12(%arg0: i32) -> (i32, i32) {
    %c0_i32 = arith.constant 0 : i32
    %c0_i32_0 = arith.constant 0 : i32
    %c0_i32_1 = arith.constant 0 : i32
    return %c0_i32, %c0_i32_0 : i32, i32
  }
  func.func @transform_13(%arg0: i32) -> (i32, i32, i32) {
    %c0_i32 = arith.constant 0 : i32
    %c0_i32_0 = arith.constant 0 : i32
    %c0_i32_1 = arith.constant 0 : i32
    return %arg0, %c0_i32, %c0_i32_0 : i32, i32, i32
  }
}

</mosaic_0001>

<bundles_post_ra>
// kernel: cnnmodel_forward.1
= control target key start
LH: loop header
LB: loop body
LE: loop exit
PB: predicated region body
PF: predicated region fallthrough
CT: control target
= control target key end

     0   :  { %s11919_s0 = inlined_call_operand.vmem [shape: bf16[2048,32], index: 0, kind: input, shape index: {}]   ;;  %s11920_s1 = inlined_call_operand.vmem [shape: bf16[32,32], index: 1, kind: input, shape index: {}]   ;;  %s11921_s2 = inlined_call_operand.vmem [shape: f32[1,32], index: 2, kind: input, shape index: {}]   ;;  %s11922_s3 = inlined_call_operand.vmem [shape: bf16[3,96,64], index: 3, kind: input, shape index: {}]   ;;  %s11923_s4 = inlined_call_operand.vmem [shape: f32[1,64], index: 4, kind: input, shape index: {}]   ;;  %s11924_s5 = inlined_call_operand.vmem [shape: bf16[3,192,128], index: 5, kind: input, shape index: {}]   ;;  %s11925_s6 = inlined_call_operand.vmem [shape: f32[1,128], index: 6, kind: input, shape index: {}]   ;;  %s11926_s7 = inlined_call_operand.vmem [shape: bf16[2048,256], index: 7, kind: input, shape index: {}]   ;;  %s11927_s8 = inlined_call_operand.vmem [shape: f32[1,256], index: 8, kind: input, shape index: {}]   ;;  %s11928_s9 = inlined_call_operand.vmem [shape: bf16[256,128], index: 9, kind: input, shape index: {}]   ;;  %s11929_s10 = inlined_call_operand.vmem [shape: f32[1,128], index: 10, kind: input, shape index: {}]   ;;  %s11930_s11 = inlined_call_operand.vmem [shape: bf16[128,128], index: 11, kind: input, shape index: {}]   ;;  %s11931_s12 = inlined_call_operand.vmem [shape: f32[1,128], index: 12, kind: input, shape index: {}]   ;;  %s11932_s13 = inlined_call_operand.hbm [shape: f32[2,1,128], index: 13, kind: output, shape index: {}]  }
   0x1   :  { %11937 = sst [smem:[#allocation22_spill]] %s11919_s0 }
   0x2   :  { %11938 = sst [smem:[#allocation23_spill]] %s11920_s1 }
   0x3   :  { %18 = vsyncpa [#allocation8], 0 }
   0x4   :  { %20 = vsyncpa [#allocation8 + $0x1], 0  ;;  %s9191_s25 = smov 0   ;;  %s9193_s26 = smov 0  }
   0x5   :  { %s9195_s27 = smov 0   ;;  %s9197_s28 = smov 0  }
   0x6 LB: > { %s9212_s29 = sadd.s32 4294967295, %s9113_s28   ;;  %s7376_s30 = sadd.s32 4294967294, %s9113_s28   ;;  %s9113_s28 = sphi %s9197_s28, %s11974_s28   ;;  %s9109_s27 = sphi %s9195_s27, %s11973_s27   ;;  %s9105_s26 = sphi %s9193_s26, %s11972_s26   ;;  %s9101_s25 = sphi %s9191_s25, %s11971_s25  }
   0x7   : > { %s9216_s14 = sadd.s32 1, %s9113_s28   ;;  %s311_s15 = sadd.s32 1, %s9109_s27 }
   0x8   : > { %s308_s16 = ssub.s32 %s9113_s28, %s9216_s14  ;;  %p321_p0 = scmp.ne.s32.totalorder %s9109_s27, %s9105_s26 }
   0x9   : > { %p309_p1 = scmp.eq.s32.totalorder %s308_s16, 0  ;;  %p322_p2 = scmp.eq.s32.totalorder %s9212_s29, 1 }
   0xa   : > { %p327_p3 = scmp.ne.s32.totalorder %s9105_s26, %s9101_s25  ;;  %p328_p4 = scmp.eq.s32.totalorder %s7376_s30, 1 }
   0xb   : > { %s9227_s17 = scalar_select %p309_p1, %s9109_s27, %s311_s15  }
   0xc   : > { %p9229_p5 = por %p322_p2, %p321_p0  ;;  %p9233_p6 = por %p328_p4, %p327_p3 }
   0xd   : > { %11939 = sst [smem:[#allocation10_spill]] %s9227_s17  ;;  %p7379_p7 = scmp.ge.s32.totalorder %s9113_s28, 1 }
   0xe   : > { %p391_p8 = scmp.lt.s32.totalorder %s9113_s28, 3 }
  0x10   : > { %p392_p9 = pnand %p7379_p7, %p391_p8 }
  0x12   : > { %395 = sbr.rel (%p392_p9) target bundleno = 2191 (0x88f), region = 72 }
  0x17   : > { %s11942_s1 = sld [smem:[#allocation23_spill]]  ;;  %s7380_s22 = sshll.u32 %s9212_s29, 7  ;;  %vm912_vm0 = vcmask 261120   ;;  %v11933_v28 = vmov 0.0   ;;  %v9503_v55 = vld [vmem:[%s11921_s2] ss:$0 sm:$0xff] }
  0x18   : > { %p435_p10 = scmp.lt.s32.totalorder %s7380_s22, 255  ;;  %s11943_s0 = sld [smem:[#allocation22_spill]]  ;;  %2070 = vst.msk [vmem:[#allocation5 + $0x28] sm:$0xff] %vm912_vm0, %v11933_v28  ;;  %2065 = vst.msk [vmem:[#allocation5] sm:$0xff] %vm912_vm0, %v11933_v28  ;;  %vm2792_vm1 = vcmask 523264   ;;  %vm2615_vm2 = vcmask 1046528  }
  0x19   : > { %2066 = vst.msk [vmem:[#allocation5 + $0x8] sm:$0xff] %vm912_vm0, %v11933_v28  ;;  %2067 = vst.msk [vmem:[#allocation5 + $0x10] sm:$0xff] %vm912_vm0, %v11933_v28  ;;  %s9116_s15 = smov 64   ;;  %s9117_s21 = smov 32   ;;  %vm2278_vm3 = vsmask.f32 7424 }
  0x1a   : > { %s11976_s22 = smov (!%p435_p10, %s7380_s22), 255  ;;  %2068 = vst.msk [vmem:[#allocation5 + $0x18] sm:$0xff] %vm912_vm0, %v11933_v28  ;;  %2069 = vst.msk [vmem:[#allocation5 + $0x20] sm:$0xff] %vm912_vm0, %v11933_v28  ;;  %vm2857_vm4 = vsmask.f32 4352  ;;  %vm3210_vm5 = vcmask 785408  }
  0x1b   : > { %s7381_s30 = sshll.u32 %s11976_s22, 2  ;;  %2071 = vst.msk [vmem:[#allocation5 + $0x30] sm:$0xff] %vm912_vm0, %v11933_v28  ;;  %2072 = vst.msk [vmem:[#allocation5 + $0x38] sm:$0xff] %vm912_vm0, %v11933_v28  ;;  %vm4331_vm6 = vsmask.f32 256  ;;  %vm9119_vm9 = vmmov 0  }
  0x1c   : > { %2073 = vst.msk [vmem:[#allocation5 + $0x40] sm:$0xff] %vm912_vm0, %v11933_v28  ;;  %2074 = vst.msk [vmem:[#allocation5 + $0x48] sm:$0xff] %vm912_vm0, %v11933_v28  ;;  %vm4332_vm7 = vsmask.f32 4368  ;;  %s432_s23 = sand.u32 1, %s9105_s26  }
  0x1d   : > { %v8523_v0 = vld [vmem:[%s11942_s1 + $0x8] sm:$0xff]   ;;  %v8524_v1 = vld [vmem:[%s11942_s1] sm:$0xff]   ;;  %2075 = vst.msk [vmem:[#allocation5 + $0x50] sm:$0xff] %vm912_vm0, %v11933_v28  ;;  %2076 = vst.msk [vmem:[#allocation5 + $0x58] sm:$0xff] %vm912_vm0, %v11933_v28  ;;  %s433_s24 = scalar_lea.vmem [#allocation7], %s432_s23  ;;  %s7309_s22 = scalar_lea.sflag [#allocation8], %s432_s23 }
  0x1e   : > { %8195 = vmatprep.subr.bf16.mxu0 %v8523_v0  ;;  %s9249_s17 = scalar_lea.vmem %s11943_s0, %s7381_s30  ;;  %2077 = vst.msk [vmem:[#allocation5 + $0x60] sm:$0xff] %vm912_vm0, %v11933_v28  ;;  %2078 = vst.msk [vmem:[#allocation5 + $0x68] sm:$0xff] %vm912_vm0, %v11933_v28  ;;  %s7321_s30 = sshll.u32 %s433_s24, 4  ;;  %s11880_s30 = int_to_ptr.vmem [resolvable:$true] %s7321_s30 }
  0x1f   : > { %8196 = vmatpush3.bf16.msra.mxu0 %v8523_v0  ;;  %v8525_v2 = vld [vmem:[%s9249_s17] sm:$0xff]   ;;  %v8526_v3 = vld [vmem:[%s9249_s17 + $0x8] sm:$0xff]   ;;  %v8527_v4 = vld [vmem:[%s9249_s17 + $0x10] sm:$0xff]   ;;  %2079 = vst.msk [vmem:[#allocation5 + $0x70] sm:$0xff] %vm912_vm0, %v11933_v28  ;;  %s9053_s0 = scalar_lea.vmem %s11880_s30, 16 }
  0x20   : > { %8197 = vmatprep.subr.bf16.mxu0 %v8524_v1  ;;  %8199 = vmatprep.mubr.msk.bf16.mxu0 %vm912_vm0, %v8525_v2  ;;  %v8528_v5 = vld [vmem:[%s9249_s17 + $0x18] sm:$0xff]   ;;  %v8529_v6 = vld [vmem:[%s9249_s17 + $0x20] sm:$0xff]   ;;  %v8530_v7 = vld [vmem:[%s9249_s17 + $0x28] sm:$0xff]   ;;  %2080 = vst.msk [vmem:[#allocation5 + $0x78] sm:$0xff] %vm912_vm0, %v11933_v28  ;;  %p9054_p11 = scmp.ne.s32.totalorder %s11880_s30, %s9053_s0 }
  0x21   : > { %v8531_v8 = vld [vmem:[%s9249_s17 + $0x30] sm:$0xff]   ;;  %v8532_v9 = vld [vmem:[%s9249_s17 + $0x38] sm:$0xff]   ;;  %v8533_v10 = vld [vmem:[%s9249_s17 + $0x40] sm:$0xff]   ;;  %2081 = vst.msk [vmem:[#allocation5 + $0x80] sm:$0xff] %vm912_vm0, %v11933_v28 }
  0x22   : > { %v8534_v11 = vld [vmem:[%s9249_s17 + $0x48] sm:$0xff]   ;;  %v8535_v12 = vld [vmem:[%s9249_s17 + $0x50] sm:$0xff]   ;;  %v8536_v13 = vld [vmem:[%s9249_s17 + $0x58] sm:$0xff]   ;;  %2082 = vst.msk [vmem:[#allocation5 + $0x88] sm:$0xff] %vm912_vm0, %v11933_v28  ;;  %p9055_p12 = pnand %p9054_p11, %p9229_p5 }
  0x23   : > { %8198 = vmatpush3.bf16.msra.mxu0 %v8524_v1  ;;  %v8537_v14 = vld [vmem:[%s9249_s17 + $0x60] sm:$0xff]   ;;  %v8538_v15 = vld [vmem:[%s9249_s17 + $0x68] sm:$0xff]   ;;  %v8539_v16 = vld [vmem:[%s9249_s17 + $0x70] sm:$0xff]   ;;  %2083 = vst.msk [vmem:[#allocation5 + $0x90] sm:$0xff] %vm912_vm0, %v11933_v28 }
  0x24   : > { %v8540_v17 = vld [vmem:[%s9249_s17 + $0x78] sm:$0xff]   ;;  %v8541_v18 = vld [vmem:[%s9249_s17 + $0x80] sm:$0xff]   ;;  %v8542_v19 = vld [vmem:[%s9249_s17 + $0x88] sm:$0xff]   ;;  %2084 = vst.msk [vmem:[#allocation5 + $0x98] sm:$0xff] %vm912_vm0, %v11933_v28  ;;  %p9056_p13 = pneg %p9055_p12 }
  0x25   : > { %v8543_v20 = vld [vmem:[%s9249_s17 + $0x90] sm:$0xff]   ;;  %v8544_v21 = vld [vmem:[%s9249_s17 + $0x98] sm:$0xff]   ;;  %v8545_v22 = vld [vmem:[%s9249_s17 + $0xa0] sm:$0xff]   ;;  %2085 = vst.msk [vmem:[#allocation5 + $0xa0] sm:$0xff] %vm912_vm0, %v11933_v28 }
  0x26   : > { %8200 = vmatmul.mubr.msk.bf16.vlgmr.msra.gmra.mxu0 %vm912_vm0, %v8526_v3  ;;  %v8546_v23 = vld [vmem:[%s9249_s17 + $0xa8] sm:$0xff]   ;;  %v8547_v24 = vld [vmem:[%s9249_s17 + $0xb0] sm:$0xff]   ;;  %v8548_v25 = vld [vmem:[%s9249_s17 + $0xb8] sm:$0xff]   ;;  %2086 = vst.msk [vmem:[#allocation5 + $0xa8] sm:$0xff] %vm912_vm0, %v11933_v28 }
  0x27   : > { %8203 = vmatprep.mubr.msk.bf16.mxu0 %vm912_vm0, %v8527_v4  ;;  %v8549_v26 = vld [vmem:[%s9249_s17 + $0xc0] sm:$0xff]   ;;  %v9302_v27 = vld [vmem:[%s9249_s17 + $0xc8] sm:$0xff]   ;;  %2087 = vst.msk [vmem:[#allocation5 + $0xb0] sm:$0xff] %vm912_vm0, %v11933_v28  ;;  %2088 = vst.msk [vmem:[#allocation5 + $0xb8] sm:$0xff] %vm912_vm0, %v11933_v28 }
  0x28   : > { %2089 = vst.msk [vmem:[#allocation5 + $0xc0] sm:$0xff] %vm912_vm0, %v11933_v28  ;;  %2090 = vst.msk [vmem:[#allocation5 + $0xc8] sm:$0xff] %vm912_vm0, %v11933_v28  ;;  %v8551_v29 = vld [vmem:[%s9249_s17 + $0xd0] sm:$0xff]   ;;  %v8552_v30 = vld [vmem:[%s9249_s17 + $0xd8] sm:$0xff]  }
  0x29   : > { %2091 = vst.msk [vmem:[#allocation5 + $0xd0] sm:$0xff] %vm912_vm0, %v11933_v28  ;;  %2092 = vst.msk [vmem:[#allocation5 + $0xd8] sm:$0xff] %vm912_vm0, %v11933_v28  ;;  %v8553_v31 = vld [vmem:[%s9249_s17 + $0xe0] sm:$0xff]   ;;  %v8554_v32 = vld [vmem:[%s9249_s17 + $0xe8] sm:$0xff]  }
  0x2a   : > { %2093 = vst.msk [vmem:[#allocation5 + $0xe0] sm:$0xff] %vm912_vm0, %v11933_v28  ;;  %2094 = vst.msk [vmem:[#allocation5 + $0xe8] sm:$0xff] %vm912_vm0, %v11933_v28  ;;  %v8555_v33 = vld [vmem:[%s9249_s17 + $0xf0] sm:$0xff]   ;;  %v8556_v34 = vld [vmem:[%s9249_s17 + $0xf8] sm:$0xff]  }
  0x2b   : > { %2095 = vst.msk [vmem:[#allocation5 + $0xf0] sm:$0xff] %vm912_vm0, %v11933_v28  ;;  %2096 = vst.msk [vmem:[#allocation5 + $0xf8] sm:$0xff] %vm912_vm0, %v11933_v28  ;;  %v8557_v35 = vld [vmem:[%s9249_s17 + $0x100] sm:$0xff]   ;;  %v8558_v36 = vld [vmem:[%s9249_s17 + $0x108] sm:$0xff]  }
  0x2c   : > { %2097 = vst.msk [vmem:[#allocation5 + $0x100] sm:$0xff] %vm912_vm0, %v11933_v28  ;;  %2098 = vst.msk [vmem:[#allocation5 + $0x108] sm:$0xff] %vm912_vm0, %v11933_v28  ;;  %v8559_v37 = vld [vmem:[%s9249_s17 + $0x110] sm:$0xff]   ;;  %v8560_v38 = vld [vmem:[%s9249_s17 + $0x118] sm:$0xff]  }
  0x2d   : > { %2099 = vst.msk [vmem:[#allocation5 + $0x110] sm:$0xff] %vm912_vm0, %v11933_v28  ;;  %2100 = vst.msk [vmem:[#allocation5 + $0x118] sm:$0xff] %vm912_vm0, %v11933_v28  ;;  %v8561_v39 = vld [vmem:[%s9249_s17 + $0x120] sm:$0xff]   ;;  %v8562_v40 = vld [vmem:[%s9249_s17 + $0x128] sm:$0xff]  }
  0x2e   : > { %8204 = vmatmul.mubr.msk.bf16.gmra.mxu0 %vm912_vm0, %v8528_v5  ;;  %2101 = vst.msk [vmem:[#allocation5 + $0x120] sm:$0xff] %vm912_vm0, %v11933_v28  ;;  %2102 = vst.msk [vmem:[#allocation5 + $0x128] sm:$0xff] %vm912_vm0, %v11933_v28  ;;  %v8563_v41 = vld [vmem:[%s9249_s17 + $0x130] sm:$0xff]   ;;  %v8564_v42 = vld [vmem:[%s9249_s17 + $0x138] sm:$0xff]  }
  0x2f   : > { %8207 = vmatprep.mubr.msk.bf16.mxu0 %vm912_vm0, %v8529_v6  ;;  %2103 = vst.msk [vmem:[#allocation5 + $0x130] sm:$0xff] %vm912_vm0, %v11933_v28  ;;  %2104 = vst.msk [vmem:[#allocation5 + $0x138] sm:$0xff] %vm912_vm0, %v11933_v28  ;;  %v8565_v43 = vld [vmem:[%s9249_s17 + $0x140] sm:$0xff]   ;;  %v8566_v44 = vld [vmem:[%s9249_s17 + $0x148] sm:$0xff]  }
  0x30   : > { %2105 = vst.msk [vmem:[#allocation5 + $0x140] sm:$0xff] %vm912_vm0, %v11933_v28  ;;  %2106 = vst.msk [vmem:[#allocation5 + $0x148] sm:$0xff] %vm912_vm0, %v11933_v28  ;;  %v8567_v45 = vld [vmem:[%s9249_s17 + $0x150] sm:$0xff]   ;;  %v8568_v46 = vld [vmem:[%s9249_s17 + $0x158] sm:$0xff]  }
  0x31   : > { %2107 = vst.msk [vmem:[#allocation5 + $0x150] sm:$0xff] %vm912_vm0, %v11933_v28  ;;  %2108 = vst.msk [vmem:[#allocation5 + $0x158] sm:$0xff] %vm912_vm0, %v11933_v28  ;;  %v8569_v47 = vld [vmem:[%s9249_s17 + $0x160] sm:$0xff]   ;;  %v8570_v48 = vld [vmem:[%s9249_s17 + $0x168] sm:$0xff]  }
  0x32   : > { %2109 = vst.msk [vmem:[#allocation5 + $0x160] sm:$0xff] %vm912_vm0, %v11933_v28  ;;  %2110 = vst.msk [vmem:[#allocation5 + $0x168] sm:$0xff] %vm912_vm0, %v11933_v28  ;;  %v8571_v49 = vld [vmem:[%s9249_s17 + $0x170] sm:$0xff]   ;;  %v8572_v50 = vld [vmem:[%s9249_s17 + $0x178] sm:$0xff]  }
  0x33   : > { %2111 = vst.msk [vmem:[#allocation5 + $0x170] sm:$0xff] %vm912_vm0, %v11933_v28  ;;  %2112 = vst.msk [vmem:[#allocation5 + $0x178] sm:$0xff] %vm912_vm0, %v11933_v28  ;;  %v8573_v51 = vld [vmem:[%s9249_s17 + $0x180] sm:$0xff]   ;;  %v8574_v52 = vld [vmem:[%s9249_s17 + $0x188] sm:$0xff]  }
  0x34   : > { %2113 = vst.msk [vmem:[#allocation5 + $0x180] sm:$0xff] %vm912_vm0, %v11933_v28  ;;  %2114 = vst.msk [vmem:[#allocation5 + $0x188] sm:$0xff] %vm912_vm0, %v11933_v28  ;;  %v8575_v53 = vld [vmem:[%s9249_s17 + $0x190] sm:$0xff]   ;;  %v8576_v57 = vld [vmem:[%s9249_s17 + $0x198] sm:$0xff]  }
  0x35   : > { %2115 = vst.msk [vmem:[#allocation5 + $0x190] sm:$0xff] %vm912_vm0, %v11933_v28  ;;  %2116 = vst.msk [vmem:[#allocation5 + $0x198] sm:$0xff] %vm912_vm0, %v11933_v28  ;;  %v8577_v59 = vld [vmem:[%s9249_s17 + $0x1a0] sm:$0xff]  }
  0x36   : > { %8208 = vmatmul.mubr.msk.bf16.gmra.mxu0 %vm912_vm0, %v8530_v7  ;;  %2117 = vst.msk [vmem:[#allocation5 + $0x1a0] sm:$0xff] %vm912_vm0, %v11933_v28  ;;  %2118 = vst.msk [vmem:[#allocation5 + $0x1a8] sm:$0xff] %vm912_vm0, %v11933_v28 }
  0x37   : > { %8211 = vmatprep.mubr.msk.bf16.mxu0 %vm912_vm0, %v8531_v8  ;;  %2119 = vst.msk [vmem:[#allocation5 + $0x1b0] sm:$0xff] %vm912_vm0, %v11933_v28  ;;  %2120 = vst.msk [vmem:[#allocation5 + $0x1b8] sm:$0xff] %vm912_vm0, %v11933_v28  ;;  %v8578_v8 = vld [vmem:[%s9249_s17 + $0x1a8] sm:$0xff]  }
  0x38   : > { %2121 = vst.msk [vmem:[#allocation5 + $0x1c0] sm:$0xff] %vm912_vm0, %v11933_v28  ;;  %2122 = vst.msk [vmem:[#allocation5 + $0x1c8] sm:$0xff] %vm912_vm0, %v11933_v28 }
  0x39   : > { %2123 = vst.msk [vmem:[#allocation5 + $0x1d0] sm:$0xff] %vm912_vm0, %v11933_v28  ;;  %2124 = vst.msk [vmem:[#allocation5 + $0x1d8] sm:$0xff] %vm912_vm0, %v11933_v28 }
  0x3a   : > { %2125 = vst.msk [vmem:[#allocation5 + $0x1e0] sm:$0xff] %vm912_vm0, %v11933_v28  ;;  %2126 = vst.msk [vmem:[#allocation5 + $0x1e8] sm:$0xff] %vm912_vm0, %v11933_v28 }
  0x3b   : > { %2127 = vst.msk [vmem:[#allocation5 + $0x1f0] sm:$0xff] %vm912_vm0, %v11933_v28  ;;  %2128 = vst.msk [vmem:[#allocation5 + $0x1f8] sm:$0xff] %vm912_vm0, %v11933_v28 }
  0x3c   : > { %2129 = vst.msk [vmem:[#allocation5 + $0x200] sm:$0xff] %vm912_vm0, %v11933_v28  ;;  %2130 = vst.msk [vmem:[#allocation5 + $0x208] sm:$0xff] %vm912_vm0, %v11933_v28 }
  0x3d   : > { %2131 = vst.msk [vmem:[#allocation5 + $0x210] sm:$0xff] %vm912_vm0, %v11933_v28  ;;  %2132 = vst.msk [vmem:[#allocation5 + $0x218] sm:$0xff] %vm912_vm0, %v11933_v28 }
  0x3e   : > { %8212 = vmatmul.mubr.msk.bf16.gmra.mxu0 %vm912_vm0, %v8532_v9  ;;  %2133 = vst.msk [vmem:[#allocation5 + $0x220] sm:$0xff] %vm912_vm0, %v11933_v28  ;;  %2134 = vst.msk [vmem:[#allocation5 + $0x228] sm:$0xff] %vm912_vm0, %v11933_v28 }
  0x3f   : > { %8215 = vmatprep.mubr.msk.bf16.mxu0 %vm912_vm0, %v8533_v10  ;;  %2135 = vst.msk [vmem:[#allocation5 + $0x230] sm:$0xff] %vm912_vm0, %v11933_v28  ;;  %2136 = vst.msk [vmem:[#allocation5 + $0x238] sm:$0xff] %vm912_vm0, %v11933_v28 }
  0x40   : > { %4058 = vst.msk [vmem:[#allocation6] sm:$0xff] %vm2792_vm1, %v11933_v28  ;;  %4059 = vst.msk [vmem:[#allocation6 + $0x8] sm:$0xff] %vm2792_vm1, %v11933_v28 }
  0x41   : > { %4060 = vst.msk [vmem:[#allocation6 + $0x10] sm:$0xff] %vm2792_vm1, %v11933_v28  ;;  %4061 = vst.msk [vmem:[#allocation6 + $0x18] sm:$0xff] %vm2792_vm1, %v11933_v28 }
  0x42   : > { %4062 = vst.msk [vmem:[#allocation6 + $0x20] sm:$0xff] %vm2792_vm1, %v11933_v28  ;;  %4063 = vst.msk [vmem:[#allocation6 + $0x28] sm:$0xff] %vm2792_vm1, %v11933_v28 }
  0x43   : > { %4064 = vst.msk [vmem:[#allocation6 + $0x30] sm:$0xff] %vm2792_vm1, %v11933_v28  ;;  %4065 = vst.msk [vmem:[#allocation6 + $0x38] sm:$0xff] %vm2792_vm1, %v11933_v28 }
  0x44   : > { %4066 = vst.msk [vmem:[#allocation6 + $0x40] sm:$0xff] %vm2792_vm1, %v11933_v28  ;;  %4067 = vst.msk [vmem:[#allocation6 + $0x48] sm:$0xff] %vm2792_vm1, %v11933_v28 }
  0x45   : > { %4068 = vst.msk [vmem:[#allocation6 + $0x50] sm:$0xff] %vm2792_vm1, %v11933_v28  ;;  %4069 = vst.msk [vmem:[#allocation6 + $0x58] sm:$0xff] %vm2792_vm1, %v11933_v28 }
  0x46   : > { %8216 = vmatmul.mubr.msk.bf16.gmra.mxu0 %vm912_vm0, %v8534_v11  ;;  %4070 = vst.msk [vmem:[#allocation6 + $0x60] sm:$0xff] %vm2792_vm1, %v11933_v28  ;;  %4071 = vst.msk [vmem:[#allocation6 + $0x68] sm:$0xff] %vm2792_vm1, %v11933_v28 }
  0x47   : > { %8219 = vmatprep.mubr.msk.bf16.mxu0 %vm912_vm0, %v8535_v12  ;;  %4072 = vst.msk [vmem:[#allocation6 + $0x70] sm:$0xff] %vm2792_vm1, %v11933_v28  ;;  %4073 = vst.msk [vmem:[#allocation6 + $0x78] sm:$0xff] %vm2792_vm1, %v11933_v28 }
  0x48   : > { %4074 = vst.msk [vmem:[#allocation6 + $0x80] sm:$0xff] %vm2792_vm1, %v11933_v28  ;;  %4075 = vst.msk [vmem:[#allocation6 + $0x88] sm:$0xff] %vm2792_vm1, %v11933_v28 }
  0x49   : > { %4076 = vst.msk [vmem:[#allocation6 + $0x90] sm:$0xff] %vm2792_vm1, %v11933_v28  ;;  %4077 = vst.msk [vmem:[#allocation6 + $0x98] sm:$0xff] %vm2792_vm1, %v11933_v28 }
  0x4a   : > { %4078 = vst.msk [vmem:[#allocation6 + $0xa0] sm:$0xff] %vm2792_vm1, %v11933_v28  ;;  %4079 = vst.msk [vmem:[#allocation6 + $0xa8] sm:$0xff] %vm2792_vm1, %v11933_v28 }
  0x4b   : > { %4080 = vst.msk [vmem:[#allocation6 + $0xb0] sm:$0xff] %vm2792_vm1, %v11933_v28  ;;  %4081 = vst.msk [vmem:[#allocation6 + $0xb8] sm:$0xff] %vm2792_vm1, %v11933_v28 }
  0x4c   : > { %4082 = vst.msk [vmem:[#allocation6 + $0xc0] sm:$0xff] %vm2792_vm1, %v11933_v28  ;;  %4083 = vst.msk [vmem:[#allocation6 + $0xc8] sm:$0xff] %vm2792_vm1, %v11933_v28 }
  0x4d   : > { %4084 = vst.msk [vmem:[#allocation6 + $0xd0] sm:$0xff] %vm2792_vm1, %v11933_v28  ;;  %4085 = vst.msk [vmem:[#allocation6 + $0xd8] sm:$0xff] %vm2792_vm1, %v11933_v28 }
  0x4e   : > { %8220 = vmatmul.mubr.msk.bf16.gmra.mxu0 %vm912_vm0, %v8536_v13  ;;  %v8579_v13 = vld [vmem:[%s9249_s17 + $0x1b0] sm:$0xff]   ;;  %4086 = vst.msk [vmem:[#allocation6 + $0xe0] sm:$0xff] %vm2792_vm1, %v11933_v28  ;;  %4087 = vst.msk [vmem:[#allocation6 + $0xe8] sm:$0xff] %vm2792_vm1, %v11933_v28 }
  0x4f   : > { %8223 = vmatprep.mubr.msk.bf16.mxu0 %vm912_vm0, %v8537_v14  ;;  %vm10841_vm8 = vmor %vm4331_vm6, %vm4332_vm7 }
  0x56   : > { %8224 = vmatmul.mubr.msk.bf16.gmra.mxu0 %vm912_vm0, %v8538_v15 }
  0x57   : > { %8227 = vmatprep.mubr.msk.bf16.mxu0 %vm912_vm0, %v8539_v16 }
  0x5e   : > { %8228 = vmatmul.mubr.msk.bf16.gmra.mxu0 %vm912_vm0, %v8540_v17 }
  0x5f   : > { %8231 = vmatprep.mubr.msk.bf16.mxu0 %vm912_vm0, %v8541_v18 }
  0x66   : > { %8232 = vmatmul.mubr.msk.bf16.gmra.mxu0 %vm912_vm0, %v8542_v19 }
  0x67   : > { %8235 = vmatprep.mubr.msk.bf16.mxu0 %vm912_vm0, %v8543_v20 }
  0x6e   : > { %8236 = vmatmul.mubr.msk.bf16.gmra.mxu0 %vm912_vm0, %v8544_v21 }
  0x6f   : > { %8239 = vmatprep.mubr.msk.bf16.mxu0 %vm912_vm0, %v8545_v22 }
  0x76   : > { %8240 = vmatmul.mubr.msk.bf16.gmra.mxu0 %vm912_vm0, %v8546_v23 }
  0x77   : > { %8243 = vmatprep.mubr.msk.bf16.mxu0 %vm912_vm0, %v8547_v24 }
  0x7e   : > { %8244 = vmatmul.mubr.msk.bf16.gmra.mxu0 %vm912_vm0, %v8548_v25 }
  0x7f   : > { %8247 = vmatprep.mubr.msk.bf16.mxu0 %vm912_vm0, %v8549_v26  ;;  %v8580_v26 = vld [vmem:[%s9249_s17 + $0x1b8] sm:$0xff]  }
  0x86   : > { %8248 = vmatmul.mubr.msk.bf16.gmra.mxu0 %vm912_vm0, %v9302_v27  ;;  %v8581_v27 = vld [vmem:[%s9249_s17 + $0x1c0] sm:$0xff]  }
  0x87   : > { %8251 = vmatprep.mubr.msk.bf16.mxu0 %vm912_vm0, %v8551_v29 }
  0x8e   : > { %8252 = vmatmul.mubr.msk.bf16.gmra.mxu0 %vm912_vm0, %v8552_v30 }
  0x8f   : > { %8255 = vmatprep.mubr.msk.bf16.mxu0 %vm912_vm0, %v8553_v31 }
  0x96   : > { %8256 = vmatmul.mubr.msk.bf16.gmra.mxu0 %vm912_vm0, %v8554_v32 }
  0x97   : > { %8259 = vmatprep.mubr.msk.bf16.mxu0 %vm912_vm0, %v8555_v33 }
  0x9e   : > { %8260 = vmatmul.mubr.msk.bf16.gmra.mxu0 %vm912_vm0, %v8556_v34 }
  0x9f   : > { %8263 = vmatprep.mubr.msk.bf16.mxu0 %vm912_vm0, %v8557_v35 }
  0xa6   : > { %8264 = vmatmul.mubr.msk.bf16.gmra.mxu0 %vm912_vm0, %v8558_v36 }
  0xa7   : > { %8267 = vmatprep.mubr.msk.bf16.mxu0 %vm912_vm0, %v8559_v37 }
  0xae   : > { %8268 = vmatmul.mubr.msk.bf16.gmra.mxu0 %vm912_vm0, %v8560_v38 }
  0xaf   : > { %8271 = vmatprep.mubr.msk.bf16.mxu0 %vm912_vm0, %v8561_v39 }
  0xb6   : > { %8272 = vmatmul.mubr.msk.bf16.gmra.mxu0 %vm912_vm0, %v8562_v40 }
  0xb7   : > { %8275 = vmatprep.mubr.msk.bf16.mxu0 %vm912_vm0, %v8563_v41 }
  0xbe   : > { %8276 = vmatmul.mubr.msk.bf16.gmra.mxu0 %vm912_vm0, %v8564_v42 }
  0xbf   : > { %8279 = vmatprep.mubr.msk.bf16.mxu0 %vm912_vm0, %v8565_v43 }
  0xc6   : > { %8280 = vmatmul.mubr.msk.bf16.gmra.mxu0 %vm912_vm0, %v8566_v44 }
  0xc7   : > { %8283 = vmatprep.mubr.msk.bf16.mxu0 %vm912_vm0, %v8567_v45 }
  0xce   : > { %8284 = vmatmul.mubr.msk.bf16.gmra.mxu0 %vm912_vm0, %v8568_v46 }
  0xcf   : > { %8287 = vmatprep.mubr.msk.bf16.mxu0 %vm912_vm0, %v8569_v47  ;;  %v8582_v47 = vld [vmem:[%s9249_s17 + $0x1c8] sm:$0xff]  }
  0xd6   : > { %8288 = vmatmul.mubr.msk.bf16.gmra.mxu0 %vm912_vm0, %v8570_v48 }
  0xd7   : > { %8291 = vmatprep.mubr.msk.bf16.mxu0 %vm912_vm0, %v8571_v49 }
  0xde   : > { %8292 = vmatmul.mubr.msk.bf16.gmra.mxu0 %vm912_vm0, %v8572_v50 }
  0xdf   : > { %8295 = vmatprep.mubr.msk.bf16.mxu0 %vm912_vm0, %v8573_v51 }
  0xe6   : > { %v8201_v54 = vpop.f32.mrf.mxu0  ;;  %8296 = vmatmul.mubr.msk.bf16.gmra.mxu0 %vm912_vm0, %v8574_v52  ;;  %v8583_v52 = vld [vmem:[%s9249_s17 + $0x1d0] sm:$0xff]  }
  0xe7   : > { %8299 = vmatprep.mubr.msk.bf16.mxu0 %vm912_vm0, %v8575_v53  ;;  %v1148_v61 = vadd.f32 %v8201_v54, %v9503_v55 }
  0xe8   : > { %v1139_v56 = vpop.f32.mrf.mxu0 }
  0xe9   : > { %v1140_v62 = vadd.f32 %v9503_v55, %v1139_v56  ;;  %v1652_v2 = vmax.f32 %v1148_v61, 0.0 }
  0xea   : > { %v8202_v58 = vpop.f32.mrf.mxu0 }
  0xeb   : > { %v1151_v3 = vadd.f32 %v8202_v58, %v9503_v55  ;;  %v1650_v6 = vmax.f32 %v1140_v62, 0.0 }
  0xec   : > { %v1142_v60 = vpop.f32.mrf.mxu0 }
  0xed   : > { %v1143_v9 = vadd.f32 %v9503_v55, %v1142_v60  ;;  %v1653_v15 = vmax.f32 %v1151_v3, 0.0 }
  0xee   : > { %v8205_v63 = vpop.f32.mrf.mxu0  ;;  %8300 = vmatmul.mubr.msk.bf16.gmra.mxu0 %vm912_vm0, %v8576_v57 }
  0xef   : > { %v1164_v0 = vadd.f32 %v8205_v63, %v9503_v55  ;;  %8303 = vmatprep.mubr.msk.bf16.mxu0 %vm912_vm0, %v8577_v59  ;;  %v1651_v20 = vmax.f32 %v1143_v9, 0.0 }
  0xf0   : > { %v1155_v1 = vpop.f32.mrf.mxu0 }
  0xf1   : > { %v1656_v4 = vmax.f32 %v1164_v0, 0.0  ;;  %v1156_v5 = vadd.f32 %v9503_v55, %v1155_v1  ;;  %v2177_v0 = vld [vmem:[#allocation5 + $0x38] sm:$0xff] }
  0xf2   : > { %v8206_v7 = vpop.f32.mrf.mxu0 }
  0xf3   : > { %v1780_v10 = vmax.f32 %v1652_v2, %v1656_v4  ;;  %v1654_v11 = vmax.f32 %v1156_v5, 0.0  ;;  %v1167_v12 = vadd.f32 %v8206_v7, %v9503_v55  ;;  %v8584_v2 = vld [vmem:[%s9249_s17 + $0x1d8] sm:$0xff]  }
  0xf4   : > { %v1158_v14 = vpop.f32.mrf.mxu0  ;;  %v8589_v7 = vld [vmem:[%s11922_s3 + $0x58] sm:$0xff]  }
  0xf5   : > { %1844 = vst.msk [vmem:[#allocation2 + $0x10] sm:$0xff] %vm912_vm0, %v1780_v10  ;;  %v1778_v16 = vmax.f32 %v1650_v6, %v1654_v11  ;;  %v1657_v17 = vmax.f32 %v1167_v12, 0.0  ;;  %v1159_v18 = vadd.f32 %v9503_v55, %v1158_v14  ;;  %v2174_v6 = vld [vmem:[#allocation5 + $0x20] sm:$0xff]  ;;  %8327 = vmatprep.subr.bf16.mxu1 %v8589_v7 }
  0xf6   : > { %v8209_v19 = vpop.f32.mrf.mxu0  ;;  %8304 = vmatmul.mubr.msk.bf16.gmra.mxu0 %vm912_vm0, %v8578_v8  ;;  %v8585_v10 = vld [vmem:[%s9249_s17 + $0x1e0] sm:$0xff]   ;;  %8328 = vmatpush3.bf16.msra.mxu1 %v8589_v7 }
  0xf7   : > { %1842 = vst.msk [vmem:[#allocation2] sm:$0xff] %vm912_vm0, %v1778_v16  ;;  %v1781_v21 = vmax.f32 %v1653_v15, %v1657_v17  ;;  %v1655_v22 = vmax.f32 %v1159_v18, 0.0  ;;  %8307 = vmatprep.mubr.msk.bf16.mxu0 %vm912_vm0, %v8579_v13  ;;  %v1180_v29 = vadd.f32 %v8209_v19, %v9503_v55  ;;  %v8590_v18 = vld [vmem:[%s11922_s3 + $0x50] sm:$0xff]  }
  0xf8   : > { %v1171_v23 = vpop.f32.mrf.mxu0  ;;  %8329 = vmatprep.subr.bf16.mxu1 %v8590_v18 }
  0xf9   : > { %1845 = vst.msk [vmem:[#allocation2 + $0x18] sm:$0xff] %vm912_vm0, %v1781_v21  ;;  %v1779_v24 = vmax.f32 %v1651_v20, %v1655_v22  ;;  %v1172_v31 = vadd.f32 %v9503_v55, %v1171_v23  ;;  %v1660_v36 = vmax.f32 %v1180_v29, 0.0 }
  0xfa   : > { %v8210_v25 = vpop.f32.mrf.mxu0  ;;  %8330 = vmatpush3.bf16.msra.mxu1 %v8590_v18 }
  0xfb   : > { %1843 = vst.msk [vmem:[#allocation2 + $0x8] sm:$0xff] %vm912_vm0, %v1779_v24  ;;  %v1183_v39 = vadd.f32 %v8210_v25, %v9503_v55  ;;  %v1658_v44 = vmax.f32 %v1172_v31, 0.0 }
  0xfc   : > { %v1174_v30 = vpop.f32.mrf.mxu0 }
  0xfd   : > { %v1175_v45 = vadd.f32 %v9503_v55, %v1174_v30  ;;  %v1661_v54 = vmax.f32 %v1183_v39, 0.0 }
  0xfe   : > { %v8213_v32 = vpop.f32.mrf.mxu0  ;;  %8308 = vmatmul.mubr.msk.bf16.gmra.mxu0 %vm912_vm0, %v8580_v26 }
  0xff   : > { %v1196_v33 = vadd.f32 %v8213_v32, %v9503_v55  ;;  %8311 = vmatprep.mubr.msk.bf16.mxu0 %vm912_vm0, %v8581_v27  ;;  %v1659_v60 = vmax.f32 %v1175_v45, 0.0  ;;  %v8587_v45 = vld [vmem:[%s9249_s17 + $0x1f0] sm:$0xff]  }
 0x100   : > { %v1908_v34 = vld [vmem:[#allocation2 + $0x10] ss:$2 sm:$0xff]  ;;  %v1972_v35 = vld [vmem:[#allocation2 + $0x11] ss:$2 sm:$0xff]  ;;  %v1187_v37 = vpop.f32.mrf.mxu0 }
 0x101   : > { %v2034_v38 = vmax.f32 %v1908_v34, %v1972_v35  ;;  %v1664_v40 = vmax.f32 %v1196_v33, 0.0  ;;  %v1188_v41 = vadd.f32 %v9503_v55, %v1187_v37  ;;  %v8586_v34 = vld [vmem:[%s9249_s17 + $0x1e8] sm:$0xff]  }
 0x102   : > { %v1906_v42 = vld [vmem:[#allocation2] ss:$2 sm:$0xff]  ;;  %v1970_v43 = vld [vmem:[#allocation2 + $0x1] ss:$2 sm:$0xff]  ;;  %v8214_v46 = vpop.f32.mrf.mxu0 }
 0x103   : > { %v2033_v48 = vmax.f32 %v1906_v42, %v1970_v43  ;;  %2139 = vst.msk [vmem:[#allocation5 + $0x30] sm:$0xff] %vm912_vm0, %v2034_v38  ;;  %v1784_v49 = vmax.f32 %v1660_v36, %v1664_v40  ;;  %v1662_v50 = vmax.f32 %v1188_v41, 0.0  ;;  %v1199_v51 = vadd.f32 %v8214_v46, %v9503_v55 }
 0x104   : > { %v1190_v53 = vpop.f32.mrf.mxu0 }
 0x105   : > { %2138 = vst.msk [vmem:[#allocation5 + $0x28] sm:$0xff] %vm912_vm0, %v2033_v48  ;;  %1848 = vst.msk [vmem:[#allocation2 + $0x30] sm:$0xff] %vm912_vm0, %v1784_v49  ;;  %v1782_v56 = vmax.f32 %v1658_v44, %v1662_v50  ;;  %v1665_v57 = vmax.f32 %v1199_v51, 0.0  ;;  %v1191_v58 = vadd.f32 %v9503_v55, %v1190_v53  ;;  %v8591_v49 = vld [vmem:[%s11922_s3 + $0x48] sm:$0xff]  }
 0x106   : > { %v8217_v59 = vpop.f32.mrf.mxu0  ;;  %8312 = vmatmul.mubr.msk.bf16.gmra.mxu0 %vm912_vm0, %v8582_v47  ;;  %8331 = vmatprep.subr.bf16.mxu1 %v8591_v49 }
 0x107   : > { %1846 = vst.msk [vmem:[#allocation2 + $0x20] sm:$0xff] %vm912_vm0, %v1782_v56  ;;  %v1785_v61 = vmax.f32 %v1661_v54, %v1665_v57  ;;  %v1663_v62 = vmax.f32 %v1191_v58, 0.0  ;;  %8315 = vmatprep.mubr.msk.bf16.mxu0 %vm912_vm0, %v8583_v52  ;;  %v9548_v3 = vadd.f32 %v8217_v59, %v9503_v55  ;;  %8332 = vmatpush3.bf16.msra.mxu1 %v8591_v49 }
 0x108   : > { %v1203_v63 = vpop.f32.mrf.mxu0 }
 0x109   : > { %1849 = vst.msk [vmem:[#allocation2 + $0x38] sm:$0xff] %vm912_vm0, %v1785_v61  ;;  %v1783_v1 = vmax.f32 %v1659_v60, %v1663_v62  ;;  %v9555_v8 = vadd.f32 %v9503_v55, %v1203_v63  ;;  %v1668_v15 = vmax.f32 %v9548_v3, 0.0  ;;  %v2181_v60 = vld [vmem:[#allocation5 + $0x58] sm:$0xff] }
 0x10a   : > { %v8218_v4 = vpop.f32.mrf.mxu0  ;;  %v2176_v5 = vld [vmem:[#allocation5 + $0x30] sm:$0xff]  ;;  %v8588_v63 = vld [vmem:[%s9249_s17 + $0x1f8] sm:$0xff]  }
 0x10b   : > { %1847 = vst.msk [vmem:[#allocation2 + $0x28] sm:$0xff] %vm912_vm0, %v1783_v1  ;;  %v9557_v9 = vpack.c.bf16 %v2177_v0, %v2176_v5  ;;  %v1666_v19 = vmax.f32 %v9555_v8, 0.0  ;;  %v1215_v25 = vadd.f32 %v8218_v4, %v9503_v55  ;;  %v2178_v4 = vld [vmem:[#allocation5 + $0x40] sm:$0xff] }
 0x10c   : > { %v1206_v11 = vpop.f32.mrf.mxu0  ;;  %v2175_v12 = vld [vmem:[#allocation5 + $0x28] sm:$0xff]  ;;  %v8592_v5 = vld [vmem:[%s11922_s3 + $0x40] sm:$0xff]  }
 0x10d   : > { %v2620_v13 = vrot.slane %v9557_v9, 1  ;;  %v9621_v14 = vpack.c.bf16 %v2175_v12, %v2174_v6  ;;  %v2302_v17 = vshll.u32 %v9557_v9, 16  ;;  %v2306_v22 = vshrl.u32 %v9557_v9, 16  ;;  %8333 = vmatprep.subr.bf16.mxu1 %v8592_v5 }
 0x10e   : > { %v8221_v16 = vpop.f32.mrf.mxu0  ;;  %8316 = vmatmul.mubr.msk.bf16.gmra.mxu0 %vm912_vm0, %v8584_v2  ;;  %v1207_v37 = vadd.f32 %v9503_v55, %v1206_v11  ;;  %v1669_v46 = vmax.f32 %v1215_v25, 0.0  ;;  %8334 = vmatpush3.bf16.msra.mxu1 %v8592_v5 }
 0x10f   : > { %v1228_v20 = vadd.f32 %v8221_v16, %v9503_v55  ;;  %2670 = vrot.lane.b32.xlu1 %v2620_v13, %s9116_s15  ;;  %v2619_v21 = vrot.slane %v9621_v14, 1  ;;  %8319 = vmatprep.mubr.msk.bf16.mxu0 %vm912_vm0, %v8585_v10  ;;  %v2304_v27 = vrot.slane %v2302_v17, 1  ;;  %v2297_v29 = vshll.u32 %v9621_v14, 16  ;;  %v8593_v17 = vld [vmem:[%s11922_s3 + $0x38] sm:$0xff]  }
 0x110   : > { %v1912_v23 = vld [vmem:[#allocation2 + $0x30] ss:$2 sm:$0xff]  ;;  %v1976_v24 = vld [vmem:[#allocation2 + $0x31] ss:$2 sm:$0xff]  ;;  %v1219_v26 = vpop.f32.mrf.mxu0  ;;  %v2295_v39 = vshrl.u32 %v9621_v14, 16  ;;  %v1667_v56 = vmax.f32 %v1207_v37, 0.0  ;;  %8335 = vmatprep.subr.bf16.mxu1 %v8593_v17 }
 0x111   : > { %v2036_v30 = vmax.f32 %v1912_v23, %v1976_v24  ;;  %v1672_v31 = vmax.f32 %v1228_v20, 0.0  ;;  %v1220_v32 = vadd.f32 %v9503_v55, %v1219_v26  ;;  %v2621_v33 = vsel %vm2615_vm2, %v2619_v21, %v2620_v13 }
 0x112   : > { %v1910_v35 = vld [vmem:[#allocation2 + $0x20] ss:$2 sm:$0xff]  ;;  %v1974_v36 = vld [vmem:[#allocation2 + $0x21] ss:$2 sm:$0xff]  ;;  %v8222_v38 = vpop.f32.mrf.mxu0  ;;  %2668 = vrot.lane.b32.xlu0 %v2621_v33, %s9116_s15  ;;  %v2299_v40 = vrot.slane %v2297_v29, 1  ;;  %v2308_v48 = vor.u32 %v2306_v22, %v2304_v27  ;;  %8336 = vmatpush3.bf16.msra.mxu1 %v8593_v17 }
 0x113   : > { %2141 = vst.msk [vmem:[#allocation5 + $0x50] sm:$0xff] %vm912_vm0, %v2036_v30  ;;  %v2035_v41 = vmax.f32 %v1910_v35, %v1974_v36  ;;  %v1788_v42 = vmax.f32 %v1668_v15, %v1672_v31  ;;  %v1670_v43 = vmax.f32 %v1220_v32, 0.0  ;;  %v1231_v44 = vadd.f32 %v8222_v38, %v9503_v55 }
 0x114   : > { %v1222_v47 = vpop.f32.mrf.mxu0  ;;  %v2300_v53 = vor.u32 %v2299_v40, %v2295_v39  ;;  %v8594_v39 = vld [vmem:[%s11922_s3 + $0x30] sm:$0xff]  }
 0x115   : > { %2140 = vst.msk [vmem:[#allocation5 + $0x48] sm:$0xff] %vm912_vm0, %v2035_v41  ;;  %1852 = vst.msk [vmem:[#allocation2 + $0x50] sm:$0xff] %vm912_vm0, %v1788_v42  ;;  %v1786_v50 = vmax.f32 %v1666_v19, %v1670_v43  ;;  %v1673_v51 = vmax.f32 %v1231_v44, 0.0  ;;  %v1223_v52 = vadd.f32 %v9503_v55, %v1222_v47  ;;  %8337 = vmatprep.subr.bf16.mxu1 %v8594_v39 }
 0x116   : > { %v8225_v54 = vpop.f32.mrf.mxu0  ;;  %8320 = vmatmul.mubr.msk.bf16.gmra.mxu0 %vm912_vm0, %v8586_v34  ;;  %2525 = vrot.lane.b32.xlu0 %v2308_v48, %s9117_s21  ;;  %v2305_v62 = vsel %vm2278_vm3, %v2300_v53, %v2304_v27 }
 0x117   : > { %1850 = vst.msk [vmem:[#allocation2 + $0x40] sm:$0xff] %vm912_vm0, %v1786_v50  ;;  %v1789_v57 = vmax.f32 %v1669_v46, %v1673_v51  ;;  %v1671_v58 = vmax.f32 %v1223_v52, 0.0  ;;  %8323 = vmatprep.mubr.msk.bf16.mxu0 %vm912_vm0, %v8587_v45  ;;  %v1244_v0 = vadd.f32 %v8225_v54, %v9503_v55  ;;  %8338 = vmatpush3.bf16.msra.mxu1 %v8594_v39 }
 0x118   : > { %v1235_v59 = vpop.f32.mrf.mxu0 }
 0x119   : > { %1853 = vst.msk [vmem:[#allocation2 + $0x58] sm:$0xff] %vm912_vm0, %v1789_v57  ;;  %v1787_v61 = vmax.f32 %v1667_v56, %v1671_v58  ;;  %v1236_v1 = vadd.f32 %v9503_v55, %v1235_v59  ;;  %v1676_v12 = vmax.f32 %v1244_v0, 0.0  ;;  %v2185_v57 = vld [vmem:[#allocation5 + $0x78] sm:$0xff] }
 0x11a   : > { %v8226_v2 = vpop.f32.mrf.mxu0  ;;  %2523 = vrot.lane.b32.xlu0 %v2305_v62, %s9117_s21  ;;  %v2180_v3 = vld [vmem:[#allocation5 + $0x50] sm:$0xff]  ;;  %v2182_v62 = vld [vmem:[#allocation5 + $0x60] sm:$0xff] }
 0x11b   : > { %1851 = vst.msk [vmem:[#allocation2 + $0x48] sm:$0xff] %vm912_vm0, %v1787_v61  ;;  %v9666_v6 = vpack.c.bf16 %v2181_v60, %v2180_v3  ;;  %v1674_v13 = vmax.f32 %v1236_v1, 0.0  ;;  %v1247_v24 = vadd.f32 %v8226_v2, %v9503_v55 }
 0x11c   : > { %v1238_v7 = vpop.f32.mrf.mxu0  ;;  %v2179_v8 = vld [vmem:[#allocation5 + $0x48] sm:$0xff] }
 0x11d   : > { %v2623_v10 = vrot.slane %v9666_v6, 1  ;;  %v9669_v11 = vpack.c.bf16 %v2179_v8, %v2178_v4  ;;  %v2317_v16 = vshll.u32 %v9666_v6, 16  ;;  %v2321_v20 = vshrl.u32 %v9666_v6, 16 }
 0x11e   : > { %v8229_v15 = vpop.f32.mrf.mxu0  ;;  %8324 = vmatmul.mubr.msk.bf16.gmra.mxu0 %vm912_vm0, %v8588_v63  ;;  %v1239_v35 = vadd.f32 %v9503_v55, %v1238_v7  ;;  %v1677_v46 = vmax.f32 %v1247_v24, 0.0 }
 0x11f   : > { %v1260_v18 = vadd.f32 %v8229_v15, %v9503_v55  ;;  %2674 = vrot.lane.b32.xlu1 %v2623_v10, %s9116_s15  ;;  %v2622_v19 = vrot.slane %v9669_v11, 1  ;;  %v2310_v21 = vshrl.u32 %v9669_v11, 16  ;;  %v2319_v26 = vrot.slane %v2317_v16, 1 }
 0x120   : > { %v1916_v22 = vld [vmem:[#allocation2 + $0x50] ss:$2 sm:$0xff]  ;;  %v1980_v23 = vld [vmem:[#allocation2 + $0x51] ss:$2 sm:$0xff]  ;;  %v1251_v25 = vpop.f32.mrf.mxu0  ;;  %v2312_v27 = vshll.u32 %v9669_v11, 16  ;;  %v1675_v52 = vmax.f32 %v1239_v35, 0.0 }
 0x121   : > { %v2038_v29 = vmax.f32 %v1916_v22, %v1980_v23  ;;  %v1680_v30 = vmax.f32 %v1260_v18, 0.0  ;;  %v1252_v31 = vadd.f32 %v9503_v55, %v1251_v25  ;;  %v2624_v32 = vsel %vm2615_vm2, %v2622_v19, %v2623_v10 }
 0x122   : > { %v1914_v33 = vld [vmem:[#allocation2 + $0x40] ss:$2 sm:$0xff]  ;;  %v1978_v34 = vld [vmem:[#allocation2 + $0x41] ss:$2 sm:$0xff]  ;;  %v8230_v36 = vpop.f32.mrf.mxu0  ;;  %2672 = vrot.lane.b32.xlu0 %v2624_v32, %s9116_s15  ;;  %v2323_v37 = vor.u32 %v2321_v20, %v2319_v26  ;;  %v2314_v38 = vrot.slane %v2312_v27, 1 }
 0x123   : > { %2143 = vst.msk [vmem:[#allocation5 + $0x70] sm:$0xff] %vm912_vm0, %v2038_v29  ;;  %v2037_v40 = vmax.f32 %v1914_v33, %v1978_v34  ;;  %v1792_v41 = vmax.f32 %v1676_v12, %v1680_v30  ;;  %v1678_v42 = vmax.f32 %v1252_v31, 0.0  ;;  %v1263_v43 = vadd.f32 %v8230_v36, %v9503_v55 }
 0x124   : > { %2529 = vrot.lane.b32.xlu1 %v2323_v37, %s9117_s21  ;;  %v1254_v44 = vpop.f32.mrf.mxu0  ;;  %v2315_v45 = vor.u32 %v2314_v38, %v2310_v21 }
 0x125   : > { %2142 = vst.msk [vmem:[#allocation5 + $0x68] sm:$0xff] %vm912_vm0, %v2037_v40  ;;  %1856 = vst.msk [vmem:[#allocation2 + $0x70] sm:$0xff] %vm912_vm0, %v1792_v41  ;;  %v1790_v47 = vmax.f32 %v1674_v13, %v1678_v42  ;;  %v1681_v48 = vmax.f32 %v1263_v43, 0.0  ;;  %v1255_v49 = vadd.f32 %v9503_v55, %v1254_v44 }
 0x126   : > { %v8233_v50 = vpop.f32.mrf.mxu0  ;;  %v2320_v51 = vsel %vm2278_vm3, %v2315_v45, %v2319_v26 }
 0x127   : > { %1854 = vst.msk [vmem:[#allocation2 + $0x60] sm:$0xff] %vm912_vm0, %v1790_v47  ;;  %v1793_v53 = vmax.f32 %v1677_v46, %v1681_v48  ;;  %v1679_v54 = vmax.f32 %v1255_v49, 0.0  ;;  %v1276_v59 = vadd.f32 %v8233_v50, %v9503_v55  ;;  %v2189_v50 = vld [vmem:[#allocation5 + $0x98] sm:$0xff] }
 0x128   : > { %2527 = vrot.lane.b32.xlu1 %v2320_v51, %s9117_s21  ;;  %v1267_v56 = vpop.f32.mrf.mxu0 }
 0x129   : > { %1857 = vst.msk [vmem:[#allocation2 + $0x78] sm:$0xff] %vm912_vm0, %v1793_v53  ;;  %v1791_v58 = vmax.f32 %v1675_v52, %v1679_v54  ;;  %v1268_v63 = vadd.f32 %v9503_v55, %v1267_v56  ;;  %v1684_v5 = vmax.f32 %v1276_v59, 0.0  ;;  %v2186_v56 = vld [vmem:[#allocation5 + $0x80] sm:$0xff] }
 0x12a   : > { %v8234_v60 = vpop.f32.mrf.mxu0  ;;  %v2184_v61 = vld [vmem:[#allocation5 + $0x70] sm:$0xff] }
 0x12b   : > { %1855 = vst.msk [vmem:[#allocation2 + $0x68] sm:$0xff] %vm912_vm0, %v1791_v58  ;;  %v9703_v0 = vpack.c.bf16 %v2185_v57, %v2184_v61  ;;  %v1682_v10 = vmax.f32 %v1268_v63, 0.0  ;;  %v1279_v18 = vadd.f32 %v8234_v60, %v9503_v55 }
 0x12c   : > { %v1270_v1 = vpop.f32.mrf.mxu0  ;;  %v2183_v2 = vld [vmem:[#allocation5 + $0x68] sm:$0xff] }
 0x12d   : > { %v2626_v3 = vrot.slane %v9703_v0, 1  ;;  %v9706_v4 = vpack.c.bf16 %v2183_v2, %v2182_v62  ;;  %v2332_v8 = vshll.u32 %v9703_v0, 16  ;;  %v2336_v15 = vshrl.u32 %v9703_v0, 16 }
 0x12e   : > { %v8237_v7 = vpop.f32.mrf.mxu0  ;;  %v1271_v29 = vadd.f32 %v9503_v55, %v1270_v1  ;;  %v1685_v40 = vmax.f32 %v1279_v18, 0.0 }
 0x12f   : > { %v1292_v12 = vadd.f32 %v8237_v7, %v9503_v55  ;;  %2678 = vrot.lane.b32.xlu1 %v2626_v3, %s9116_s15  ;;  %v2625_v13 = vrot.slane %v9706_v4, 1  ;;  %v2334_v20 = vrot.slane %v2332_v8, 1  ;;  %v2327_v21 = vshll.u32 %v9706_v4, 16 }
 0x130   : > { %v1920_v16 = vld [vmem:[#allocation2 + $0x70] ss:$2 sm:$0xff]  ;;  %v1984_v17 = vld [vmem:[#allocation2 + $0x71] ss:$2 sm:$0xff]  ;;  %v1283_v19 = vpop.f32.mrf.mxu0  ;;  %v2325_v32 = vshrl.u32 %v9706_v4, 16  ;;  %v1683_v46 = vmax.f32 %v1271_v29, 0.0 }
 0x131   : > { %v2040_v22 = vmax.f32 %v1920_v16, %v1984_v17  ;;  %v1688_v23 = vmax.f32 %v1292_v12, 0.0  ;;  %v1284_v24 = vadd.f32 %v9503_v55, %v1283_v19  ;;  %v2627_v25 = vsel %vm2615_vm2, %v2625_v13, %v2626_v3 }
 0x132   : > { %v1918_v26 = vld [vmem:[#allocation2 + $0x60] ss:$2 sm:$0xff]  ;;  %v1982_v27 = vld [vmem:[#allocation2 + $0x61] ss:$2 sm:$0xff]  ;;  %v8238_v30 = vpop.f32.mrf.mxu0  ;;  %2676 = vrot.lane.b32.xlu0 %v2627_v25, %s9116_s15  ;;  %v2338_v31 = vor.u32 %v2336_v15, %v2334_v20  ;;  %v2329_v33 = vrot.slane %v2327_v21, 1 }
 0x133   : > { %2145 = vst.msk [vmem:[#allocation5 + $0x90] sm:$0xff] %vm912_vm0, %v2040_v22  ;;  %v2039_v34 = vmax.f32 %v1918_v26, %v1982_v27  ;;  %v1796_v35 = vmax.f32 %v1684_v5, %v1688_v23  ;;  %v1686_v36 = vmax.f32 %v1284_v24, 0.0  ;;  %v1295_v37 = vadd.f32 %v8238_v30, %v9503_v55 }
 0x134   : > { %2533 = vrot.lane.b32.xlu1 %v2338_v31, %s9117_s21  ;;  %v1286_v38 = vpop.f32.mrf.mxu0  ;;  %v2330_v39 = vor.u32 %v2329_v33, %v2325_v32 }
 0x135   : > { %2144 = vst.msk [vmem:[#allocation5 + $0x88] sm:$0xff] %vm912_vm0, %v2039_v34  ;;  %1860 = vst.msk [vmem:[#allocation2 + $0x90] sm:$0xff] %vm912_vm0, %v1796_v35  ;;  %v1794_v41 = vmax.f32 %v1682_v10, %v1686_v36  ;;  %v1689_v42 = vmax.f32 %v1295_v37, 0.0  ;;  %v1287_v43 = vadd.f32 %v9503_v55, %v1286_v38 }
 0x136   : > { %v8241_v44 = vpop.f32.mrf.mxu0  ;;  %v2335_v45 = vsel %vm2278_vm3, %v2330_v39, %v2334_v20 }
 0x137   : > { %1858 = vst.msk [vmem:[#allocation2 + $0x80] sm:$0xff] %vm912_vm0, %v1794_v41  ;;  %v1797_v47 = vmax.f32 %v1685_v40, %v1689_v42  ;;  %v1687_v48 = vmax.f32 %v1287_v43, 0.0  ;;  %2531 = vrot.lane.b32.xlu0 %v2335_v45, %s9117_s21  ;;  %v1308_v52 = vadd.f32 %v8241_v44, %v9503_v55 }
 0x138   : > { %v1299_v49 = vpop.f32.mrf.mxu0 }
 0x139   : > { %1861 = vst.msk [vmem:[#allocation2 + $0x98] sm:$0xff] %vm912_vm0, %v1797_v47  ;;  %v1795_v51 = vmax.f32 %v1683_v46, %v1687_v48  ;;  %v1300_v57 = vadd.f32 %v9503_v55, %v1299_v49  ;;  %v1692_v63 = vmax.f32 %v1308_v52, 0.0  ;;  %v2193_v46 = vld [vmem:[#allocation5 + $0xb8] sm:$0xff] }
 0x13a   : > { %v8242_v53 = vpop.f32.mrf.mxu0  ;;  %v2188_v54 = vld [vmem:[#allocation5 + $0x90] sm:$0xff] }
 0x13b   : > { %1859 = vst.msk [vmem:[#allocation2 + $0x88] sm:$0xff] %vm912_vm0, %v1795_v51  ;;  %v9733_v58 = vpack.c.bf16 %v2189_v50, %v2188_v54  ;;  %v1690_v3 = vmax.f32 %v1300_v57, 0.0  ;;  %v1311_v13 = vadd.f32 %v8242_v53, %v9503_v55  ;;  %v2190_v51 = vld [vmem:[#allocation5 + $0xa0] sm:$0xff] }
 0x13c   : > { %v1302_v59 = vpop.f32.mrf.mxu0  ;;  %v2187_v60 = vld [vmem:[#allocation5 + $0x88] sm:$0xff] }
 0x13d   : > { %v2629_v61 = vrot.slane %v9733_v58, 1  ;;  %v9736_v62 = vpack.c.bf16 %v2187_v60, %v2186_v56  ;;  %v2347_v2 = vshll.u32 %v9733_v58, 16  ;;  %v2351_v8 = vshrl.u32 %v9733_v58, 16 }
 0x13e   : > { %v8245_v1 = vpop.f32.mrf.mxu0  ;;  %v1303_v24 = vadd.f32 %v9503_v55, %v1302_v59  ;;  %v1693_v36 = vmax.f32 %v1311_v13, 0.0 }
 0x13f   : > { %v1324_v5 = vadd.f32 %v8245_v1, %v9503_v55  ;;  %2682 = vrot.lane.b32.xlu1 %v2629_v61, %s9116_s15  ;;  %v2628_v7 = vrot.slane %v9736_v62, 1  ;;  %v2349_v16 = vrot.slane %v2347_v2, 1  ;;  %v2342_v17 = vshll.u32 %v9736_v62, 16 }
 0x140   : > { %v1924_v10 = vld [vmem:[#allocation2 + $0x90] ss:$2 sm:$0xff]  ;;  %v1988_v12 = vld [vmem:[#allocation2 + $0x91] ss:$2 sm:$0xff]  ;;  %v1315_v15 = vpop.f32.mrf.mxu0  ;;  %v2340_v27 = vshrl.u32 %v9736_v62, 16  ;;  %v1691_v42 = vmax.f32 %v1303_v24, 0.0 }
 0x141   : > { %v2042_v18 = vmax.f32 %v1924_v10, %v1988_v12  ;;  %v1696_v19 = vmax.f32 %v1324_v5, 0.0  ;;  %v1316_v20 = vadd.f32 %v9503_v55, %v1315_v15  ;;  %v2630_v21 = vsel %vm2615_vm2, %v2628_v7, %v2629_v61 }
 0x142   : > { %v1922_v22 = vld [vmem:[#allocation2 + $0x80] ss:$2 sm:$0xff]  ;;  %v1986_v23 = vld [vmem:[#allocation2 + $0x81] ss:$2 sm:$0xff]  ;;  %v8246_v25 = vpop.f32.mrf.mxu0  ;;  %2680 = vrot.lane.b32.xlu0 %v2630_v21, %s9116_s15  ;;  %v2353_v26 = vor.u32 %v2351_v8, %v2349_v16  ;;  %v2344_v29 = vrot.slane %v2342_v17, 1 }
 0x143   : > { %2147 = vst.msk [vmem:[#allocation5 + $0xb0] sm:$0xff] %vm912_vm0, %v2042_v18  ;;  %v2041_v30 = vmax.f32 %v1922_v22, %v1986_v23  ;;  %v1800_v31 = vmax.f32 %v1692_v63, %v1696_v19  ;;  %v1694_v32 = vmax.f32 %v1316_v20, 0.0  ;;  %v1327_v33 = vadd.f32 %v8246_v25, %v9503_v55 }
 0x144   : > { %2537 = vrot.lane.b32.xlu1 %v2353_v26, %s9117_s21  ;;  %v1318_v34 = vpop.f32.mrf.mxu0  ;;  %v2345_v35 = vor.u32 %v2344_v29, %v2340_v27 }
 0x145   : > { %2146 = vst.msk [vmem:[#allocation5 + $0xa8] sm:$0xff] %vm912_vm0, %v2041_v30  ;;  %1864 = vst.msk [vmem:[#allocation2 + $0xb0] sm:$0xff] %vm912_vm0, %v1800_v31  ;;  %v1798_v37 = vmax.f32 %v1690_v3, %v1694_v32  ;;  %v1697_v38 = vmax.f32 %v1327_v33, 0.0  ;;  %v1319_v39 = vadd.f32 %v9503_v55, %v1318_v34 }
 0x146   : > { %v8249_v40 = vpop.f32.mrf.mxu0  ;;  %v2350_v41 = vsel %vm2278_vm3, %v2345_v35, %v2349_v16 }
 0x147   : > { %1862 = vst.msk [vmem:[#allocation2 + $0xa0] sm:$0xff] %vm912_vm0, %v1798_v37  ;;  %v1801_v43 = vmax.f32 %v1693_v36, %v1697_v38  ;;  %v1695_v44 = vmax.f32 %v1319_v39, 0.0  ;;  %2535 = vrot.lane.b32.xlu0 %v2350_v41, %s9117_s21  ;;  %v1340_v48 = vadd.f32 %v8249_v40, %v9503_v55 }
 0x148   : > { %v1331_v45 = vpop.f32.mrf.mxu0 }
 0x149   : > { %1865 = vst.msk [vmem:[#allocation2 + $0xb8] sm:$0xff] %vm912_vm0, %v1801_v43  ;;  %v1799_v47 = vmax.f32 %v1691_v42, %v1695_v44  ;;  %v1332_v52 = vadd.f32 %v9503_v55, %v1331_v45  ;;  %v1700_v60 = vmax.f32 %v1340_v48, 0.0  ;;  %v2197_v44 = vld [vmem:[#allocation5 + $0xd8] sm:$0xff] }
 0x14a   : > { %v8250_v49 = vpop.f32.mrf.mxu0  ;;  %v2192_v50 = vld [vmem:[#allocation5 + $0xb0] sm:$0xff] }
 0x14b   : > { %1863 = vst.msk [vmem:[#allocation2 + $0xa8] sm:$0xff] %vm912_vm0, %v1799_v47  ;;  %v9763_v53 = vpack.c.bf16 %v2193_v46, %v2192_v50  ;;  %v1698_v1 = vmax.f32 %v1332_v52, 0.0  ;;  %v1343_v10 = vadd.f32 %v8250_v49, %v9503_v55  ;;  %v2194_v49 = vld [vmem:[#allocation5 + $0xc0] sm:$0xff] }
 0x14c   : > { %v1334_v54 = vpop.f32.mrf.mxu0  ;;  %v2191_v56 = vld [vmem:[#allocation5 + $0xa8] sm:$0xff] }
 0x14d   : > { %v2632_v57 = vrot.slane %v9763_v53, 1  ;;  %v9766_v59 = vpack.c.bf16 %v2191_v56, %v2190_v51  ;;  %v2362_v63 = vshll.u32 %v9763_v53, 16  ;;  %v2366_v5 = vshrl.u32 %v9763_v53, 16 }
 0x14e   : > { %v8253_v61 = vpop.f32.mrf.mxu0  ;;  %v1335_v22 = vadd.f32 %v9503_v55, %v1334_v54  ;;  %v1701_v34 = vmax.f32 %v1343_v10, 0.0 }
 0x14f   : > { %v1356_v2 = vadd.f32 %v8253_v61, %v9503_v55  ;;  %2686 = vrot.lane.b32.xlu1 %v2632_v57, %s9116_s15  ;;  %v2631_v3 = vrot.slane %v9766_v59, 1  ;;  %v2364_v13 = vrot.slane %v2362_v63, 1  ;;  %v2357_v15 = vshll.u32 %v9766_v59, 16 }
 0x150   : > { %v1928_v7 = vld [vmem:[#allocation2 + $0xb0] ss:$2 sm:$0xff]  ;;  %v1992_v8 = vld [vmem:[#allocation2 + $0xb1] ss:$2 sm:$0xff]  ;;  %v1347_v12 = vpop.f32.mrf.mxu0  ;;  %v2355_v25 = vshrl.u32 %v9766_v59, 16  ;;  %v1699_v40 = vmax.f32 %v1335_v22, 0.0 }
 0x151   : > { %v2044_v16 = vmax.f32 %v1928_v7, %v1992_v8  ;;  %v1704_v17 = vmax.f32 %v1356_v2, 0.0  ;;  %v1348_v18 = vadd.f32 %v9503_v55, %v1347_v12  ;;  %v2633_v19 = vsel %vm2615_vm2, %v2631_v3, %v2632_v57 }
 0x152   : > { %v1926_v20 = vld [vmem:[#allocation2 + $0xa0] ss:$2 sm:$0xff]  ;;  %v1990_v21 = vld [vmem:[#allocation2 + $0xa1] ss:$2 sm:$0xff]  ;;  %v8254_v23 = vpop.f32.mrf.mxu0  ;;  %2684 = vrot.lane.b32.xlu0 %v2633_v19, %s9116_s15  ;;  %v2368_v24 = vor.u32 %v2366_v5, %v2364_v13  ;;  %v2359_v26 = vrot.slane %v2357_v15, 1 }
 0x153   : > { %2149 = vst.msk [vmem:[#allocation5 + $0xd0] sm:$0xff] %vm912_vm0, %v2044_v16  ;;  %v2043_v27 = vmax.f32 %v1926_v20, %v1990_v21  ;;  %v1804_v29 = vmax.f32 %v1700_v60, %v1704_v17  ;;  %v1702_v30 = vmax.f32 %v1348_v18, 0.0  ;;  %v1359_v31 = vadd.f32 %v8254_v23, %v9503_v55 }
 0x154   : > { %2541 = vrot.lane.b32.xlu1 %v2368_v24, %s9117_s21  ;;  %v1350_v32 = vpop.f32.mrf.mxu0  ;;  %v2360_v33 = vor.u32 %v2359_v26, %v2355_v25 }
 0x155   : > { %2148 = vst.msk [vmem:[#allocation5 + $0xc8] sm:$0xff] %vm912_vm0, %v2043_v27  ;;  %1868 = vst.msk [vmem:[#allocation2 + $0xd0] sm:$0xff] %vm912_vm0, %v1804_v29  ;;  %v1802_v35 = vmax.f32 %v1698_v1, %v1702_v30  ;;  %v1705_v36 = vmax.f32 %v1359_v31, 0.0  ;;  %v1351_v37 = vadd.f32 %v9503_v55, %v1350_v32  ;;  %v9814_v31 = vld [vmem:[%s11921_s2] ss:$0 sm:$0xff] }
 0x156   : > { %v8257_v38 = vpop.f32.mrf.mxu0  ;;  %v2365_v39 = vsel %vm2278_vm3, %v2360_v33, %v2364_v13 }
 0x157   : > { %1866 = vst.msk [vmem:[#allocation2 + $0xc0] sm:$0xff] %vm912_vm0, %v1802_v35  ;;  %v1805_v41 = vmax.f32 %v1701_v34, %v1705_v36  ;;  %v1703_v42 = vmax.f32 %v1351_v37, 0.0  ;;  %2539 = vrot.lane.b32.xlu0 %v2365_v39, %s9117_s21  ;;  %v1372_v46 = vadd.f32 %v8257_v38, %v9503_v55 }
 0x158   : > { %v1363_v43 = vpop.f32.mrf.mxu0 }
 0x159   : > { %1869 = vst.msk [vmem:[#allocation2 + $0xd8] sm:$0xff] %vm912_vm0, %v1805_v41  ;;  %v1803_v45 = vmax.f32 %v1699_v40, %v1703_v42  ;;  %v1364_v50 = vadd.f32 %v9503_v55, %v1363_v43  ;;  %v1708_v60 = vmax.f32 %v1372_v46, 0.0 }
 0x15a   : > { %v8258_v47 = vpop.f32.mrf.mxu0  ;;  %v2196_v48 = vld [vmem:[#allocation5 + $0xd0] sm:$0xff] }
 0x15b   : > { %1867 = vst.msk [vmem:[#allocation2 + $0xc8] sm:$0xff] %vm912_vm0, %v1803_v45  ;;  %v9793_v51 = vpack.c.bf16 %v2197_v44, %v2196_v48  ;;  %v1706_v1 = vmax.f32 %v1364_v50, 0.0  ;;  %v1375_v10 = vadd.f32 %v8258_v47, %v9503_v55  ;;  %v2201_v44 = vld [vmem:[#allocation5 + $0xf8] sm:$0xff] }
 0x15c   : > { %v1366_v52 = vpop.f32.mrf.mxu0  ;;  %v2195_v54 = vld [vmem:[#allocation5 + $0xc8] sm:$0xff] }
 0x15d   : > { %v2635_v56 = vrot.slane %v9793_v51, 1  ;;  %v9796_v57 = vpack.c.bf16 %v2195_v54, %v2194_v49  ;;  %v2377_v63 = vshll.u32 %v9793_v51, 16  ;;  %v2381_v5 = vshrl.u32 %v9793_v51, 16  ;;  %v2198_v49 = vld [vmem:[#allocation5 + $0xe0] sm:$0xff] }
 0x15e   : > { %v8261_v61 = vpop.f32.mrf.mxu0  ;;  %v1367_v22 = vadd.f32 %v9503_v55, %v1366_v52  ;;  %v1709_v34 = vmax.f32 %v1375_v10, 0.0 }
 0x15f   : > { %v1388_v2 = vadd.f32 %v8261_v61, %v9503_v55  ;;  %2690 = vrot.lane.b32.xlu1 %v2635_v56, %s9116_s15  ;;  %v2634_v3 = vrot.slane %v9796_v57, 1  ;;  %v2379_v13 = vrot.slane %v2377_v63, 1  ;;  %v2372_v15 = vshll.u32 %v9796_v57, 16 }
 0x160   : > { %v1932_v7 = vld [vmem:[#allocation2 + $0xd0] ss:$2 sm:$0xff]  ;;  %v1996_v8 = vld [vmem:[#allocation2 + $0xd1] ss:$2 sm:$0xff]  ;;  %v1379_v12 = vpop.f32.mrf.mxu0  ;;  %v2370_v25 = vshrl.u32 %v9796_v57, 16  ;;  %v1707_v40 = vmax.f32 %v1367_v22, 0.0 }
 0x161   : > { %v2046_v16 = vmax.f32 %v1932_v7, %v1996_v8  ;;  %v1712_v17 = vmax.f32 %v1388_v2, 0.0  ;;  %v1380_v18 = vadd.f32 %v9503_v55, %v1379_v12  ;;  %v2636_v19 = vsel %vm2615_vm2, %v2634_v3, %v2635_v56 }
 0x162   : > { %v1930_v20 = vld [vmem:[#allocation2 + $0xc0] ss:$2 sm:$0xff]  ;;  %v1994_v21 = vld [vmem:[#allocation2 + $0xc1] ss:$2 sm:$0xff]  ;;  %v8262_v23 = vpop.f32.mrf.mxu0  ;;  %2688 = vrot.lane.b32.xlu0 %v2636_v19, %s9116_s15  ;;  %v2383_v24 = vor.u32 %v2381_v5, %v2379_v13  ;;  %v2374_v26 = vrot.slane %v2372_v15, 1 }
 0x163   : > { %2151 = vst.msk [vmem:[#allocation5 + $0xf0] sm:$0xff] %vm912_vm0, %v2046_v16  ;;  %v2045_v27 = vmax.f32 %v1930_v20, %v1994_v21  ;;  %v1808_v29 = vmax.f32 %v1708_v60, %v1712_v17  ;;  %v1710_v30 = vmax.f32 %v1380_v18, 0.0  ;;  %v1391_v32 = vadd.f32 %v9814_v31, %v8262_v23 }
 0x164   : > { %2545 = vrot.lane.b32.xlu1 %v2383_v24, %s9117_s21  ;;  %v1382_v55 = vpop.f32.mrf.mxu0  ;;  %v2375_v33 = vor.u32 %v2374_v26, %v2370_v25 }
 0x165   : > { %2150 = vst.msk [vmem:[#allocation5 + $0xe8] sm:$0xff] %vm912_vm0, %v2045_v27  ;;  %1872 = vst.msk [vmem:[#allocation2 + $0xf0] sm:$0xff] %vm912_vm0, %v1808_v29  ;;  %v1806_v35 = vmax.f32 %v1706_v1, %v1710_v30  ;;  %v1713_v36 = vmax.f32 %v1391_v32, 0.0  ;;  %v1383_v37 = vadd.f32 %v9814_v31, %v1382_v55 }
 0x166   : > { %v8265_v38 = vpop.f32.mrf.mxu0  ;;  %v2380_v39 = vsel %vm2278_vm3, %v2375_v33, %v2379_v13 }
 0x167   : > { %1870 = vst.msk [vmem:[#allocation2 + $0xe0] sm:$0xff] %vm912_vm0, %v1806_v35  ;;  %v1809_v41 = vmax.f32 %v1709_v34, %v1713_v36  ;;  %v1711_v42 = vmax.f32 %v1383_v37, 0.0  ;;  %2543 = vrot.lane.b32.xlu0 %v2380_v39, %s9117_s21  ;;  %v1404_v46 = vadd.f32 %v9814_v31, %v8265_v38 }
 0x168   : > { %v1395_v43 = vpop.f32.mrf.mxu0 }
 0x169   : > { %1873 = vst.msk [vmem:[#allocation2 + $0xf8] sm:$0xff] %vm912_vm0, %v1809_v41  ;;  %v1807_v45 = vmax.f32 %v1707_v40, %v1711_v42  ;;  %v1396_v50 = vadd.f32 %v9814_v31, %v1395_v43  ;;  %v1716_v63 = vmax.f32 %v1404_v46, 0.0  ;;  %v2205_v46 = vld [vmem:[#allocation5 + $0x118] sm:$0xff] }
 0x16a   : > { %v8266_v47 = vpop.f32.mrf.mxu0  ;;  %v2200_v48 = vld [vmem:[#allocation5 + $0xf0] sm:$0xff] }
 0x16b   : > { %1871 = vst.msk [vmem:[#allocation2 + $0xe8] sm:$0xff] %vm912_vm0, %v1807_v45  ;;  %v9828_v52 = vpack.c.bf16 %v2201_v44, %v2200_v48  ;;  %v1714_v3 = vmax.f32 %v1396_v50, 0.0  ;;  %v1407_v13 = vadd.f32 %v9814_v31, %v8266_v47 }
 0x16c   : > { %v1398_v54 = vpop.f32.mrf.mxu0  ;;  %v2199_v56 = vld [vmem:[#allocation5 + $0xe8] sm:$0xff] }
 0x16d   : > { %v2638_v60 = vrot.slane %v9828_v52, 1  ;;  %v9831_v61 = vpack.c.bf16 %v2199_v56, %v2198_v49  ;;  %v2392_v2 = vshll.u32 %v9828_v52, 16  ;;  %v2396_v8 = vshrl.u32 %v9828_v52, 16 }
 0x16e   : > { %v8269_v1 = vpop.f32.mrf.mxu0  ;;  %v1399_v24 = vadd.f32 %v9814_v31, %v1398_v54  ;;  %v1717_v36 = vmax.f32 %v1407_v13, 0.0  ;;  %v2202_v54 = vld [vmem:[#allocation5 + $0x100] sm:$0xff] }
 0x16f   : > { %v1420_v5 = vadd.f32 %v9814_v31, %v8269_v1  ;;  %2694 = vrot.lane.b32.xlu1 %v2638_v60, %s9116_s15  ;;  %v2637_v7 = vrot.slane %v9831_v61, 1  ;;  %v2394_v16 = vrot.slane %v2392_v2, 1  ;;  %v2387_v17 = vshll.u32 %v9831_v61, 16 }
 0x170   : > { %v1936_v10 = vld [vmem:[#allocation2 + $0xf0] ss:$2 sm:$0xff]  ;;  %v2000_v12 = vld [vmem:[#allocation2 + $0xf1] ss:$2 sm:$0xff]  ;;  %v1411_v15 = vpop.f32.mrf.mxu0  ;;  %v2385_v27 = vshrl.u32 %v9831_v61, 16  ;;  %v1715_v42 = vmax.f32 %v1399_v24, 0.0 }
 0x171   : > { %v2048_v18 = vmax.f32 %v1936_v10, %v2000_v12  ;;  %v1720_v19 = vmax.f32 %v1420_v5, 0.0  ;;  %v1412_v20 = vadd.f32 %v9814_v31, %v1411_v15  ;;  %v2639_v21 = vsel %vm2615_vm2, %v2637_v7, %v2638_v60 }
 0x172   : > { %v1934_v22 = vld [vmem:[#allocation2 + $0xe0] ss:$2 sm:$0xff]  ;;  %v1998_v23 = vld [vmem:[#allocation2 + $0xe1] ss:$2 sm:$0xff]  ;;  %v8270_v25 = vpop.f32.mrf.mxu0  ;;  %2692 = vrot.lane.b32.xlu0 %v2639_v21, %s9116_s15  ;;  %v2398_v26 = vor.u32 %v2396_v8, %v2394_v16  ;;  %v2389_v29 = vrot.slane %v2387_v17, 1 }
 0x173   : > { %2153 = vst.msk [vmem:[#allocation5 + $0x110] sm:$0xff] %vm912_vm0, %v2048_v18  ;;  %v2047_v30 = vmax.f32 %v1934_v22, %v1998_v23  ;;  %v1812_v32 = vmax.f32 %v1716_v63, %v1720_v19  ;;  %v1718_v55 = vmax.f32 %v1412_v20, 0.0  ;;  %v1423_v33 = vadd.f32 %v9814_v31, %v8270_v25 }
 0x174   : > { %2549 = vrot.lane.b32.xlu1 %v2398_v26, %s9117_s21  ;;  %v1414_v34 = vpop.f32.mrf.mxu0  ;;  %v2390_v35 = vor.u32 %v2389_v29, %v2385_v27 }
 0x175   : > { %2152 = vst.msk [vmem:[#allocation5 + $0x108] sm:$0xff] %vm912_vm0, %v2047_v30  ;;  %1876 = vst.msk [vmem:[#allocation2 + $0x110] sm:$0xff] %vm912_vm0, %v1812_v32  ;;  %v1810_v37 = vmax.f32 %v1714_v3, %v1718_v55  ;;  %v1721_v38 = vmax.f32 %v1423_v33, 0.0  ;;  %v1415_v39 = vadd.f32 %v9814_v31, %v1414_v34 }
 0x176   : > { %v8273_v40 = vpop.f32.mrf.mxu0  ;;  %v2395_v41 = vsel %vm2278_vm3, %v2390_v35, %v2394_v16 }
 0x177   : > { %1874 = vst.msk [vmem:[#allocation2 + $0x100] sm:$0xff] %vm912_vm0, %v1810_v37  ;;  %v1813_v43 = vmax.f32 %v1717_v36, %v1721_v38  ;;  %v1719_v44 = vmax.f32 %v1415_v39, 0.0  ;;  %2547 = vrot.lane.b32.xlu0 %v2395_v41, %s9117_s21  ;;  %v1436_v48 = vadd.f32 %v9814_v31, %v8273_v40 }
 0x178   : > { %v1427_v45 = vpop.f32.mrf.mxu0 }
 0x179   : > { %1877 = vst.msk [vmem:[#allocation2 + $0x118] sm:$0xff] %vm912_vm0, %v1813_v43  ;;  %v1811_v47 = vmax.f32 %v1715_v42, %v1719_v44  ;;  %v1428_v56 = vadd.f32 %v9814_v31, %v1427_v45  ;;  %v1724_v5 = vmax.f32 %v1436_v48, 0.0 }
 0x17a   : > { %v8274_v49 = vpop.f32.mrf.mxu0  ;;  %v2204_v50 = vld [vmem:[#allocation5 + $0x110] sm:$0xff] }
 0x17b   : > { %1875 = vst.msk [vmem:[#allocation2 + $0x108] sm:$0xff] %vm912_vm0, %v1811_v47  ;;  %v9858_v60 = vpack.c.bf16 %v2205_v46, %v2204_v50  ;;  %v1722_v10 = vmax.f32 %v1428_v56, 0.0  ;;  %v1439_v18 = vadd.f32 %v9814_v31, %v8274_v49 }
 0x17c   : > { %v1430_v63 = vpop.f32.mrf.mxu0  ;;  %v2203_v1 = vld [vmem:[#allocation5 + $0x108] sm:$0xff] }
 0x17d   : > { %v2641_v2 = vrot.slane %v9858_v60, 1  ;;  %v9861_v3 = vpack.c.bf16 %v2203_v1, %v2202_v54  ;;  %v2407_v8 = vshll.u32 %v9858_v60, 16  ;;  %v2411_v15 = vshrl.u32 %v9858_v60, 16 }
 0x17e   : > { %v8277_v7 = vpop.f32.mrf.mxu0  ;;  %v1431_v29 = vadd.f32 %v9814_v31, %v1430_v63  ;;  %v1725_v41 = vmax.f32 %v1439_v18, 0.0 }
 0x17f   : > { %v1452_v12 = vadd.f32 %v9814_v31, %v8277_v7  ;;  %2698 = vrot.lane.b32.xlu1 %v2641_v2, %s9116_s15  ;;  %v2640_v13 = vrot.slane %v9861_v3, 1  ;;  %v2409_v20 = vrot.slane %v2407_v8, 1  ;;  %v2402_v21 = vshll.u32 %v9861_v3, 16  ;;  %v2209_v7 = vld [vmem:[#allocation5 + $0x138] sm:$0xff] }
 0x180   : > { %v1940_v16 = vld [vmem:[#allocation2 + $0x110] ss:$2 sm:$0xff]  ;;  %v2004_v17 = vld [vmem:[#allocation2 + $0x111] ss:$2 sm:$0xff]  ;;  %v1443_v19 = vpop.f32.mrf.mxu0  ;;  %v2400_v55 = vshrl.u32 %v9861_v3, 16  ;;  %v1723_v47 = vmax.f32 %v1431_v29, 0.0 }
 0x181   : > { %v2050_v22 = vmax.f32 %v1940_v16, %v2004_v17  ;;  %v1728_v23 = vmax.f32 %v1452_v12, 0.0  ;;  %v1444_v24 = vadd.f32 %v9814_v31, %v1443_v19  ;;  %v2642_v25 = vsel %vm2615_vm2, %v2640_v13, %v2641_v2  ;;  %v2671_v56 = vpop.permute.xlu1 %2670  ;;  %v2206_v17 = vld [vmem:[#allocation5 + $0x120] sm:$0xff] }
 0x182   : > { %v1938_v26 = vld [vmem:[#allocation2 + $0x100] ss:$2 sm:$0xff]  ;;  %v2002_v27 = vld [vmem:[#allocation2 + $0x101] ss:$2 sm:$0xff]  ;;  %v8278_v30 = vpop.f32.mrf.mxu0  ;;  %2696 = vrot.lane.b32.xlu0 %v2642_v25, %s9116_s15  ;;  %v2413_v32 = vor.u32 %v2411_v15, %v2409_v20  ;;  %v2404_v33 = vrot.slane %v2402_v21, 1 }
 0x183   : > { %2155 = vst.msk [vmem:[#allocation5 + $0x130] sm:$0xff] %vm912_vm0, %v2050_v22  ;;  %v2049_v34 = vmax.f32 %v1938_v26, %v2002_v27  ;;  %v1816_v35 = vmax.f32 %v1724_v5, %v1728_v23  ;;  %v1726_v36 = vmax.f32 %v1444_v24, 0.0  ;;  %v1455_v37 = vadd.f32 %v9814_v31, %v8278_v30 }
 0x184   : > { %2553 = vrot.lane.b32.xlu1 %v2413_v32, %s9117_s21  ;;  %v1446_v38 = vpop.f32.mrf.mxu0  ;;  %v2669_v39 = vpop.permute.xlu0 %2668  ;;  %v2405_v40 = vor.u32 %v2404_v33, %v2400_v55 }
 0x185   : > { %2154 = vst.msk [vmem:[#allocation5 + $0x128] sm:$0xff] %vm912_vm0, %v2049_v34  ;;  %1880 = vst.msk [vmem:[#allocation2 + $0x130] sm:$0xff] %vm912_vm0, %v1816_v35  ;;  %v1814_v42 = vmax.f32 %v1722_v10, %v1726_v36  ;;  %v1729_v43 = vmax.f32 %v1455_v37, 0.0  ;;  %v1447_v44 = vadd.f32 %v9814_v31, %v1446_v38 }
 0x186   : > { %v8281_v45 = vpop.f32.mrf.mxu0  ;;  %v2410_v46 = vsel %vm2278_vm3, %v2405_v40, %v2409_v20 }
 0x187   : > { %1878 = vst.msk [vmem:[#allocation2 + $0x120] sm:$0xff] %vm912_vm0, %v1814_v42  ;;  %v1817_v48 = vmax.f32 %v1725_v41, %v1729_v43  ;;  %v1727_v49 = vmax.f32 %v1447_v44, 0.0  ;;  %2551 = vrot.lane.b32.xlu0 %v2410_v46, %s9117_s21  ;;  %v1468_v1 = vadd.f32 %v9814_v31, %v8281_v45 }
 0x188   : > { %v1459_v50 = vpop.f32.mrf.mxu0  ;;  %v2526_v54 = vpop.permute.xlu0 %2525 }
 0x189   : > { %1881 = vst.msk [vmem:[#allocation2 + $0x138] sm:$0xff] %vm912_vm0, %v1817_v48  ;;  %v1815_v63 = vmax.f32 %v1723_v47, %v1727_v49  ;;  %v1460_v2 = vadd.f32 %v9814_v31, %v1459_v50  ;;  %v2735_v5 = vsel %vm912_vm0, %v9557_v9, %v2526_v54  ;;  %v1732_v22 = vmax.f32 %v1468_v1, 0.0 }
 0x18a   : > { %v2800_v8 = vsel %vm2792_vm1, %v2735_v5, %v2671_v56  ;;  %v8282_v10 = vpop.f32.mrf.mxu0  ;;  %v2208_v12 = vld [vmem:[#allocation5 + $0x130] sm:$0xff] }
 0x18b   : > { %1879 = vst.msk [vmem:[#allocation2 + $0x128] sm:$0xff] %vm912_vm0, %v1815_v63  ;;  %v2880_v13 = vshrl.u32 %v2800_v8, 16  ;;  %v2883_v15 = vshll.u32 %v2800_v8, 16  ;;  %v9892_v16 = vadd.f32 %v9814_v31, %v8282_v10  ;;  %v9894_v20 = vpack.c.bf16 %v2209_v7, %v2208_v12 }
 0x18c   : > { %v1462_v18 = vpop.f32.mrf.mxu0  ;;  %v2524_v19 = vpop.permute.xlu0 %2523  ;;  %v2207_v21 = vld [vmem:[#allocation5 + $0x128] sm:$0xff]  ;;  %v1730_v9 = vmax.f32 %v1460_v2, 0.0 }
 0x18d   : > { %v2882_v23 = vrot.slane %v2880_v13, 3  ;;  %v2885_v24 = vrot.slane %v2883_v15, 4  ;;  %v2733_v25 = vsel %vm912_vm0, %v9621_v14, %v2524_v19  ;;  %v2644_v27 = vrot.slane %v9894_v20, 1 }
 0x18e   : > { %v8285_v26 = vpop.f32.mrf.mxu0  ;;  %v9899_v29 = vpack.c.bf16 %v2207_v21, %v2206_v17  ;;  %v1733_v30 = vmax.f32 %v9892_v16, 0.0  ;;  %v2798_v32 = vsel %vm2792_vm1, %v2733_v25, %v2669_v39  ;;  %v2422_v33 = vshll.u32 %v9894_v20, 16 }
 0x18f   : > { %v1484_v55 = vadd.f32 %v9814_v31, %v8285_v26  ;;  %v2873_v36 = vshrl.u32 %v2798_v32, 16  ;;  %v2876_v37 = vshll.u32 %v2798_v32, 16  ;;  %2702 = vrot.lane.b32.xlu1 %v2644_v27, %s9116_s15  ;;  %v1463_v45 = vadd.f32 %v9814_v31, %v1462_v18 }
 0x190   : > { %v1944_v34 = vld [vmem:[#allocation2 + $0x130] ss:$2 sm:$0xff]  ;;  %v2008_v35 = vld [vmem:[#allocation2 + $0x131] ss:$2 sm:$0xff]  ;;  %v1475_v14 = vpop.f32.mrf.mxu0  ;;  %v2643_v43 = vrot.slane %v9899_v29, 1  ;;  %v2424_v1 = vrot.slane %v2422_v33, 1  ;;  %v2886_v21 = vor.u32 %v2885_v24, %v2882_v23 }
 0x191   : > { %v2052_v38 = vmax.f32 %v1944_v34, %v2008_v35  ;;  %v1736_v40 = vmax.f32 %v1484_v55, 0.0  ;;  %v1476_v41 = vadd.f32 %v9814_v31, %v1475_v14  ;;  %v2675_v42 = vpop.permute.xlu1 %2674  ;;  %v2875_v46 = vrot.slane %v2873_v36, 3 }
 0x192   : > { %v1942_v44 = vld [vmem:[#allocation2 + $0x120] ss:$2 sm:$0xff]  ;;  %v2006_v39 = vld [vmem:[#allocation2 + $0x121] ss:$2 sm:$0xff]  ;;  %v2878_v47 = vrot.slane %v2876_v37, 4  ;;  %v8286_v48 = vpop.f32.mrf.mxu0  ;;  %v2645_v63 = vsel %vm2615_vm2, %v2643_v43, %v2644_v27  ;;  %v2426_v2 = vshrl.u32 %v9894_v20, 16 }
 0x193   : > { %2157 = vst.msk [vmem:[#allocation5 + $0x150] sm:$0xff] %vm912_vm0, %v2052_v38  ;;  %v2051_v49 = vmax.f32 %v1942_v44, %v2006_v39  ;;  %v1820_v50 = vmax.f32 %v1732_v22, %v1736_v40  ;;  %v1734_v54 = vmax.f32 %v1476_v41, 0.0  ;;  %v1487_v56 = vadd.f32 %v9814_v31, %v8286_v48  ;;  %2700 = vrot.lane.b32.xlu0 %v2645_v63, %s9116_s15 }
 0x194   : > { %v1478_v5 = vpop.f32.mrf.mxu0  ;;  %v2417_v7 = vshll.u32 %v9899_v29, 16  ;;  %v2879_v13 = vor.u32 %v2878_v47, %v2875_v46  ;;  %v2428_v15 = vor.u32 %v2426_v2, %v2424_v1  ;;  %v2415_v18 = vshrl.u32 %v9899_v29, 16  ;;  %v2673_v14 = vpop.permute.xlu0 %2672 }
 0x195   : > { %2156 = vst.msk [vmem:[#allocation5 + $0x148] sm:$0xff] %vm912_vm0, %v2051_v49  ;;  %1884 = vst.msk [vmem:[#allocation2 + $0x150] sm:$0xff] %vm912_vm0, %v1820_v50  ;;  %v1818_v8 = vmax.f32 %v1730_v9, %v1734_v54  ;;  %v1737_v10 = vmax.f32 %v1487_v56, 0.0  ;;  %v1479_v12 = vadd.f32 %v9814_v31, %v1478_v5  ;;  %v1731_v22 = vmax.f32 %v1463_v45, 0.0 }
 0x196   : > { %v2530_v16 = vpop.permute.xlu1 %2529  ;;  %v8289_v17 = vpop.f32.mrf.mxu0  ;;  %v2419_v19 = vrot.slane %v2417_v7, 1  ;;  %2557 = vrot.lane.b32.xlu1 %v2428_v15, %s9117_s21  ;;  %v9925_v55 = vsel %vm2857_vm4, %v2879_v13, %v2886_v21 }
 0x197   : > { %1882 = vst.msk [vmem:[#allocation2 + $0x140] sm:$0xff] %vm912_vm0, %v1818_v8  ;;  %v1821_v25 = vmax.f32 %v1733_v30, %v1737_v10  ;;  %v1735_v26 = vmax.f32 %v1479_v12, 0.0  ;;  %v2739_v9 = vsel %vm912_vm0, %v9666_v6, %v2530_v16  ;;  %8339 = vmatprep.mubr.msk.bf16.mxu1 %vm3210_vm5, %v9925_v55  ;;  %v2213_v30 = vld [vmem:[#allocation5 + $0x158] sm:$0xff]  ;;  %v1500_v38 = vadd.f32 %v9814_v31, %v8289_v17 }
 0x198   : > { %v2804_v27 = vsel %vm2792_vm1, %v2739_v9, %v2675_v42  ;;  %v2420_v32 = vor.u32 %v2419_v19, %v2415_v18  ;;  %v1491_v33 = vpop.f32.mrf.mxu0  ;;  %v2210_v42 = vld [vmem:[#allocation5 + $0x140] sm:$0xff] }
 0x199   : > { %1885 = vst.msk [vmem:[#allocation2 + $0x158] sm:$0xff] %vm912_vm0, %v1821_v25  ;;  %v1819_v23 = vmax.f32 %v1731_v22, %v1735_v26  ;;  %v2895_v24 = vshrl.u32 %v2804_v27, 16  ;;  %v2898_v34 = vshll.u32 %v2804_v27, 16  ;;  %v1492_v40 = vadd.f32 %v9814_v31, %v1491_v33 }
 0x19a   : > { %v2425_v6 = vsel %vm2278_vm3, %v2420_v32, %v2424_v1  ;;  %v2528_v35 = vpop.permute.xlu1 %2527  ;;  %v8290_v36 = vpop.f32.mrf.mxu0  ;;  %v2212_v37 = vld [vmem:[#allocation5 + $0x150] sm:$0xff]  ;;  %v1740_v1 = vmax.f32 %v1500_v38, 0.0 }
 0x19b   : > { %1883 = vst.msk [vmem:[#allocation2 + $0x148] sm:$0xff] %vm912_vm0, %v1819_v23  ;;  %2555 = vrot.lane.b32.xlu0 %v2425_v6, %s9117_s21  ;;  %v2737_v41 = vsel %vm912_vm0, %v9669_v11, %v2528_v35  ;;  %v2897_v43 = vrot.slane %v2895_v24, 3  ;;  %v2900_v44 = vrot.slane %v2898_v34, 4  ;;  %v9938_v46 = vpack.c.bf16 %v2213_v30, %v2212_v37 }
 0x19c   : > { %v2802_v39 = vsel %vm2792_vm1, %v2737_v41, %v2673_v14  ;;  %v1494_v45 = vpop.f32.mrf.mxu0  ;;  %v2211_v47 = vld [vmem:[#allocation5 + $0x148] sm:$0xff]  ;;  %v1738_v12 = vmax.f32 %v1492_v40, 0.0  ;;  %v1503_v13 = vadd.f32 %v9814_v31, %v8290_v36 }
 0x19d   : > { %v2888_v48 = vshrl.u32 %v2802_v39, 16  ;;  %v2891_v49 = vshll.u32 %v2802_v39, 16  ;;  %v2647_v54 = vrot.slane %v9938_v46, 1  ;;  %v9941_v56 = vpack.c.bf16 %v2211_v47, %v2210_v42 }
 0x19e   : > { %v8293_v50 = vpop.f32.mrf.mxu0  ;;  %v2437_v63 = vshll.u32 %v9938_v46, 16  ;;  %v2901_v10 = vor.u32 %v2900_v44, %v2897_v43  ;;  %v1495_v9 = vadd.f32 %v9814_v31, %v1494_v45  ;;  %v2441_v23 = vshrl.u32 %v9938_v46, 16 }
 0x19f   : > { %v2890_v11 = vrot.slane %v2888_v48, 3  ;;  %v2893_v2 = vrot.slane %v2891_v49, 4  ;;  %v1516_v5 = vadd.f32 %v9814_v31, %v8293_v50  ;;  %2706 = vrot.lane.b32.xlu1 %v2647_v54, %s9116_s15  ;;  %v2646_v16 = vrot.slane %v9941_v56, 1 }
 0x1a0   : > { %v1948_v7 = vld [vmem:[#allocation2 + $0x150] ss:$2 sm:$0xff]  ;;  %v2012_v8 = vld [vmem:[#allocation2 + $0x151] ss:$2 sm:$0xff]  ;;  %v1507_v15 = vpop.f32.mrf.mxu0  ;;  %v2439_v33 = vrot.slane %v2437_v63, 1  ;;  %v2432_v38 = vshll.u32 %v9941_v56, 16 }
 0x1a1   : > { %v2054_v17 = vmax.f32 %v1948_v7, %v2012_v8  ;;  %v2894_v18 = vor.u32 %v2893_v2, %v2890_v11  ;;  %v1744_v19 = vmax.f32 %v1516_v5, 0.0  ;;  %v1508_v21 = vadd.f32 %v9814_v31, %v1507_v15  ;;  %v2679_v22 = vpop.permute.xlu1 %2678 }
 0x1a2   : > { %v1946_v25 = vld [vmem:[#allocation2 + $0x140] ss:$2 sm:$0xff]  ;;  %v2010_v26 = vld [vmem:[#allocation2 + $0x141] ss:$2 sm:$0xff]  ;;  %v8294_v27 = vpop.f32.mrf.mxu0  ;;  %v2648_v32 = vsel %vm2615_vm2, %v2646_v16, %v2647_v54  ;;  %v2443_v35 = vor.u32 %v2441_v23, %v2439_v33  ;;  %v1741_v40 = vmax.f32 %v1503_v13, 0.0  ;;  %v2430_v45 = vshrl.u32 %v9941_v56, 16 }
 0x1a3   : > { %2159 = vst.msk [vmem:[#allocation5 + $0x170] sm:$0xff] %vm912_vm0, %v2054_v17  ;;  %v2053_v24 = vmax.f32 %v1946_v25, %v2010_v26  ;;  %v1824_v34 = vmax.f32 %v1740_v1, %v1744_v19  ;;  %v1742_v30 = vmax.f32 %v1508_v21, 0.0  ;;  %v1519_v6 = vadd.f32 %v9814_v31, %v8294_v27  ;;  %2704 = vrot.lane.b32.xlu0 %v2648_v32, %s9116_s15  ;;  %v2214_v17 = vld [vmem:[#allocation5 + $0x160] sm:$0xff] }
 0x1a4   : > { %v9956_v36 = vsel %vm2857_vm4, %v2894_v18, %v2901_v10  ;;  %v1510_v37 = vpop.f32.mrf.mxu0  ;;  %v2677_v14 = vpop.permute.xlu0 %2676  ;;  %2561 = vrot.lane.b32.xlu1 %v2443_v35, %s9117_s21  ;;  %v2434_v47 = vrot.slane %v2432_v38, 1  ;;  %v1739_v48 = vmax.f32 %v1495_v9, 0.0 }
 0x1a5   : > { %2158 = vst.msk [vmem:[#allocation5 + $0x168] sm:$0xff] %vm912_vm0, %v2053_v24  ;;  %1888 = vst.msk [vmem:[#allocation2 + $0x170] sm:$0xff] %vm912_vm0, %v1824_v34  ;;  %v1822_v41 = vmax.f32 %v1738_v12, %v1742_v30  ;;  %v1745_v42 = vmax.f32 %v1519_v6, 0.0  ;;  %8340 = vmatmul.mubr.msk.bf16.vlgmr.msra.gmra.mxu1 %vm3210_vm5, %v9956_v36  ;;  %v1511_v43 = vadd.f32 %v9814_v31, %v1510_v37  ;;  %v2217_v12 = vld [vmem:[#allocation5 + $0x178] sm:$0xff] }
 0x1a6   : > { %v2534_v44 = vpop.permute.xlu1 %2533  ;;  %v8297_v39 = vpop.f32.mrf.mxu0  ;;  %v2435_v1 = vor.u32 %v2434_v47, %v2430_v45 }
 0x1a7   : > { %1886 = vst.msk [vmem:[#allocation2 + $0x160] sm:$0xff] %vm912_vm0, %v1822_v41  ;;  %v1825_v49 = vmax.f32 %v1741_v40, %v1745_v42  ;;  %v1743_v50 = vmax.f32 %v1511_v43, 0.0  ;;  %v2743_v54 = vsel %vm912_vm0, %v9703_v0, %v2534_v44  ;;  %v1532_v8 = vadd.f32 %v9814_v31, %v8297_v39 }
 0x1a8   : > { %v2808_v63 = vsel %vm2792_vm1, %v2743_v54, %v2679_v22  ;;  %v1523_v11 = vpop.f32.mrf.mxu0  ;;  %v2440_v13 = vsel %vm2278_vm3, %v2435_v1, %v2439_v33 }
 0x1a9   : > { %1889 = vst.msk [vmem:[#allocation2 + $0x178] sm:$0xff] %vm912_vm0, %v1825_v49  ;;  %v1823_v2 = vmax.f32 %v1739_v48, %v1743_v50  ;;  %v2910_v5 = vshrl.u32 %v2808_v63, 16  ;;  %v2913_v7 = vshll.u32 %v2808_v63, 16  ;;  %v2532_v10 = vpop.permute.xlu0 %2531  ;;  %2559 = vrot.lane.b32.xlu0 %v2440_v13, %s9117_s21  ;;  %v1524_v19 = vadd.f32 %v9814_v31, %v1523_v11 }
 0x1aa   : > { %v2741_v15 = vsel %vm912_vm0, %v9706_v4, %v2532_v10  ;;  %v8298_v16 = vpop.f32.mrf.mxu0  ;;  %v2216_v0 = vld [vmem:[#allocation5 + $0x170] sm:$0xff]  ;;  %v1748_v4 = vmax.f32 %v1532_v8, 0.0 }
 0x1ab   : > { %1887 = vst.msk [vmem:[#allocation2 + $0x168] sm:$0xff] %vm912_vm0, %v1823_v2  ;;  %v2912_v18 = vrot.slane %v2910_v5, 3  ;;  %v2806_v21 = vsel %vm2792_vm1, %v2741_v15, %v2677_v14  ;;  %v2915_v22 = vrot.slane %v2913_v7, 4  ;;  %v9979_v27 = vpack.c.bf16 %v2217_v12, %v2216_v0 }
 0x1ac   : > { %v2903_v25 = vshrl.u32 %v2806_v21, 16  ;;  %v2906_v26 = vshll.u32 %v2806_v21, 16  ;;  %v1526_v9 = vpop.f32.mrf.mxu0  ;;  %v2215_v32 = vld [vmem:[#allocation5 + $0x168] sm:$0xff]  ;;  %v1746_v35 = vmax.f32 %v1524_v19, 0.0  ;;  %v1535_v37 = vadd.f32 %v9814_v31, %v8298_v16 }
 0x1ad   : > { %v9981_v33 = vpack.c.bf16 %v2215_v32, %v2214_v17  ;;  %v2650_v30 = vrot.slane %v9979_v27, 1  ;;  %v2452_v6 = vshll.u32 %v9979_v27, 16  ;;  %v2916_v42 = vor.u32 %v2915_v22, %v2912_v18 }
 0x1ae   : > { %v2905_v23 = vrot.slane %v2903_v25, 3  ;;  %v2908_v24 = vrot.slane %v2906_v26, 4  ;;  %v8301_v34 = vpop.f32.mrf.mxu0  ;;  %v2456_v45 = vshrl.u32 %v9979_v27, 16  ;;  %v1527_v11 = vadd.f32 %v9814_v31, %v1526_v9 }
 0x1af   : > { %v1548_v14 = vadd.f32 %v9814_v31, %v8301_v34  ;;  %v2649_v38 = vrot.slane %v9981_v33, 1  ;;  %2710 = vrot.lane.b32.xlu1 %v2650_v30, %s9116_s15  ;;  %v2454_v39 = vrot.slane %v2452_v6, 1  ;;  %v2447_v8 = vshll.u32 %v9981_v33, 16 }
 0x1b0   : > { %v1952_v40 = vld [vmem:[#allocation2 + $0x170] ss:$2 sm:$0xff]  ;;  %v2016_v41 = vld [vmem:[#allocation2 + $0x171] ss:$2 sm:$0xff]  ;;  %v2909_v43 = vor.u32 %v2908_v24, %v2905_v23  ;;  %v1539_v44 = vpop.f32.mrf.mxu0  ;;  %v2445_v17 = vshrl.u32 %v9981_v33, 16  ;;  %v1749_v19 = vmax.f32 %v1535_v37, 0.0 }
 0x1b1   : > { %v2056_v47 = vmax.f32 %v1952_v40, %v2016_v41  ;;  %v1752_v48 = vmax.f32 %v1548_v14, 0.0  ;;  %v1540_v49 = vadd.f32 %v9814_v31, %v1539_v44  ;;  %v2683_v50 = vpop.permute.xlu1 %2682  ;;  %v2651_v54 = vsel %vm2615_vm2, %v2649_v38, %v2650_v30 }
 0x1b2   : > { %v1950_v63 = vld [vmem:[#allocation2 + $0x160] ss:$2 sm:$0xff]  ;;  %v2014_v1 = vld [vmem:[#allocation2 + $0x161] ss:$2 sm:$0xff]  ;;  %v8302_v2 = vpop.f32.mrf.mxu0  ;;  %2708 = vrot.lane.b32.xlu0 %v2651_v54, %s9116_s15  ;;  %v9995_v5 = vsel %vm2857_vm4, %v2909_v43, %v2916_v42  ;;  %v2458_v7 = vor.u32 %v2456_v45, %v2454_v39  ;;  %v2449_v18 = vrot.slane %v2447_v8, 1  ;;  %v2221_v42 = vld [vmem:[#allocation5 + $0x198] sm:$0xff] }
 0x1b3   : > { %2161 = vst.msk [vmem:[#allocation5 + $0x190] sm:$0xff] %vm912_vm0, %v2056_v47  ;;  %v2055_v10 = vmax.f32 %v1950_v63, %v2014_v1  ;;  %v1828_v12 = vmax.f32 %v1748_v4, %v1752_v48  ;;  %v1750_v13 = vmax.f32 %v1540_v49, 0.0  ;;  %v1551_v15 = vadd.f32 %v9814_v31, %v8302_v2  ;;  %8343 = vmatprep.mubr.msk.bf16.mxu1 %vm3210_vm5, %v9995_v5  ;;  %v2218_v45 = vld [vmem:[#allocation5 + $0x180] sm:$0xff] }
 0x1b4   : > { %2565 = vrot.lane.b32.xlu1 %v2458_v7, %s9117_s21  ;;  %v1542_v16 = vpop.f32.mrf.mxu0  ;;  %v2681_v0 = vpop.permute.xlu0 %2680  ;;  %v2450_v32 = vor.u32 %v2449_v18, %v2445_v17  ;;  %v1747_v4 = vmax.f32 %v1527_v11, 0.0 }
 0x1b5   : > { %2160 = vst.msk [vmem:[#allocation5 + $0x188] sm:$0xff] %vm912_vm0, %v2055_v10  ;;  %1892 = vst.msk [vmem:[#allocation2 + $0x190] sm:$0xff] %vm912_vm0, %v1828_v12  ;;  %v1826_v21 = vmax.f32 %v1746_v35, %v1750_v13  ;;  %v1753_v22 = vmax.f32 %v1551_v15, 0.0  ;;  %v1543_v25 = vadd.f32 %v9814_v31, %v1542_v16 }
 0x1b6   : > { %v2538_v26 = vpop.permute.xlu1 %2537  ;;  %v8305_v9 = vpop.f32.mrf.mxu0  ;;  %v2455_v6 = vsel %vm2278_vm3, %v2450_v32, %v2454_v39 }
 0x1b7   : > { %1890 = vst.msk [vmem:[#allocation2 + $0x180] sm:$0xff] %vm912_vm0, %v1826_v21  ;;  %v1829_v23 = vmax.f32 %v1749_v19, %v1753_v22  ;;  %v1751_v24 = vmax.f32 %v1543_v25, 0.0  ;;  %v2747_v34 = vsel %vm912_vm0, %v9733_v58, %v2538_v26  ;;  %v1564_v40 = vadd.f32 %v9814_v31, %v8305_v9  ;;  %2563 = vrot.lane.b32.xlu0 %v2455_v6, %s9117_s21 }
 0x1b8   : > { %v2812_v30 = vsel %vm2792_vm1, %v2747_v34, %v2683_v50  ;;  %v1555_v37 = vpop.f32.mrf.mxu0 }
 0x1b9   : > { %1893 = vst.msk [vmem:[#allocation2 + $0x198] sm:$0xff] %vm912_vm0, %v1829_v23  ;;  %v1827_v35 = vmax.f32 %v1747_v4, %v1751_v24  ;;  %v2925_v14 = vshrl.u32 %v2812_v30, 16  ;;  %v2928_v38 = vshll.u32 %v2812_v30, 16  ;;  %v2536_v41 = vpop.permute.xlu0 %2535  ;;  %v1556_v47 = vadd.f32 %v9814_v31, %v1555_v37 }
 0x1ba   : > { %v2745_v43 = vsel %vm912_vm0, %v9736_v62, %v2536_v41  ;;  %v8306_v58 = vpop.f32.mrf.mxu0  ;;  %v2220_v44 = vld [vmem:[#allocation5 + $0x190] sm:$0xff]  ;;  %v1756_v2 = vmax.f32 %v1564_v40, 0.0 }
 0x1bb   : > { %1891 = vst.msk [vmem:[#allocation2 + $0x188] sm:$0xff] %vm912_vm0, %v1827_v35  ;;  %v2927_v39 = vrot.slane %v2925_v14, 3  ;;  %v2810_v48 = vsel %vm2792_vm1, %v2745_v43, %v2681_v0  ;;  %v2930_v49 = vrot.slane %v2928_v38, 4  ;;  %v10020_v1 = vpack.c.bf16 %v2221_v42, %v2220_v44 }
 0x1bc   : > { %v2918_v50 = vshrl.u32 %v2810_v48, 16  ;;  %v2921_v54 = vshll.u32 %v2810_v48, 16  ;;  %v1558_v63 = vpop.f32.mrf.mxu0  ;;  %v2219_v11 = vld [vmem:[#allocation5 + $0x188] sm:$0xff]  ;;  %v1754_v15 = vmax.f32 %v1556_v47, 0.0  ;;  %v1567_v16 = vadd.f32 %v9814_v31, %v8306_v58 }
 0x1bd   : > { %v10022_v7 = vpack.c.bf16 %v2219_v11, %v2218_v45  ;;  %v2653_v12 = vrot.slane %v10020_v1, 1  ;;  %v2467_v13 = vshll.u32 %v10020_v1, 16  ;;  %v2931_v21 = vor.u32 %v2930_v49, %v2927_v39 }
 0x1be   : > { %v2920_v62 = vrot.slane %v2918_v50, 3  ;;  %v2923_v8 = vrot.slane %v2921_v54, 4  ;;  %v8309_v10 = vpop.f32.mrf.mxu0  ;;  %v2471_v9 = vshrl.u32 %v10020_v1, 16  ;;  %v1559_v37 = vadd.f32 %v9814_v31, %v1558_v63 }
 0x1bf   : > { %v1580_v0 = vadd.f32 %v9814_v31, %v8309_v10  ;;  %v2652_v17 = vrot.slane %v10022_v7, 1  ;;  %2714 = vrot.lane.b32.xlu1 %v2653_v12, %s9116_s15  ;;  %v2469_v26 = vrot.slane %v2467_v13, 1  ;;  %v2462_v40 = vshll.u32 %v10022_v7, 16 }
 0x1c0   : > { %v1956_v18 = vld [vmem:[#allocation2 + $0x190] ss:$2 sm:$0xff]  ;;  %v2020_v19 = vld [vmem:[#allocation2 + $0x191] ss:$2 sm:$0xff]  ;;  %v2924_v22 = vor.u32 %v2923_v8, %v2920_v62  ;;  %v1571_v25 = vpop.f32.mrf.mxu0  ;;  %v2460_v39 = vshrl.u32 %v10022_v7, 16  ;;  %v1757_v48 = vmax.f32 %v1567_v16, 0.0 }
 0x1c1   : > { %v2058_v32 = vmax.f32 %v1956_v18, %v2020_v19  ;;  %v1760_v4 = vmax.f32 %v1580_v0, 0.0  ;;  %v1572_v23 = vadd.f32 %v9814_v31, %v1571_v25  ;;  %v2687_v24 = vpop.permute.xlu1 %2686  ;;  %v2654_v34 = vsel %vm2615_vm2, %v2652_v17, %v2653_v12 }
 0x1c2   : > { %v1954_v30 = vld [vmem:[#allocation2 + $0x180] ss:$2 sm:$0xff]  ;;  %v2018_v6 = vld [vmem:[#allocation2 + $0x181] ss:$2 sm:$0xff]  ;;  %v8310_v35 = vpop.f32.mrf.mxu0  ;;  %2712 = vrot.lane.b32.xlu0 %v2654_v34, %s9116_s15  ;;  %v10036_v14 = vsel %vm2857_vm4, %v2924_v22, %v2931_v21  ;;  %v2473_v38 = vor.u32 %v2471_v9, %v2469_v26  ;;  %v2464_v47 = vrot.slane %v2462_v40, 1  ;;  %v1755_v62 = vmax.f32 %v1559_v37, 0.0 }
 0x1c3   : > { %2163 = vst.msk [vmem:[#allocation5 + $0x1b0] sm:$0xff] %vm912_vm0, %v2058_v32  ;;  %v2057_v41 = vmax.f32 %v1954_v30, %v2018_v6  ;;  %v1832_v42 = vmax.f32 %v1756_v2, %v1760_v4  ;;  %v1758_v43 = vmax.f32 %v1572_v23, 0.0  ;;  %v1583_v58 = vadd.f32 %v9814_v31, %v8310_v35  ;;  %8344 = vmatmul.mubr.msk.bf16.gmra.mxu1 %vm3210_vm5, %v10036_v14  ;;  %v2225_v22 = vld [vmem:[#allocation5 + $0x1b8] sm:$0xff]  ;;  %v2222_v32 = vld [vmem:[#allocation5 + $0x1a0] sm:$0xff] }
 0x1c4   : > { %2569 = vrot.lane.b32.xlu1 %v2473_v38, %s9117_s21  ;;  %v1574_v44 = vpop.f32.mrf.mxu0  ;;  %v2685_v45 = vpop.permute.xlu0 %2684  ;;  %v2465_v2 = vor.u32 %v2464_v47, %v2460_v39 }
 0x1c5   : > { %2162 = vst.msk [vmem:[#allocation5 + $0x1a8] sm:$0xff] %vm912_vm0, %v2057_v41  ;;  %1896 = vst.msk [vmem:[#allocation2 + $0x1b0] sm:$0xff] %vm912_vm0, %v1832_v42  ;;  %v1830_v49 = vmax.f32 %v1754_v15, %v1758_v43  ;;  %v1761_v50 = vmax.f32 %v1583_v58, 0.0  ;;  %v1575_v54 = vadd.f32 %v9814_v31, %v1574_v44 }
 0x1c6   : > { %v2542_v63 = vpop.permute.xlu1 %2541  ;;  %v8313_v11 = vpop.f32.mrf.mxu0  ;;  %v2470_v16 = vsel %vm2278_vm3, %v2465_v2, %v2469_v26 }
 0x1c7   : > { %1894 = vst.msk [vmem:[#allocation2 + $0x1a0] sm:$0xff] %vm912_vm0, %v1830_v49  ;;  %v1833_v8 = vmax.f32 %v1757_v48, %v1761_v50  ;;  %v1759_v10 = vmax.f32 %v1575_v54, 0.0  ;;  %v2751_v12 = vsel %vm912_vm0, %v9763_v53, %v2542_v63  ;;  %v1596_v19 = vadd.f32 %v9814_v31, %v8313_v11  ;;  %2567 = vrot.lane.b32.xlu0 %v2470_v16, %s9117_s21 }
 0x1c8   : > { %v2816_v13 = vsel %vm2792_vm1, %v2751_v12, %v2687_v24  ;;  %v1587_v0 = vpop.f32.mrf.mxu0 }
 0x1c9   : > { %1897 = vst.msk [vmem:[#allocation2 + $0x1b8] sm:$0xff] %vm912_vm0, %v1833_v8  ;;  %v1831_v15 = vmax.f32 %v1755_v62, %v1759_v10  ;;  %v2940_v17 = vshrl.u32 %v2816_v13, 16  ;;  %v2943_v18 = vshll.u32 %v2816_v13, 16  ;;  %v2540_v21 = vpop.permute.xlu0 %2539  ;;  %v1588_v4 = vadd.f32 %v9814_v31, %v1587_v0  ;;  %v10075_v10 = vld [vmem:[%s11921_s2] ss:$0 sm:$0xff] }
 0x1ca   : > { %v2749_v25 = vsel %vm912_vm0, %v9766_v59, %v2540_v21  ;;  %v8314_v53 = vpop.f32.mrf.mxu0  ;;  %v2224_v9 = vld [vmem:[#allocation5 + $0x1b0] sm:$0xff]  ;;  %v1764_v38 = vmax.f32 %v1596_v19, 0.0 }
 0x1cb   : > { %1895 = vst.msk [vmem:[#allocation2 + $0x1a8] sm:$0xff] %vm912_vm0, %v1831_v15  ;;  %v2942_v26 = vrot.slane %v2940_v17, 3  ;;  %v2814_v23 = vsel %vm2792_vm1, %v2749_v25, %v2685_v45  ;;  %v2945_v24 = vrot.slane %v2943_v18, 4  ;;  %v10061_v37 = vpack.c.bf16 %v2225_v22, %v2224_v9  ;;  %v8595_v22 = vld [vmem:[%s11922_s3 + $0x28] sm:$0xff]  }
 0x1cc   : > { %v2933_v34 = vshrl.u32 %v2814_v23, 16  ;;  %v2936_v30 = vshll.u32 %v2814_v23, 16  ;;  %v1590_v6 = vpop.f32.mrf.mxu0  ;;  %v2223_v35 = vld [vmem:[#allocation5 + $0x1a8] sm:$0xff]  ;;  %v1762_v44 = vmax.f32 %v1588_v4, 0.0  ;;  %v1599_v45 = vadd.f32 %v9814_v31, %v8314_v53  ;;  %8371 = vmatprep.subr.bf16.mxu1 %v8595_v22 }
 0x1cd   : > { %v10063_v40 = vpack.c.bf16 %v2223_v35, %v2222_v32  ;;  %v2656_v43 = vrot.slane %v10061_v37, 1  ;;  %v2482_v58 = vshll.u32 %v10061_v37, 16  ;;  %v2946_v50 = vor.u32 %v2945_v24, %v2942_v26  ;;  %8372 = vmatpush3.bf16.msra.mxu1 %v8595_v22 }
 0x1ce   : > { %v2935_v59 = vrot.slane %v2933_v34, 3  ;;  %v2938_v41 = vrot.slane %v2936_v30, 4  ;;  %v8317_v42 = vpop.f32.mrf.mxu0  ;;  %v2486_v2 = vshrl.u32 %v10061_v37, 16  ;;  %v1591_v15 = vadd.f32 %v10075_v10, %v1590_v6 }
 0x1cf   : > { %v1612_v39 = vadd.f32 %v9814_v31, %v8317_v42  ;;  %v2655_v47 = vrot.slane %v10063_v40, 1  ;;  %2718 = vrot.lane.b32.xlu1 %v2656_v43, %s9116_s15  ;;  %v2484_v11 = vrot.slane %v2482_v58, 1  ;;  %v2477_v21 = vshll.u32 %v10063_v40, 16 }
 0x1d0   : > { %v1960_v48 = vld [vmem:[#allocation2 + $0x1b0] ss:$2 sm:$0xff]  ;;  %v2024_v49 = vld [vmem:[#allocation2 + $0x1b1] ss:$2 sm:$0xff]  ;;  %v2939_v54 = vor.u32 %v2938_v41, %v2935_v59  ;;  %v1603_v63 = vpop.f32.mrf.mxu0  ;;  %v2475_v23 = vshrl.u32 %v10063_v40, 16  ;;  %v1765_v34 = vmax.f32 %v1599_v45, 0.0 }
 0x1d1   : > { %v2060_v62 = vmax.f32 %v1960_v48, %v2024_v49  ;;  %v1768_v8 = vmax.f32 %v1612_v39, 0.0  ;;  %v1604_v31 = vadd.f32 %v10075_v10, %v1603_v63  ;;  %v2691_v12 = vpop.permute.xlu1 %2690  ;;  %v2657_v13 = vsel %vm2615_vm2, %v2655_v47, %v2656_v43 }
 0x1d2   : > { %v1958_v16 = vld [vmem:[#allocation2 + $0x1a0] ss:$2 sm:$0xff]  ;;  %v2022_v0 = vld [vmem:[#allocation2 + $0x1a1] ss:$2 sm:$0xff]  ;;  %v8318_v17 = vpop.f32.mrf.mxu0  ;;  %2716 = vrot.lane.b32.xlu0 %v2657_v13, %s9116_s15  ;;  %v10082_v18 = vsel %vm2857_vm4, %v2939_v54, %v2946_v50  ;;  %v2488_v19 = vor.u32 %v2486_v2, %v2484_v11  ;;  %v2479_v24 = vrot.slane %v2477_v21, 1  ;;  %v1763_v43 = vmax.f32 %v1591_v15, 0.0 }
 0x1d3   : > { %2165 = vst.msk [vmem:[#allocation5 + $0x1d0] sm:$0xff] %vm912_vm0, %v2060_v62  ;;  %v2059_v25 = vmax.f32 %v1958_v16, %v2022_v0  ;;  %v1836_v53 = vmax.f32 %v1764_v38, %v1768_v8  ;;  %v1766_v9 = vmax.f32 %v1604_v31, 0.0  ;;  %v1615_v32 = vadd.f32 %v10075_v10, %v8318_v17  ;;  %8347 = vmatprep.mubr.msk.bf16.mxu1 %vm3210_vm5, %v10082_v18  ;;  %v8596_v38 = vld [vmem:[%s11922_s3 + $0x20] sm:$0xff]   ;;  %v2229_v62 = vld [vmem:[#allocation5 + $0x1d8] sm:$0xff] }
 0x1d4   : > { %2573 = vrot.lane.b32.xlu1 %v2488_v19, %s9117_s21  ;;  %v1606_v26 = vpop.f32.mrf.mxu0  ;;  %v2689_v4 = vpop.permute.xlu0 %2688  ;;  %v2480_v42 = vor.u32 %v2479_v24, %v2475_v23  ;;  %8373 = vmatprep.subr.bf16.mxu1 %v8596_v38 }
 0x1d5   : > { %2164 = vst.msk [vmem:[#allocation5 + $0x1c8] sm:$0xff] %vm912_vm0, %v2059_v25  ;;  %1900 = vst.msk [vmem:[#allocation2 + $0x1d0] sm:$0xff] %vm912_vm0, %v1836_v53  ;;  %v1834_v30 = vmax.f32 %v1762_v44, %v1766_v9  ;;  %v1769_v6 = vmax.f32 %v1615_v32, 0.0  ;;  %v1607_v35 = vadd.f32 %v10075_v10, %v1606_v26  ;;  %8374 = vmatpush3.bf16.msra.mxu1 %v8596_v38 }
 0x1d6   : > { %v2546_v59 = vpop.permute.xlu1 %2545  ;;  %v8321_v41 = vpop.f32.mrf.mxu0  ;;  %v2485_v47 = vsel %vm2278_vm3, %v2480_v42, %v2484_v11 }
 0x1d7   : > { %1898 = vst.msk [vmem:[#allocation2 + $0x1c0] sm:$0xff] %vm912_vm0, %v1834_v30  ;;  %v1837_v58 = vmax.f32 %v1765_v34, %v1769_v6  ;;  %v1767_v39 = vmax.f32 %v1607_v35, 0.0  ;;  %v2755_v45 = vsel %vm912_vm0, %v9793_v51, %v2546_v59  ;;  %v1628_v63 = vadd.f32 %v10075_v10, %v8321_v41  ;;  %2571 = vrot.lane.b32.xlu0 %v2485_v47, %s9117_s21 }
 0x1d8   : > { %v2820_v44 = vsel %vm2792_vm1, %v2755_v45, %v2691_v12  ;;  %v1619_v48 = vpop.f32.mrf.mxu0  ;;  %v2226_v12 = vld [vmem:[#allocation5 + $0x1c0] sm:$0xff] }
 0x1d9   : > { %1901 = vst.msk [vmem:[#allocation2 + $0x1d8] sm:$0xff] %vm912_vm0, %v1837_v58  ;;  %v1835_v49 = vmax.f32 %v1763_v43, %v1767_v39  ;;  %v2955_v50 = vshrl.u32 %v2820_v44, 16  ;;  %v2958_v54 = vshll.u32 %v2820_v44, 16  ;;  %v2544_v2 = vpop.permute.xlu0 %2543  ;;  %v1620_v13 = vadd.f32 %v10075_v10, %v1619_v48 }
 0x1da   : > { %v2753_v51 = vsel %vm912_vm0, %v9796_v57, %v2544_v2  ;;  %v8322_v8 = vpop.f32.mrf.mxu0  ;;  %v2228_v31 = vld [vmem:[#allocation5 + $0x1d0] sm:$0xff]  ;;  %v1772_v25 = vmax.f32 %v1628_v63, 0.0 }
 0x1db   : > { %1899 = vst.msk [vmem:[#allocation2 + $0x1c8] sm:$0xff] %vm912_vm0, %v1835_v49  ;;  %v2957_v11 = vrot.slane %v2955_v50, 3  ;;  %v2818_v16 = vsel %vm2792_vm1, %v2753_v51, %v2689_v4  ;;  %v2960_v0 = vrot.slane %v2958_v54, 4  ;;  %v10113_v21 = vpack.c.bf16 %v2229_v62, %v2228_v31  ;;  %v8597_v51 = vld [vmem:[%s11922_s3 + $0x18] sm:$0xff]  }
 0x1dc   : > { %v2948_v15 = vshrl.u32 %v2818_v16, 16  ;;  %v2951_v17 = vshll.u32 %v2818_v16, 16  ;;  %v1622_v19 = vpop.f32.mrf.mxu0  ;;  %v2227_v22 = vld [vmem:[#allocation5 + $0x1c8] sm:$0xff]  ;;  %v1770_v24 = vmax.f32 %v1620_v13, 0.0  ;;  %v1631_v4 = vadd.f32 %v10075_v10, %v8322_v8  ;;  %8375 = vmatprep.subr.bf16.mxu1 %v8597_v51 }
 0x1dd   : > { %v10115_v53 = vpack.c.bf16 %v2227_v22, %v2226_v12  ;;  %v2659_v26 = vrot.slane %v10113_v21, 1  ;;  %v2497_v23 = vshll.u32 %v10113_v21, 16  ;;  %v2961_v38 = vor.u32 %v2960_v0, %v2957_v11  ;;  %8376 = vmatpush3.bf16.msra.mxu1 %v8597_v51 }
 0x1de   : > { %v2950_v57 = vrot.slane %v2948_v15, 3  ;;  %v2953_v9 = vrot.slane %v2951_v17, 4  ;;  %v8325_v32 = vpop.f32.mrf.mxu0  ;;  %v2501_v43 = vshrl.u32 %v10113_v21, 16  ;;  %v1623_v50 = vadd.f32 %v10075_v10, %v1622_v19 }
 0x1df   : > { %v1644_v34 = vadd.f32 %v10075_v10, %v8325_v32  ;;  %v2658_v30 = vrot.slane %v10115_v53, 1  ;;  %2722 = vrot.lane.b32.xlu1 %v2659_v26, %s9116_s15  ;;  %v2499_v42 = vrot.slane %v2497_v23, 1  ;;  %v2492_v62 = vshll.u32 %v10115_v53, 16 }
 0x1e0   : > { %v1964_v6 = vld [vmem:[#allocation2 + $0x1d0] ss:$2 sm:$0xff]  ;;  %v2028_v35 = vld [vmem:[#allocation2 + $0x1d1] ss:$2 sm:$0xff]  ;;  %v2954_v59 = vor.u32 %v2953_v9, %v2950_v57  ;;  %v1635_v41 = vpop.f32.mrf.mxu0  ;;  %v2490_v0 = vshrl.u32 %v10115_v53, 16  ;;  %v1773_v17 = vmax.f32 %v1631_v4, 0.0 }
 0x1e1   : > { %v2062_v58 = vmax.f32 %v1964_v6, %v2028_v35  ;;  %v1776_v39 = vmax.f32 %v1644_v34, 0.0  ;;  %v1636_v45 = vadd.f32 %v10075_v10, %v1635_v41  ;;  %v2695_v44 = vpop.permute.xlu1 %2694  ;;  %v2660_v47 = vsel %vm2615_vm2, %v2658_v30, %v2659_v26  ;;  %v2233_v6 = vld [vmem:[#allocation5 + $0x1f8] sm:$0xff] }
 0x1e2   : > { %v1962_v48 = vld [vmem:[#allocation2 + $0x1c0] ss:$2 sm:$0xff]  ;;  %v2026_v49 = vld [vmem:[#allocation2 + $0x1c1] ss:$2 sm:$0xff]  ;;  %v8326_v54 = vpop.f32.mrf.mxu0  ;;  %2720 = vrot.lane.b32.xlu0 %v2660_v47, %s9116_s15  ;;  %v10129_v63 = vsel %vm2857_vm4, %v2954_v59, %v2961_v38  ;;  %v2503_v2 = vor.u32 %v2501_v43, %v2499_v42  ;;  %v2494_v15 = vrot.slane %v2492_v62, 1  ;;  %v1771_v32 = vmax.f32 %v1623_v50, 0.0 }
 0x1e3   : > { %2167 = vst.msk [vmem:[#allocation5 + $0x1f0] sm:$0xff] %vm912_vm0, %v2062_v58  ;;  %v2061_v8 = vmax.f32 %v1962_v48, %v2026_v49  ;;  %v1840_v31 = vmax.f32 %v1772_v25, %v1776_v39  ;;  %v1774_v12 = vmax.f32 %v1636_v45, 0.0  ;;  %v1647_v11 = vadd.f32 %v10075_v10, %v8326_v54  ;;  %8348 = vmatmul.mubr.msk.bf16.gmra.mxu1 %vm3210_vm5, %v10129_v63  ;;  %v2230_v43 = vld [vmem:[#allocation5 + $0x1e0] sm:$0xff] }
 0x1e4   : > { %2577 = vrot.lane.b32.xlu1 %v2503_v2, %s9117_s21  ;;  %v1638_v13 = vpop.f32.mrf.mxu0  ;;  %v2693_v16 = vpop.permute.xlu0 %2692  ;;  %v2495_v9 = vor.u32 %v2494_v15, %v2490_v0  ;;  %v2172_v2 = vld [vmem:[#allocation5 + $0x10] sm:$0xff] }
 0x1e5   : > { %2166 = vst.msk [vmem:[#allocation5 + $0x1e8] sm:$0xff] %vm912_vm0, %v2061_v8  ;;  %1904 = vst.msk [vmem:[#allocation2 + $0x1f0] sm:$0xff] %vm912_vm0, %v1840_v31  ;;  %v1838_v19 = vmax.f32 %v1770_v24, %v1774_v12  ;;  %v1777_v22 = vmax.f32 %v1647_v11, 0.0  ;;  %v1639_v25 = vadd.f32 %v10075_v10, %v1638_v13  ;;  %v2173_v12 = vld [vmem:[#allocation5 + $0x18] sm:$0xff]  ;;  %v8598_v11 = vld [vmem:[%s11922_s3 + $0x10] sm:$0xff]  }
 0x1e6   : > { %v2550_v57 = vpop.permute.xlu1 %2549  ;;  %v2500_v4 = vsel %vm2278_vm3, %v2495_v9, %v2499_v42  ;;  %8377 = vmatprep.subr.bf16.mxu1 %v8598_v11 }
 0x1e7   : > { %1902 = vst.msk [vmem:[#allocation2 + $0x1e0] sm:$0xff] %vm912_vm0, %v1838_v19  ;;  %v1841_v26 = vmax.f32 %v1773_v17, %v1777_v22  ;;  %v1775_v23 = vmax.f32 %v1639_v25, 0.0  ;;  %v2759_v34 = vsel %vm912_vm0, %v9828_v52, %v2550_v57  ;;  %2575 = vrot.lane.b32.xlu0 %v2500_v4, %s9117_s21  ;;  %v10174_v4 = vpack.c.bf16 %v2173_v12, %v2172_v2  ;;  %v2238_v12 = vld [vmem:[#allocation5 + $0x220] sm:$0xff] }
 0x1e8   : > { %v2824_v30 = vsel %vm2792_vm1, %v2759_v34, %v2695_v44  ;;  %8378 = vmatpush3.bf16.msra.mxu1 %v8598_v11  ;;  %v2239_v11 = vld [vmem:[#allocation5 + $0x228] sm:$0xff] }
 0x1e9   : > { %1905 = vst.msk [vmem:[#allocation2 + $0x1f8] sm:$0xff] %vm912_vm0, %v1841_v26  ;;  %v1839_v24 = vmax.f32 %v1771_v32, %v1775_v23  ;;  %v2970_v10 = vshrl.u32 %v2824_v30, 16  ;;  %v2973_v35 = vshll.u32 %v2824_v30, 16  ;;  %v2548_v38 = vpop.permute.xlu0 %2547  ;;  %v2170_v32 = vld [vmem:[#allocation5] sm:$0xff]  ;;  %v2171_v26 = vld [vmem:[#allocation5 + $0x8] sm:$0xff] }
 0x1ea   : > { %v2757_v59 = vsel %vm912_vm0, %v9831_v61, %v2548_v38  ;;  %v2232_v41 = vld [vmem:[#allocation5 + $0x1f0] sm:$0xff] }
 0x1eb   : > { %1903 = vst.msk [vmem:[#allocation2 + $0x1e8] sm:$0xff] %vm912_vm0, %v1839_v24  ;;  %v2822_v52 = vsel %vm2792_vm1, %v2757_v59, %v2693_v16  ;;  %v10155_v58 = vpack.c.bf16 %v2233_v6, %v2232_v41  ;;  %v2972_v42 = vrot.slane %v2970_v10, 3  ;;  %v2975_v39 = vrot.slane %v2973_v35, 4  ;;  %v8599_v6 = vld [vmem:[%s11922_s3 + $0x8] sm:$0xff]  }
 0x1ec   : > { %v2963_v45 = vshrl.u32 %v2822_v52, 16  ;;  %v2966_v44 = vshll.u32 %v2822_v52, 16  ;;  %v2231_v47 = vld [vmem:[#allocation5 + $0x1e8] sm:$0xff]  ;;  %8379 = vmatprep.subr.bf16.mxu1 %v8599_v6  ;;  %v10185_v59 = vpack.c.bf16 %v2171_v26, %v2170_v32 }
 0x1ed   : > { %v2662_v48 = vrot.slane %v10155_v58, 1  ;;  %v10158_v49 = vpack.c.bf16 %v2231_v47, %v2230_v43  ;;  %v2512_v50 = vshll.u32 %v10155_v58, 16  ;;  %v2516_v8 = vshrl.u32 %v10155_v58, 16  ;;  %8380 = vmatpush3.bf16.msra.mxu1 %v8599_v6 }
 0x1ee   : > { %v2965_v61 = vrot.slane %v2963_v45, 3  ;;  %v2968_v54 = vrot.slane %v2966_v44, 4  ;;  %v2976_v0 = vor.u32 %v2975_v39, %v2972_v42  ;;  %v2287_v43 = vshll.u32 %v10174_v4, 16  ;;  %v2237_v39 = vld [vmem:[#allocation5 + $0x218] sm:$0xff] }
 0x1ef   : > { %2726 = vrot.lane.b32.xlu1 %v2662_v48, %s9116_s15  ;;  %v2661_v62 = vrot.slane %v10158_v49, 1  ;;  %v2514_v51 = vrot.slane %v2512_v50, 1  ;;  %v2507_v31 = vshll.u32 %v10158_v49, 16  ;;  %v2505_v17 = vshrl.u32 %v10158_v49, 16 }
 0x1f0   : > { %v1968_v13 = vld [vmem:[#allocation2 + $0x1f0] ss:$2 sm:$0xff]  ;;  %v2032_v16 = vld [vmem:[#allocation2 + $0x1f1] ss:$2 sm:$0xff]  ;;  %v2969_v15 = vor.u32 %v2968_v54, %v2965_v61  ;;  %v2234_v54 = vld [vmem:[#allocation5 + $0x200] sm:$0xff]  ;;  %v2289_v2 = vrot.slane %v2287_v43, 1 }
 0x1f1   : > { %v2064_v19 = vmax.f32 %v1968_v13, %v2032_v16  ;;  %v2699_v22 = vpop.permute.xlu1 %2698  ;;  %v2663_v25 = vsel %vm2615_vm2, %v2661_v62, %v2662_v48  ;;  %v2518_v57 = vor.u32 %v2516_v8, %v2514_v51  ;;  %v2509_v9 = vrot.slane %v2507_v31, 1 }
 0x1f2   : > { %v1966_v23 = vld [vmem:[#allocation2 + $0x1e0] ss:$2 sm:$0xff]  ;;  %v2030_v34 = vld [vmem:[#allocation2 + $0x1e1] ss:$2 sm:$0xff]  ;;  %2724 = vrot.lane.b32.xlu0 %v2663_v25, %s9116_s15  ;;  %v10172_v30 = vsel %vm2857_vm4, %v2969_v15, %v2976_v0  ;;  %v2282_v48 = vshll.u32 %v10185_v59, 16  ;;  %v2291_v62 = vshrl.u32 %v10174_v4, 16 }
 0x1f3   : > { %2169 = vst.msk [vmem:[#allocation5 + $0x210] sm:$0xff] %vm912_vm0, %v2064_v19  ;;  %v2063_v24 = vmax.f32 %v1966_v23, %v2030_v34  ;;  %8351 = vmatprep.mubr.msk.bf16.mxu1 %vm3210_vm5, %v10172_v30  ;;  %2581 = vrot.lane.b32.xlu1 %v2518_v57, %s9117_s21  ;;  %v2510_v10 = vor.u32 %v2509_v9, %v2505_v17  ;;  %v2280_v31 = vshrl.u32 %v10185_v59, 16  ;;  %v2240_v17 = vld [vmem:[#allocation5 + $0x230] sm:$0xff] }
 0x1f4   : > { %v2697_v35 = vpop.permute.xlu0 %2696  ;;  %v2284_v57 = vrot.slane %v2282_v48, 1  ;;  %v10205_v23 = vpack.c.bf16 %v2239_v11, %v2238_v12  ;;  %v8600_v48 = vld [vmem:[%s11922_s3] sm:$0xff]  }
 0x1f5   : > { %2168 = vst.msk [vmem:[#allocation5 + $0x208] sm:$0xff] %vm912_vm0, %v2063_v24  ;;  %v2515_v38 = vsel %vm2278_vm3, %v2510_v10, %v2514_v51  ;;  %8381 = vmatprep.subr.bf16.mxu1 %v8600_v48 }
 0x1f6   : > { %v2554_v41 = vpop.permute.xlu1 %2553  ;;  %2579 = vrot.lane.b32.xlu0 %v2515_v38, %s9117_s21  ;;  %8382 = vmatpush3.bf16.msra.mxu1 %v8600_v48 }
 0x1f7   : > { %v2763_v52 = vsel %vm912_vm0, %v9858_v60, %v2554_v41 }
 0x1f8   : > { %v2828_v42 = vsel %vm2792_vm1, %v2763_v52, %v2699_v22 }
 0x1f9   : > { %v2985_v45 = vshrl.u32 %v2828_v42, 16  ;;  %v2988_v44 = vshll.u32 %v2828_v42, 16  ;;  %v2552_v47 = vpop.permute.xlu0 %2551 }
 0x1fa   : > { %v2761_v50 = vsel %vm912_vm0, %v9861_v3, %v2552_v47  ;;  %v2236_v61 = vld [vmem:[#allocation5 + $0x210] sm:$0xff]  ;;  %v2241_v3 = vld [vmem:[#allocation5 + $0x238] sm:$0xff]  ;;  %v2293_v47 = vor.u32 %v2291_v62, %v2289_v2  ;;  %v2616_v62 = vrot.slane %v10185_v59, 1 }
 0x1fb   : > { %v2987_v51 = vrot.slane %v2985_v45, 3  ;;  %v2826_v8 = vsel %vm2792_vm1, %v2761_v50, %v2697_v35  ;;  %v10197_v60 = vpack.c.bf16 %v2237_v39, %v2236_v61  ;;  %v2990_v13 = vrot.slane %v2988_v44, 4 }
 0x1fc   : > { %v2978_v16 = vshrl.u32 %v2826_v8, 16  ;;  %v2981_v0 = vshll.u32 %v2826_v8, 16  ;;  %v2235_v15 = vld [vmem:[#allocation5 + $0x208] sm:$0xff]  ;;  %v10210_v10 = vpack.c.bf16 %v2241_v3, %v2240_v17  ;;  %v2285_v45 = vor.u32 %v2284_v57, %v2280_v31 }
 0x1fd   : > { %v3132_v19 = vrot.slane %v10197_v60, 1  ;;  %v10201_v22 = vpack.c.bf16 %v2235_v15, %v2234_v54  ;;  %v3118_v25 = vshll.u32 %v10197_v60, 16  ;;  %v3122_v26 = vshrl.u32 %v10197_v60, 16  ;;  %v10237_v15 = vld [vmem:[%s11922_s3 + $0x88] sm:$0xff]  }
 0x1fe   : > { %v2980_v9 = vrot.slane %v2978_v16, 3  ;;  %v2983_v32 = vrot.slane %v2981_v0, 4  ;;  %v2991_v35 = vor.u32 %v2990_v13, %v2987_v51  ;;  %v3628_v50 = vshll.u32 %v10210_v10, 16  ;;  %8415 = vmatprep.subr.bf16.mxu1 %v10237_v15 }
 0x1ff   : > { %3136 = vrot.lane.b32.xlu1 %v3132_v19, %s9116_s15  ;;  %v3131_v34 = vrot.slane %v10201_v22, 1  ;;  %v3120_v6 = vrot.slane %v3118_v25, 1  ;;  %v3113_v24 = vshll.u32 %v10201_v22, 16  ;;  %v3111_v52 = vshrl.u32 %v10201_v22, 16 }
 0x200   : > { %v2984_v38 = vor.u32 %v2983_v32, %v2980_v9  ;;  %v3623_v61 = vshll.u32 %v10205_v23, 16  ;;  %v2290_v8 = vsel %vm2278_vm3, %v2285_v45, %v2289_v2  ;;  %v2617_v31 = vrot.slane %v10174_v4, 1 }
 0x201   : > { %v3133_v41 = vsel %vm2615_vm2, %v3131_v34, %v3132_v19  ;;  %v3124_v43 = vor.u32 %v3122_v26, %v3120_v6  ;;  %v3115_v42 = vrot.slane %v3113_v24, 1  ;;  %v2703_v54 = vpop.permute.xlu1 %2702  ;;  %v3630_v11 = vrot.slane %v3628_v50, 1 }
 0x202   : > { %3134 = vrot.lane.b32.xlu0 %v3133_v41, %s9116_s15  ;;  %v10216_v39 = vsel %vm2857_vm4, %v2984_v38, %v2991_v35  ;;  %v3632_v13 = vshrl.u32 %v10210_v10, 16  ;;  %v3621_v16 = vshrl.u32 %v10205_v23, 16  ;;  %v3625_v0 = vrot.slane %v3623_v61, 1 }
 0x203   : > { %8352 = vmatmul.mubr.msk.bf16.gmra.mxu1 %vm3210_vm5, %v10216_v39  ;;  %3127 = vrot.lane.b32.xlu1 %v3124_v43, %s9117_s21  ;;  %v3116_v44 = vor.u32 %v3115_v42, %v3111_v52  ;;  %v2618_v17 = vsel %vm2615_vm2, %v2616_v62, %v2617_v31  ;;  %v3642_v24 = vrot.slane %v10210_v10, 1  ;;  %v3641_v35 = vrot.slane %v10205_v23, 1 }
 0x204   : > { %v3634_v19 = vor.u32 %v3632_v13, %v3630_v11  ;;  %v3626_v25 = vor.u32 %v3625_v0, %v3621_v16 }
 0x205   : > { %v3121_v51 = vsel %vm2278_vm3, %v3116_v44, %v3120_v6  ;;  %v2701_v12 = vpop.permute.xlu0 %2700 }
 0x206   : > { %3125 = vrot.lane.b32.xlu0 %v3121_v51, %s9117_s21 }
 0x207   : > { %2521 = vrot.lane.b32.xlu1 %v2293_v47, %s9117_s21 }
 0x208   : > { %v2558_v2 = vpop.permute.xlu1 %2557 }
 0x209   : > { %v2767_v3 = vsel %vm912_vm0, %v9894_v20, %v2558_v2  ;;  %v3631_v20 = vsel %vm2278_vm3, %v3626_v25, %v3630_v11 }
 0x20a   : > { %2519 = vrot.lane.b32.xlu0 %v2290_v8, %s9117_s21  ;;  %v2832_v57 = vsel %vm2792_vm1, %v2767_v3, %v2703_v54 }
 0x20b   : > { %2666 = vrot.lane.b32.xlu1 %v2617_v31, %s9116_s15  ;;  %v3000_v9 = vshrl.u32 %v2832_v57, 16  ;;  %v3003_v32 = vshll.u32 %v2832_v57, 16 }
 0x20d   : > { %v2556_v26 = vpop.permute.xlu0 %2555  ;;  %v3002_v38 = vrot.slane %v3000_v9, 3  ;;  %v3005_v41 = vrot.slane %v3003_v32, 4 }
 0x20e   : > { %v2765_v34 = vsel %vm912_vm0, %v9899_v29, %v2556_v26  ;;  %2664 = vrot.lane.b32.xlu0 %v2618_v17, %s9116_s15  ;;  %v3643_v29 = vsel %vm2615_vm2, %v3641_v35, %v3642_v24 }
 0x20f   : > { %v2830_v6 = vsel %vm2792_vm1, %v2765_v34, %v2701_v12  ;;  %3637 = vrot.lane.b32.xlu1 %v3634_v19, %s9117_s21  ;;  %v3006_v47 = vor.u32 %v3005_v41, %v3002_v38 }
 0x210   : > { %v2993_v43 = vshrl.u32 %v2830_v6, 16  ;;  %v2996_v52 = vshll.u32 %v2830_v6, 16 }
 0x211   : > { %v2707_v44 = vpop.permute.xlu1 %2706 }
 0x212   : > { %v2995_v42 = vrot.slane %v2993_v43, 3  ;;  %v2998_v45 = vrot.slane %v2996_v52, 4  ;;  %3635 = vrot.lane.b32.xlu0 %v3631_v20, %s9117_s21  ;;  %s8029_s21 = sshll.u32 %s9212_s29, 4  ;;  %s9120_s29 = smov [#allocation7]  }
 0x213   : > { %3646 = vrot.lane.b32.xlu1 %v3642_v24, %s9116_s15  ;;  %s11878_s20 = scalar_lea.hbm %s11932_s13, %s8029_s21  ;;  %s9057_s17 = sshll.u32 %s9120_s29, 4  ;;  %s9058_s17 = int_to_ptr.vmem [resolvable:$false] %s9057_s17 }
 0x214   : > { %v2999_v48 = vor.u32 %v2998_v45, %v2995_v42  ;;  %s9059_s16 = scalar_lea.vmem %s9058_s17, 32  ;;  %p9060_p0 = scmp.lt.s32.totalorder %s11880_s30, %s9058_s17 }
 0x215   : > { %v2705_v61 = vpop.permute.xlu0 %2704  ;;  %p9061_p1 = scmp.lt.s32.totalorder %s9059_s16, %s9053_s0 }
 0x216   : > { %v10258_v50 = vsel %vm2857_vm4, %v2999_v48, %v3006_v47  ;;  %3644 = vrot.lane.b32.xlu0 %v3643_v29, %s9116_s15  ;;  %v2562_v54 = vpop.permute.xlu1 %2561 }
 0x217   : > { %8355 = vmatprep.mubr.msk.bf16.mxu1 %vm3210_vm5, %v10258_v50  ;;  %v2771_v51 = vsel %vm912_vm0, %v9938_v46, %v2562_v54  ;;  %p9062_p2 = por %p9061_p1, %p9060_p0 }
 0x218   : > { %v2836_v8 = vsel %vm2792_vm1, %v2771_v51, %v2707_v44 }
 0x219   : > { %v3015_v31 = vshrl.u32 %v2836_v8, 16  ;;  %v3018_v62 = vshll.u32 %v2836_v8, 16  ;;  %p9063_p3 = pnand %p9062_p2, %p9056_p13 }
 0x21b   : > { %v2560_v12 = vpop.permute.xlu0 %2559  ;;  %v3017_v16 = vrot.slane %v3015_v31, 3  ;;  %v3020_v0 = vrot.slane %v3018_v62, 4 }
 0x21c   : > { %v2769_v11 = vsel %vm912_vm0, %v9941_v56, %v2560_v12 }
 0x21d   : > { %v2834_v13 = vsel %vm2792_vm1, %v2769_v11, %v2705_v61  ;;  %v3021_v57 = vor.u32 %v3020_v0, %v3017_v16 }
 0x21e   : > { %v3008_v2 = vshrl.u32 %v2834_v13, 16  ;;  %v3011_v17 = vshll.u32 %v2834_v13, 16 }
 0x220   : > { %v3010_v3 = vrot.slane %v3008_v2, 3  ;;  %v3013_v19 = vrot.slane %v3011_v17, 4 }
 0x221   : > { %v2711_v25 = vpop.permute.xlu1 %2710 }
 0x222   : > { %v3014_v9 = vor.u32 %v3013_v19, %v3010_v3 }
 0x224   : > { %v2709_v46 = vpop.permute.xlu0 %2708  ;;  %v10270_v32 = vsel %vm2857_vm4, %v3014_v9, %v3021_v57 }
 0x225   : > { %8356 = vmatmul.mubr.msk.bf16.gmra.mxu1 %vm3210_vm5, %v10270_v32 }
 0x226   : > { %v2566_v26 = vpop.permute.xlu1 %2565 }
 0x227   : > { %v2775_v56 = vsel %vm912_vm0, %v9979_v27, %v2566_v26 }
 0x228   : > { %v2840_v34 = vsel %vm2792_vm1, %v2775_v56, %v2711_v25 }
 0x229   : > { %v3030_v6 = vshrl.u32 %v2840_v34, 16  ;;  %v3033_v20 = vshll.u32 %v2840_v34, 16  ;;  %v2564_v24 = vpop.permute.xlu0 %2563 }
 0x22a   : > { %v2773_v35 = vsel %vm912_vm0, %v9981_v33, %v2564_v24 }
 0x22b   : > { %v2838_v38 = vsel %vm2792_vm1, %v2773_v35, %v2709_v46  ;;  %v3032_v41 = vrot.slane %v3030_v6, 3  ;;  %v3035_v43 = vrot.slane %v3033_v20, 4 }
 0x22c   : > { %v3023_v52 = vshrl.u32 %v2838_v38, 16  ;;  %v3026_v42 = vshll.u32 %v2838_v38, 16 }
 0x22d   : > { %v3036_v29 = vor.u32 %v3035_v43, %v3032_v41 }
 0x22e   : > { %v3025_v45 = vrot.slane %v3023_v52, 3  ;;  %v3028_v44 = vrot.slane %v3026_v42, 4 }
 0x230   : > { %v3029_v47 = vor.u32 %v3028_v44, %v3025_v45 }
 0x231   : > { %v2715_v48 = vpop.permute.xlu1 %2714 }
 0x232   : > { %v10281_v27 = vsel %vm2857_vm4, %v3029_v47, %v3036_v29 }
 0x233   : > { %8359 = vmatprep.mubr.msk.bf16.mxu1 %vm3210_vm5, %v10281_v27 }
 0x234   : > { %v2713_v61 = vpop.permute.xlu0 %2712 }
 0x236   : > { %v2570_v54 = vpop.permute.xlu1 %2569 }
 0x237   : > { %v2779_v33 = vsel %vm912_vm0, %v10020_v1, %v2570_v54 }
 0x238   : > { %v2844_v51 = vsel %vm2792_vm1, %v2779_v33, %v2715_v48 }
 0x239   : > { %v3045_v8 = vshrl.u32 %v2844_v51, 16  ;;  %v3048_v31 = vshll.u32 %v2844_v51, 16  ;;  %v2568_v62 = vpop.permute.xlu0 %2567 }
 0x23a   : > { %v2777_v12 = vsel %vm912_vm0, %v10022_v7, %v2568_v62 }
 0x23b   : > { %v2842_v11 = vsel %vm2792_vm1, %v2777_v12, %v2713_v61  ;;  %v3047_v13 = vrot.slane %v3045_v8, 3  ;;  %v3050_v16 = vrot.slane %v3048_v31, 4 }
 0x23c   : > { %v3038_v0 = vshrl.u32 %v2842_v11, 16  ;;  %v3041_v2 = vshll.u32 %v2842_v11, 16 }
 0x23d   : > { %v3051_v19 = vor.u32 %v3050_v16, %v3047_v13 }
 0x23e   : > { %v3040_v17 = vrot.slane %v3038_v0, 3  ;;  %v3043_v3 = vrot.slane %v3041_v2, 4 }
 0x240   : > { %v3044_v25 = vor.u32 %v3043_v3, %v3040_v17 }
 0x241   : > { %v2719_v57 = vpop.permute.xlu1 %2718 }
 0x242   : > { %v10292_v1 = vsel %vm2857_vm4, %v3044_v25, %v3051_v19 }
 0x243   : > { %8360 = vmatmul.mubr.msk.bf16.gmra.mxu1 %vm3210_vm5, %v10292_v1 }
 0x244   : > { %v2717_v9 = vpop.permute.xlu0 %2716 }
 0x246   : > { %v2574_v46 = vpop.permute.xlu1 %2573 }
 0x247   : > { %v2783_v7 = vsel %vm912_vm0, %v10061_v37, %v2574_v46 }
 0x248   : > { %v2848_v26 = vsel %vm2792_vm1, %v2783_v7, %v2719_v57 }
 0x249   : > { %v3060_v56 = vshrl.u32 %v2848_v26, 16  ;;  %v3063_v34 = vshll.u32 %v2848_v26, 16  ;;  %v2572_v6 = vpop.permute.xlu0 %2571 }
 0x24a   : > { %v2781_v20 = vsel %vm912_vm0, %v10063_v40, %v2572_v6 }
 0x24b   : > { %v2846_v24 = vsel %vm2792_vm1, %v2781_v20, %v2717_v9  ;;  %v3062_v35 = vrot.slane %v3060_v56, 3  ;;  %v3065_v38 = vrot.slane %v3063_v34, 4 }
 0x24c   : > { %v3053_v41 = vshrl.u32 %v2846_v24, 16  ;;  %v3056_v43 = vshll.u32 %v2846_v24, 16 }
 0x24d   : > { %v3066_v45 = vor.u32 %v3065_v38, %v3062_v35 }
 0x24e   : > { %v3055_v52 = vrot.slane %v3053_v41, 3  ;;  %v3058_v42 = vrot.slane %v3056_v43, 4 }
 0x250   : > { %v3059_v44 = vor.u32 %v3058_v42, %v3055_v52 }
 0x251   : > { %v2723_v29 = vpop.permute.xlu1 %2722 }
 0x252   : > { %v10303_v37 = vsel %vm2857_vm4, %v3059_v44, %v3066_v45 }
 0x253   : > { %8363 = vmatprep.mubr.msk.bf16.mxu1 %vm3210_vm5, %v10303_v37 }
 0x254   : > { %v2721_v47 = vpop.permute.xlu0 %2720 }
 0x256   : > { %v2578_v48 = vpop.permute.xlu1 %2577 }
 0x257   : > { %v2787_v40 = vsel %vm912_vm0, %v10113_v21, %v2578_v48 }
 0x258   : > { %v2852_v61 = vsel %vm2792_vm1, %v2787_v40, %v2723_v29 }
 0x259   : > { %v3075_v54 = vshrl.u32 %v2852_v61, 16  ;;  %v3078_v33 = vshll.u32 %v2852_v61, 16  ;;  %v2576_v51 = vpop.permute.xlu0 %2575 }
 0x25a   : > { %v2785_v8 = vsel %vm912_vm0, %v10115_v53, %v2576_v51 }
 0x25b   : > { %v2850_v31 = vsel %vm2792_vm1, %v2785_v8, %v2721_v47  ;;  %v3077_v62 = vrot.slane %v3075_v54, 3  ;;  %v3080_v12 = vrot.slane %v3078_v33, 4 }
 0x25c   : > { %v3068_v11 = vshrl.u32 %v2850_v31, 16  ;;  %v3071_v13 = vshll.u32 %v2850_v31, 16 }
 0x25d   : > { %v3081_v17 = vor.u32 %v3080_v12, %v3077_v62 }
 0x25e   : > { %v3070_v16 = vrot.slane %v3068_v11, 3  ;;  %v3073_v0 = vrot.slane %v3071_v13, 4 }
 0x260   : > { %v3074_v3 = vor.u32 %v3073_v0, %v3070_v16 }
 0x261   : > { %v2727_v2 = vpop.permute.xlu1 %2726 }
 0x262   : > { %v10314_v21 = vsel %vm2857_vm4, %v3074_v3, %v3081_v17 }
 0x263   : > { %8364 = vmatmul.mubr.msk.bf16.gmra.mxu1 %vm3210_vm5, %v10314_v21 }
 0x264   : > { %v2725_v19 = vpop.permute.xlu0 %2724 }
 0x265   : > { %v2582_v25 = vpop.permute.xlu1 %2581 }
 0x266   : > { %v2791_v53 = vsel %vm912_vm0, %v10155_v58, %v2582_v25 }
 0x267   : > { %v2856_v57 = vsel %vm2792_vm1, %v2791_v53, %v2727_v2 }
 0x268   : > { %v3090_v9 = vshrl.u32 %v2856_v57, 16  ;;  %v3093_v46 = vshll.u32 %v2856_v57, 16  ;;  %v2580_v7 = vpop.permute.xlu0 %2579 }
 0x269   : > { %v2789_v26 = vsel %vm912_vm0, %v10158_v49, %v2580_v7 }
 0x26a   : > { %v2854_v56 = vsel %vm2792_vm1, %v2789_v26, %v2725_v19  ;;  %v3092_v34 = vrot.slane %v3090_v9, 3  ;;  %v3095_v6 = vrot.slane %v3093_v46, 4 }
 0x26b   : > { %v3083_v20 = vshrl.u32 %v2854_v56, 16  ;;  %v3086_v24 = vshll.u32 %v2854_v56, 16 }
 0x26c   : > { %v3096_v41 = vor.u32 %v3095_v6, %v3092_v34 }
 0x26d   : > { %v3085_v35 = vrot.slane %v3083_v20, 3  ;;  %v3088_v38 = vrot.slane %v3086_v24, 4  ;;  %v8603_v20 = vld [vmem:[%s11922_s3 + $0x78] sm:$0xff]   ;;  %v8604_v24 = vld [vmem:[%s11922_s3 + $0x70] sm:$0xff]  }
 0x26f   : > { %v3089_v43 = vor.u32 %v3088_v38, %v3085_v35  ;;  %v10408_v35 = vpop.f32.mrf.mxu1 }
 0x271   : > { %v3137_v52 = vpop.permute.xlu1 %3136  ;;  %v10325_v58 = vsel %vm2857_vm4, %v3089_v43, %v3096_v41  ;;  %v8607_v41 = vld [vmem:[%s11924_s5 + $0x38] sm:$0xff]  }
 0x272   : > { %8367 = vmatprep.mubr.msk.bf16.mxu1 %vm3210_vm5, %v10325_v58 }
 0x274   : > { %v3135_v42 = vpop.permute.xlu0 %3134 }
 0x275   : > { %v3128_v45 = vpop.permute.xlu1 %3127 }
 0x276   : > { %v3141_v49 = vsel %vm912_vm0, %v10197_v60, %v3128_v45 }
 0x277   : > { %v3145_v44 = vsel %vm2792_vm1, %v3141_v49, %v3137_v52  ;;  %v11935_v52 = vmov 0  }
 0x278   : > { %v3153_v29 = vshrl.u32 %v3145_v44, 16  ;;  %v3156_v47 = vshll.u32 %v3145_v44, 16  ;;  %v3126_v48 = vpop.permute.xlu0 %3125  ;;  %4798 = vmatprep.subr.bf16.mxu0 %v11935_v52 }
 0x279   : > { %v3139_v40 = vsel %vm912_vm0, %v10201_v22, %v3126_v48  ;;  %v2522_v61 = vpop.permute.xlu1 %2521  ;;  %4799 = vmatpush1.bf16.msra.mxu0 %v8607_v41 }
 0x27a   : > { %v3155_v54 = vrot.slane %v3153_v29, 3  ;;  %v3143_v33 = vsel %vm2792_vm1, %v3139_v40, %v3135_v42  ;;  %v3158_v51 = vrot.slane %v3156_v47, 4  ;;  %v2731_v62 = vsel %vm912_vm0, %v10174_v4, %v2522_v61  ;;  %4800 = vmatprep.subr.bf16.mxu0 %v11935_v52 }
 0x27b   : > { %v3146_v8 = vshrl.u32 %v3143_v33, 16  ;;  %v3149_v31 = vshll.u32 %v3143_v33, 16 }
 0x27c   : > { %v2520_v12 = vpop.permute.xlu0 %2519  ;;  %v3159_v0 = vor.u32 %v3158_v51, %v3155_v54 }
 0x27d   : > { %v3148_v60 = vrot.slane %v3146_v8, 3  ;;  %v3151_v11 = vrot.slane %v3149_v31, 4  ;;  %v2667_v13 = vpop.permute.xlu1 %2666  ;;  %v2729_v3 = vsel %vm912_vm0, %v10185_v59, %v2520_v12  ;;  %v8602_v59 = vld [vmem:[%s11922_s3 + $0x80] sm:$0xff]   ;;  %v8608_v8 = vld [vmem:[%s11924_s5 + $0x30] sm:$0xff]  }
 0x27e   : > { %v2796_v16 = vsel %vm2792_vm1, %v2731_v62, %v2667_v13  ;;  %4801 = vmatpush1.bf16.msra.mxu0 %v8608_v8 }
 0x27f   : > { %v3152_v2 = vor.u32 %v3151_v11, %v3148_v60  ;;  %v2865_v17 = vshrl.u32 %v2796_v16, 16  ;;  %v2868_v22 = vshll.u32 %v2796_v16, 16  ;;  %4802 = vmatprep.subr.bf16.mxu0 %v11935_v52 }
 0x280   : > { %v2665_v19 = vpop.permute.xlu0 %2664 }
 0x281   : > { %v2794_v25 = vsel %vm2792_vm1, %v2729_v3, %v2665_v19  ;;  %v10342_v53 = vsel %vm2857_vm4, %v3152_v2, %v3159_v0  ;;  %v2867_v4 = vrot.slane %v2865_v17, 3  ;;  %v2870_v57 = vrot.slane %v2868_v22, 4  ;;  %v8609_v22 = vld [vmem:[%s11924_s5 + $0x28] sm:$0xff]  }
 0x282   : > { %v2858_v9 = vshrl.u32 %v2794_v25, 16  ;;  %v2861_v46 = vshll.u32 %v2794_v25, 16  ;;  %8368 = vmatmul.mubr.msk.bf16.gmra.mxu1 %vm3210_vm5, %v10342_v53  ;;  %4803 = vmatpush1.bf16.msra.mxu0 %v8609_v22  ;;  %v8617_v22 = vld [vmem:[%s11924_s5 + $0x88] sm:$0xff]  }
 0x283   : > { %v2871_v56 = vor.u32 %v2870_v57, %v2867_v4  ;;  %4804 = vmatprep.subr.bf16.mxu0 %v11935_v52 }
 0x284   : > { %v2860_v7 = vrot.slane %v2858_v9, 3  ;;  %v2863_v26 = vrot.slane %v2861_v46, 4  ;;  %v8610_v46 = vld [vmem:[%s11924_s5 + $0x20] sm:$0xff]  }
 0x286   : > { %v2864_v34 = vor.u32 %v2863_v26, %v2860_v7  ;;  %4805 = vmatpush1.bf16.msra.mxu0 %v8610_v46  ;;  %v8620_v46 = vld [vmem:[%s11924_s5 + $0x58] sm:$0xff]  }
 0x287   : > { %4806 = vmatprep.subr.bf16.mxu0 %v11935_v52 }
 0x288   : > { %v2872_v6 = vsel %vm2857_vm4, %v2864_v34, %v2871_v56 }
 0x289   : > { %8383 = vmatprep.mubr.msk.bf16.mxu1 %vm3210_vm5, %v2872_v6 }
 0x28a   : > { %8384 = vmatmul.mubr.msk.bf16.vlgmr.msra.gmra.mxu1 %vm3210_vm5, %v9925_v55  ;;  %v8605_v55 = vld [vmem:[%s11922_s3 + $0x68] sm:$0xff]  }
 0x28b   : > { %8416 = vmatpush3.bf16.msra.mxu1 %v10237_v15  ;;  %8387 = vmatprep.mubr.msk.bf16.mxu1 %vm3210_vm5, %v9956_v36  ;;  %v8606_v15 = vld [vmem:[%s11922_s3 + $0x60] sm:$0xff]  }
 0x28c   : > { %8417 = vmatprep.subr.bf16.mxu1 %v8602_v59 }
 0x28f   : > { %8418 = vmatpush3.bf16.msra.mxu1 %v8602_v59 }
 0x290   : > { %8419 = vmatprep.subr.bf16.mxu1 %v8603_v20 }
 0x292   : > { %8388 = vmatmul.mubr.msk.bf16.gmra.mxu1 %vm3210_vm5, %v9995_v5 }
 0x293   : > { %8391 = vmatprep.mubr.msk.bf16.mxu1 %vm3210_vm5, %v10036_v14  ;;  %8420 = vmatpush3.bf16.msra.mxu1 %v8603_v20 }
 0x294   : > { %8421 = vmatprep.subr.bf16.mxu1 %v8604_v24 }
 0x297   : > { %8422 = vmatpush3.bf16.msra.mxu1 %v8604_v24 }
 0x298   : > { %8423 = vmatprep.subr.bf16.mxu1 %v8605_v55 }
 0x29a   : > { %8392 = vmatmul.mubr.msk.bf16.gmra.mxu1 %vm3210_vm5, %v10082_v18 }
 0x29b   : > { %8395 = vmatprep.mubr.msk.bf16.mxu1 %vm3210_vm5, %v10129_v63  ;;  %8424 = vmatpush3.bf16.msra.mxu1 %v8605_v55  ;;  %v8611_v55 = vld [vmem:[%s11924_s5 + $0x18] sm:$0xff]  }
 0x29c   : > { %8425 = vmatprep.subr.bf16.mxu1 %v8606_v15  ;;  %4807 = vmatpush1.bf16.msra.mxu0 %v8611_v55 }
 0x29d   : > { %4808 = vmatprep.subr.bf16.mxu0 %v11935_v52 }
 0x29f   : > { %8426 = vmatpush3.bf16.msra.mxu1 %v8606_v15 }
 0x2a0   : > { %4635 = vmatprep.subr.bf16.mxu1 %v11935_v52 }
 0x2a2   : > { %8396 = vmatmul.mubr.msk.bf16.gmra.mxu1 %vm3210_vm5, %v10172_v30 }
 0x2a3   : > { %8399 = vmatprep.mubr.msk.bf16.mxu1 %vm3210_vm5, %v10216_v39 }
 0x2aa   : > { %8400 = vmatmul.mubr.msk.bf16.gmra.mxu1 %vm3210_vm5, %v10258_v50 }
 0x2ab   : > { %8403 = vmatprep.mubr.msk.bf16.mxu1 %vm3210_vm5, %v10270_v32 }
 0x2b2   : > { %8404 = vmatmul.mubr.msk.bf16.gmra.mxu1 %vm3210_vm5, %v10281_v27 }
 0x2b3   : > { %8407 = vmatprep.mubr.msk.bf16.mxu1 %vm3210_vm5, %v10292_v1 }
 0x2ba   : > { %8408 = vmatmul.mubr.msk.bf16.gmra.mxu1 %vm3210_vm5, %v10303_v37 }
 0x2bb   : > { %8411 = vmatprep.mubr.msk.bf16.mxu1 %vm3210_vm5, %v10314_v21 }
 0x2c2   : > { %8412 = vmatmul.mubr.msk.bf16.gmra.mxu1 %vm3210_vm5, %v10325_v58 }
 0x2c3   : > { %8427 = vmatprep.mubr.msk.bf16.mxu1 %vm3210_vm5, %v9956_v36  ;;  %v10414_v36 = vpop.f32.mrf.mxu1 }
 0x2ca   : > { %8428 = vmatmul.mubr.msk.bf16.vlgmr.msra.gmra.mxu1 %vm3210_vm5, %v9995_v5  ;;  %v10416_v5 = vpop.f32.mrf.mxu1 }
 0x2cb   : > { %8431 = vmatprep.mubr.msk.bf16.mxu1 %vm3210_vm5, %v10036_v14  ;;  %v3638_v14 = vpop.permute.xlu1 %3637 }
 0x2d2   : > { %8432 = vmatmul.mubr.msk.bf16.gmra.mxu1 %vm3210_vm5, %v10082_v18  ;;  %v3636_v18 = vpop.permute.xlu0 %3635 }
 0x2d3   : > { %8435 = vmatprep.mubr.msk.bf16.mxu1 %vm3210_vm5, %v10129_v63  ;;  %v10422_v63 = vpop.f32.mrf.mxu1 }
 0x2d6   : > { %v3645_v38 = vpop.permute.xlu0 %3644 }
 0x2da   : > { %8436 = vmatmul.mubr.msk.bf16.gmra.mxu1 %vm3210_vm5, %v10172_v30  ;;  %v10424_v30 = vpop.f32.mrf.mxu1 }
 0x2db   : > { %8439 = vmatprep.mubr.msk.bf16.mxu1 %vm3210_vm5, %v10216_v39  ;;  %v3651_v39 = vsel %vm912_vm0, %v10210_v10, %v3638_v14 }
 0x2e2   : > { %8440 = vmatmul.mubr.msk.bf16.gmra.mxu1 %vm3210_vm5, %v10258_v50  ;;  %v3649_v50 = vsel %vm912_vm0, %v10205_v23, %v3636_v18 }
 0x2e3   : > { %8443 = vmatprep.mubr.msk.bf16.mxu1 %vm3210_vm5, %v10270_v32  ;;  %v3647_v32 = vpop.permute.xlu1 %3646  ;;  %v3653_v43 = vsel %vm2792_vm1, %v3649_v50, %v3645_v38  ;;  %v8612_v50 = vld [vmem:[%s11924_s5 + $0x10] sm:$0xff]  }
 0x2e4   : > { %v3656_v42 = vshrl.u32 %v3653_v43, 16  ;;  %v3659_v45 = vshll.u32 %v3653_v43, 16  ;;  %4809 = vmatpush1.bf16.msra.mxu0 %v8612_v50 }
 0x2e5   : > { %4810 = vmatprep.subr.bf16.mxu0 %v11935_v52 }
 0x2e6   : > { %v3658_v29 = vrot.slane %v3656_v42, 3  ;;  %v3661_v47 = vrot.slane %v3659_v45, 4 }
 0x2e8   : > { %v3662_v61 = vor.u32 %v3661_v47, %v3658_v29  ;;  %v8614_v29 = vld [vmem:[%s11924_s5 + $0x98] sm:$0xff]  }
 0x2e9   : > { %4636 = vmatpush1.bf16.msra.mxu1 %v8614_v29 }
 0x2ea   : > { %8444 = vmatmul.mubr.msk.bf16.gmra.mxu1 %vm3210_vm5, %v10281_v27  ;;  %v10433_v27 = vpop.f32.mrf.mxu1  ;;  %4637 = vmatprep.subr.bf16.mxu1 %v11935_v52 }
 0x2eb   : > { %8447 = vmatprep.mubr.msk.bf16.mxu1 %vm3210_vm5, %v10292_v1  ;;  %v3655_v1 = vsel %vm2792_vm1, %v3651_v39, %v3647_v32 }
 0x2ec   : > { %v3663_v23 = vshrl.u32 %v3655_v1, 16  ;;  %v3666_v10 = vshll.u32 %v3655_v1, 16 }
 0x2ee   : > { %v3665_v49 = vrot.slane %v3663_v23, 3  ;;  %v3668_v44 = vrot.slane %v3666_v10, 4 }
 0x2f0   : > { %v3669_v40 = vor.u32 %v3668_v44, %v3665_v49  ;;  %v8613_v44 = vld [vmem:[%s11924_s5 + $0x8] sm:$0xff]  }
 0x2f1   : > { %4811 = vmatpush1.bf16.msra.mxu0 %v8613_v44  ;;  %v8618_v44 = vld [vmem:[%s11924_s5 + $0x80] sm:$0xff]  }
 0x2f2   : > { %8448 = vmatmul.mubr.msk.bf16.gmra.mxu1 %vm3210_vm5, %v10303_v37  ;;  %v10444_v37 = vpop.f32.mrf.mxu1  ;;  %v3670_v33 = vsel %vm2857_vm4, %v3662_v61, %v3669_v40  ;;  %v8615_v40 = vld [vmem:[%s11924_s5] sm:$0xff]   ;;  %v8616_v61 = vld [vmem:[%s11924_s5 + $0x90] sm:$0xff]   ;;  %4812 = vmatprep.subr.bf16.mxu0 %v11935_v52 }
 0x2f3   : > { %8451 = vmatprep.mubr.msk.bf16.mxu1 %vm3210_vm5, %v10314_v21  ;;  %4638 = vmatpush1.bf16.msra.mxu1 %v8616_v61  ;;  %v8619_v61 = vld [vmem:[%s11924_s5 + $0x78] sm:$0xff]  }
 0x2f4   : > { %v10446_v48 = vpop.f32.mrf.mxu1  ;;  %4639 = vmatprep.subr.bf16.mxu1 %v11935_v52 }
 0x2f5   : > { %4813 = vmatpush1.bf16.msra.mxu0 %v8615_v40 }
 0x2f6   : > { %v10452_v21 = vpop.f32.mrf.mxu1  ;;  %4822 = vmatprep.subr.bf16.mxu0 %v11935_v52 }
 0x2f7   : > { %4640 = vmatpush1.bf16.msra.mxu1 %v8617_v22 }
 0x2f8   : > { %v10454_v54 = vpop.f32.mrf.mxu1  ;;  %4641 = vmatprep.subr.bf16.mxu1 %v11935_v52 }
 0x2f9   : > { %4823 = vmatpush2.bf16.msra.mxu0 %v8620_v46  ;;  %v8621_v46 = vld [vmem:[%s11924_s5 + $0x70] sm:$0xff]  }
 0x2fa   : > { %8452 = vmatmul.mubr.msk.bf16.gmra.mxu1 %vm3210_vm5, %v10325_v58  ;;  %v10458_v51 = vpop.f32.mrf.mxu1  ;;  %4824 = vmatprep.subr.bf16.mxu0 %v11935_v52 }
 0x2fb   : > { %8455 = vmatprep.mubr.msk.bf16.mxu1 %vm3210_vm5, %v10342_v53  ;;  %4642 = vmatpush1.bf16.msra.mxu1 %v8618_v44 }
 0x2fc   : > { %v10463_v58 = vpop.f32.mrf.mxu1  ;;  %4643 = vmatprep.subr.bf16.mxu1 %v11935_v52 }
 0x2fe   : > { %v10465_v31 = vpop.f32.mrf.mxu1 }
 0x2ff   : > { %4644 = vmatpush1.bf16.msra.mxu1 %v8619_v61 }
 0x300   : > { %v10468_v62 = vpop.f32.mrf.mxu1  ;;  %4645 = vmatprep.subr.bf16.mxu1 %v11935_v52 }
 0x302   : > { %8456 = vmatmul.mubr.msk.bf16.gmra.mxu1 %vm3210_vm5, %v3670_v33  ;;  %v10470_v12 = vpop.f32.mrf.mxu1 }
 0x303   : > { %4646 = vmatpush1.bf16.msra.mxu1 %v8621_v46 }
 0x304   : > { %v10472_v60 = vpop.f32.mrf.mxu1  ;;  %4647 = vmatprep.subr.bf16.mxu1 %v11935_v52 }
 0x306   : > { %v10474_v11 = vpop.f32.mrf.mxu1 }
 0x308   : > { %v10476_v13 = vpop.f32.mrf.mxu1 }
 0x30a   : > { %v10478_v16 = vpop.f32.mrf.mxu1 }
 0x30c   : > { %v10480_v0 = vpop.f32.mrf.mxu1 }
 0x30e   : > { %v10482_v2 = vpop.f32.mrf.mxu1 }
 0x310   : > { %v10484_v17 = vpop.f32.mrf.mxu1 }
 0x312   : > { %v10489_v3 = vpop.f32.mrf.mxu1 }
 0x314   : > { %v10492_v19 = vpop.f32.mrf.mxu1 }
 0x323   : > { %v10494_v25 = vpop.f32.mrf.mxu1 }
 0x325   : > { %v10496_v53 = vpop.f32.mrf.mxu1 }
 0x327   : > { %v10498_v4 = vpop.f32.mrf.mxu1 }
 0x328   : > { %11944 = vst [vmem:[#allocation11_spill] sm:$0xff] %v10498_v4 }
 0x329   : > { %v10500_v57 = vpop.f32.mrf.mxu1 }
 0x32a   : > { %11945 = vst [vmem:[#allocation12_spill] sm:$0xff] %v10500_v57  ;;  %v8622_v57 = vld [vmem:[%s11924_s5 + $0x68] sm:$0xff]  }
 0x32b   : > { %4648 = vmatpush1.bf16.msra.mxu1 %v8622_v57 }
 0x32c   : > { %4649 = vmatprep.subr.bf16.mxu1 %v11935_v52 }
 0x342   : > { %v10502_v9 = vpop.f32.mrf.mxu1 }
 0x344   : > { %v10507_v7 = vpop.f32.mrf.mxu1 }
 0x345   : > { %11946 = vst [vmem:[#allocation13_spill] sm:$0xff] %v10507_v7 }
 0x346   : > { %v10509_v26 = vpop.f32.mrf.mxu1 }
 0x348   : > { %v10512_v56 = vpop.f32.mrf.mxu1 }
 0x349   : > { %11947 = vst [vmem:[#allocation14_spill] sm:$0xff] %v10512_v56 }
 0x34a   : > { %v10514_v34 = vpop.f32.mrf.mxu1 }
 0x34b   : > { %v3502_v4 = vadd.f32 %v10514_v34, %v10408_v35 }
 0x34c   : > { %v10516_v6 = vpop.f32.mrf.mxu1 }
 0x34d   : > { %v3494_v46 = vadd.f32 %v10516_v6, %v10414_v36 }
 0x34e   : > { %v10518_v59 = vpop.f32.mrf.mxu1 }
 0x350   : > { %v10520_v20 = vpop.f32.mrf.mxu1 }
 0x351   : > { %v3497_v34 = vadd.f32 %v10520_v20, %v10422_v63 }
 0x352   : > { %v10522_v24 = vpop.f32.mrf.mxu1 }
 0x353   : > { %v3518_v52 = vadd.f32 %v10522_v24, %v10424_v30 }
 0x354   : > { %v10527_v15 = vpop.f32.mrf.mxu1 }
 0x356   : > { %v10529_v14 = vpop.f32.mrf.mxu1 }
 0x357   : > { %v3521_v20 = vadd.f32 %v10529_v14, %v10444_v37 }
 0x358   : > { %v10532_v18 = vpop.f32.mrf.mxu1 }
 0x35a   : > { %v10534_v39 = vpop.f32.mrf.mxu1 }
 0x35c   : > { %v10539_v32 = vpop.f32.mrf.mxu1 }
 0x35e   : > { %v10541_v38 = vpop.f32.mrf.mxu1 }
 0x360   : > { %v10544_v41 = vpop.f32.mrf.mxu1 }
 0x362   : > { %v10546_v1 = vpop.f32.mrf.mxu1 }
 0x364   : > { %v10548_v43 = vpop.f32.mrf.mxu1 }
 0x366   : > { %v10550_v23 = vpop.f32.mrf.mxu1 }
 0x368   : > { %v10552_v10 = vpop.f32.mrf.mxu1 }
 0x36a   : > { %v10554_v42 = vpop.f32.mrf.mxu1 }
 0x36c   : > { %v10556_v45 = vpop.f32.mrf.mxu1 }
 0x36e   : > { %v10558_v49 = vpop.f32.mrf.mxu1 }
 0x370   : > { %v10566_v47 = vpop.f32.mrf.mxu1 }
 0x372   : > { %v10574_v33 = vpop.f32.mrf.mxu1 }
 0x374   : > { %v10578_v8 = vpop.f32.mrf.mxu1 }
 0x376   : > { %v10586_v55 = vpop.f32.mrf.mxu1 }
 0x378   : > { %v10590_v50 = vpop.f32.mrf.mxu1 }
 0x37a   : > { %v10595_v29 = vpop.f32.mrf.mxu1 }
 0x37c   : > { %v10599_v40 = vpop.f32.mrf.mxu1 }
 0x37d   : > { %11948 = vst [vmem:[#allocation15_spill] sm:$0xff] %v10599_v40 }
 0x37e   : > { %v10604_v28 = vpop.f32.mrf.mxu1 }
 0x37f   : > { %11949 = vst [vmem:[#allocation16_spill] sm:$0xff] %v10604_v28 }
 0x380   : > { %v10607_v22 = vpop.f32.mrf.mxu1 }
 0x381   : > { %11950 = vst [vmem:[#allocation17_spill] sm:$0xff] %v10607_v22 }
 0x382   : > { %v8413_v56 = vpop.f32.mrf.mxu1 }
 0x383   : > { %v10614_v44 = vadd.f32 %v8413_v56, %v10502_v9  ;;  %v10632_v56 = vld [vmem:[%s11923_s4] ss:$0 sm:$0xff] }
 0x384   : > { %v10616_v7 = vpop.f32.mrf.mxu1 }
 0x385   : > { %11951 = vst [vmem:[#allocation18_spill] sm:$0xff] %v10614_v44  ;;  %11952 = vst [vmem:[#allocation19_spill] sm:$0xff] %v10616_v7 }
 0x386   : > { %v8414_v28 = vpop.f32.mrf.mxu1 }
 0x387   : > { %v10623_v61 = vadd.f32 %v8414_v28, %v10509_v26  ;;  %v3505_v26 = vadd.f32 %v10518_v59, %v10416_v5  ;;  %v3510_v59 = vadd.f32 %v10527_v15, %v10433_v27 }
 0x388   : > { %v10625_v22 = vpop.f32.mrf.mxu1 }
 0x389   : > { %11953 = vst [vmem:[#allocation20_spill] sm:$0xff] %v10623_v61  ;;  %11954 = vst [vmem:[#allocation21_spill] sm:$0xff] %v10625_v22 }
 0x38a   : > { %v8429_v9 = vpop.f32.mrf.mxu1 }
 0x38b   : > { %v3886_v44 = vadd.f32 %v8429_v9, %v3502_v4 }
 0x38c   : > { %v3757_v28 = vpop.f32.mrf.mxu1 }
 0x38d   : > { %v3925_v61 = vadd.f32 %v10632_v56, %v3886_v44  ;;  %v3884_v35 = vadd.f32 %v3757_v28, %v3494_v46 }
 0x38e   : > { %v8430_v57 = vpop.f32.mrf.mxu1 }
 0x38f   : > { %v3923_v22 = vadd.f32 %v10632_v56, %v3884_v35  ;;  %v3887_v7 = vadd.f32 %v8430_v57, %v3505_v26  ;;  %v3957_v36 = vmax.f32 %v3925_v61, 0.0  ;;  %v3513_v61 = vadd.f32 %v10532_v18, %v10446_v48 }
 0x390   : > { %v3760_v40 = vpop.f32.mrf.mxu1 }
 0x391   : > { %v3955_v4 = vmax.f32 %v3923_v22, 0.0  ;;  %v3926_v6 = vadd.f32 %v10632_v56, %v3887_v7  ;;  %v3885_v9 = vadd.f32 %v3760_v40, %v3497_v34 }
 0x392   : > { %v8433_v5 = vpop.f32.mrf.mxu1 }
 0x393   : > { %v3987_v44 = vmax.f32 %v3955_v4, %v3957_v36  ;;  %v3924_v46 = vadd.f32 %v10632_v56, %v3885_v9  ;;  %v3890_v63 = vadd.f32 %v8433_v5, %v3518_v52  ;;  %v3958_v30 = vmax.f32 %v3926_v6, 0.0 }
 0x394   : > { %v3773_v28 = vpop.f32.mrf.mxu1  ;;  %v3534_v52 = vadd.f32 %v10534_v39, %v10452_v21  ;;  %v3526_v4 = vadd.f32 %v10539_v32, %v10454_v54  ;;  %v3537_v9 = vadd.f32 %v10541_v38, %v10458_v51 }
 0x395   : > { %4003 = vst.msk [vmem:[#allocation3] sm:$0xff] %vm2792_vm1, %v3987_v44  ;;  %v3956_v24 = vmax.f32 %v3924_v46, 0.0  ;;  %v3929_v22 = vadd.f32 %v10632_v56, %v3890_v63  ;;  %v3888_v7 = vadd.f32 %v3773_v28, %v3510_v59  ;;  %v3529_v63 = vadd.f32 %v10544_v41, %v10463_v58 }
 0x396   : > { %v8434_v40 = vpop.f32.mrf.mxu1  ;;  %v3550_v28 = vadd.f32 %v10546_v1, %v10465_v31  ;;  %v3542_v58 = vadd.f32 %v10548_v43, %v10468_v62  ;;  %v3545_v62 = vadd.f32 %v10552_v10, %v10472_v60 }
 0x397   : > { %v3988_v27 = vmax.f32 %v3956_v24, %v3958_v30  ;;  %v3927_v15 = vadd.f32 %v10632_v56, %v3888_v7  ;;  %v3891_v26 = vadd.f32 %v8434_v40, %v3521_v20  ;;  %v3961_v14 = vmax.f32 %v3929_v22, 0.0 }
 0x398   : > { %v3776_v37 = vpop.f32.mrf.mxu1 }
 0x399   : > { %4004 = vst.msk [vmem:[#allocation3 + $0x8] sm:$0xff] %vm2792_vm1, %v3988_v27  ;;  %v3959_v35 = vmax.f32 %v3927_v15, 0.0  ;;  %v3930_v57 = vadd.f32 %v10632_v56, %v3891_v26  ;;  %v3889_v34 = vadd.f32 %v3776_v37, %v3513_v61  ;;  %v3553_v15 = vadd.f32 %v10550_v23, %v10470_v12 }
 0x39a   : > { %v8437_v36 = vpop.f32.mrf.mxu1 }
 0x39b   : > { %v3989_v48 = vmax.f32 %v3959_v35, %v3961_v14  ;;  %v3928_v18 = vadd.f32 %v10632_v56, %v3889_v34  ;;  %v3894_v6 = vadd.f32 %v8437_v36, %v3534_v52  ;;  %v3962_v39 = vmax.f32 %v3930_v57, 0.0 }
 0x39c   : > { %v3789_v21 = vpop.f32.mrf.mxu1 }
 0x39d   : > { %4005 = vst.msk [vmem:[#allocation3 + $0x10] sm:$0xff] %vm2792_vm1, %v3989_v48  ;;  %v3960_v5 = vmax.f32 %v3928_v18, 0.0  ;;  %v3933_v59 = vadd.f32 %v10632_v56, %v3894_v6  ;;  %v3892_v44 = vadd.f32 %v3789_v21, %v3526_v4  ;;  %v3566_v4 = vadd.f32 %v10554_v42, %v10474_v11 }
 0x39e   : > { %v8438_v46 = vpop.f32.mrf.mxu1 }
 0x39f   : > { %v3990_v54 = vmax.f32 %v3960_v5, %v3962_v39  ;;  %v3931_v32 = vadd.f32 %v10632_v56, %v3892_v44  ;;  %v3895_v20 = vadd.f32 %v8438_v46, %v3537_v9  ;;  %v3965_v30 = vmax.f32 %v3933_v59, 0.0  ;;  %v4100_v5 = vld [vmem:[#allocation6 + $0x18] sm:$0xff]  ;;  %v8623_v46 = vld [vmem:[%s11924_s5 + $0x60] sm:$0xff]  }
 0x3a0   : > { %v4019_v51 = vld [vmem:[#allocation3] ss:$2 sm:$0xff]  ;;  %v4035_v38 = vld [vmem:[#allocation3 + $0x1] ss:$2 sm:$0xff]  ;;  %v3792_v24 = vpop.f32.mrf.mxu1  ;;  %v3558_v59 = vadd.f32 %v10556_v45, %v10476_v13  ;;  %4650 = vmatpush1.bf16.msra.mxu1 %v8623_v46 }
 0x3a1   : > { %v4050_v22 = vmax.f32 %v4019_v51, %v4035_v38  ;;  %4006 = vst.msk [vmem:[#allocation3 + $0x18] sm:$0xff] %vm2792_vm1, %v3990_v54  ;;  %v3963_v7 = vmax.f32 %v3931_v32, 0.0  ;;  %v3934_v40 = vadd.f32 %v10632_v56, %v3895_v20  ;;  %v3893_v61 = vadd.f32 %v3792_v24, %v3529_v63 }
 0x3a2   : > { %v8441_v27 = vpop.f32.mrf.mxu1  ;;  %v3569_v63 = vadd.f32 %v10558_v49, %v10478_v16  ;;  %v3561_v51 = vadd.f32 %v10566_v47, %v10480_v0  ;;  %v11955_v24 = vmov 0  }
 0x3a3   : > { %4089 = vst.msk [vmem:[#allocation6 + $0x20] sm:$0xff] %vm2792_vm1, %v4050_v22  ;;  %v3991_v41 = vmax.f32 %v3963_v7, %v3965_v30  ;;  %v3932_v31 = vadd.f32 %v10632_v56, %v3893_v61  ;;  %v3898_v1 = vadd.f32 %v8441_v27, %v3550_v28  ;;  %v3966_v52 = vmax.f32 %v3934_v40, 0.0  ;;  %4659 = vmatprep.subr.bf16.mxu1 %v11955_v24  ;;  %v8624_v40 = vld [vmem:[%s11924_s5 + $0xb8] sm:$0xff]  }
 0x3a4   : > { %v3805_v26 = vpop.f32.mrf.mxu1  ;;  %v3582_v61 = vadd.f32 %v10574_v33, %v10482_v2  ;;  %4660 = vmatpush2.bf16.msra.mxu1 %v8624_v40  ;;  %v3574_v2 = vadd.f32 %v10578_v8, %v10484_v17 }
 0x3a5   : > { %4007 = vst.msk [vmem:[#allocation3 + $0x20] sm:$0xff] %vm2792_vm1, %v3991_v41  ;;  %v3964_v37 = vmax.f32 %v3932_v31, 0.0  ;;  %v3937_v14 = vadd.f32 %v10632_v56, %v3898_v1  ;;  %v3896_v35 = vadd.f32 %v3805_v26, %v3542_v58  ;;  %4661 = vmatprep.subr.bf16.mxu1 %v11955_v24 }
 0x3a6   : > { %v8442_v57 = vpop.f32.mrf.mxu1 }
 0x3a7   : > { %v3992_v43 = vmax.f32 %v3964_v37, %v3966_v52  ;;  %v3935_v34 = vadd.f32 %v10632_v56, %v3896_v35  ;;  %v3899_v36 = vadd.f32 %v8442_v57, %v3553_v15  ;;  %v3969_v48 = vmax.f32 %v3937_v14, 0.0  ;;  %v4103_v52 = vld [vmem:[#allocation6 + $0x30] sm:$0xff] }
 0x3a8   : > { %v4021_v12 = vld [vmem:[#allocation3 + $0x10] ss:$2 sm:$0xff]  ;;  %v4037_v23 = vld [vmem:[#allocation3 + $0x11] ss:$2 sm:$0xff]  ;;  %v3808_v18 = vpop.f32.mrf.mxu1 }
 0x3a9   : > { %v4051_v6 = vmax.f32 %v4021_v12, %v4037_v23  ;;  %4008 = vst.msk [vmem:[#allocation3 + $0x28] sm:$0xff] %vm2792_vm1, %v3992_v43  ;;  %v3967_v9 = vmax.f32 %v3935_v34, 0.0  ;;  %v3938_v21 = vadd.f32 %v10632_v56, %v3899_v36  ;;  %v3897_v39 = vadd.f32 %v3808_v18, %v3545_v62  ;;  %v8625_v43 = vld [vmem:[%s11924_s5 + $0xb0] sm:$0xff]  }
 0x3aa   : > { %v8445_v60 = vpop.f32.mrf.mxu1  ;;  %v4101_v10 = vld [vmem:[#allocation6 + $0x20] sm:$0xff]  ;;  %v3585_v34 = vadd.f32 %v10586_v55, %v10489_v3  ;;  %4662 = vmatpush2.bf16.msra.mxu1 %v8625_v43 }
 0x3ab   : > { %4090 = vst.msk [vmem:[#allocation6 + $0x38] sm:$0xff] %vm2792_vm1, %v4051_v6  ;;  %v3993_v11 = vmax.f32 %v3967_v9, %v3969_v48  ;;  %v3936_v42 = vadd.f32 %v10632_v56, %v3897_v39  ;;  %v3902_v44 = vadd.f32 %v8445_v60, %v3566_v4  ;;  %v10698_v32 = vpack.c.bf16 %v4101_v10, %v4100_v5  ;;  %v8627_v5 = vld [vmem:[%s11924_s5 + $0xa8] sm:$0xff]  }
 0x3ac   : > { %v3821_v54 = vpop.f32.mrf.mxu1  ;;  %v3970_v20 = vmax.f32 %v3938_v21, 0.0  ;;  %v3577_v48 = vadd.f32 %v10590_v50, %v10492_v19  ;;  %4663 = vmatprep.subr.bf16.mxu1 %v11955_v24  ;;  %v3598_v60 = vadd.f32 %v10595_v29, %v10494_v25  ;;  %v11956_v29 = vld [vmem:[#allocation15_spill] sm:$0xff] }
 0x3ad   : > { %4009 = vst.msk [vmem:[#allocation3 + $0x30] sm:$0xff] %vm2792_vm1, %v3993_v11  ;;  %v3968_v13 = vmax.f32 %v3936_v42, 0.0  ;;  %v3941_v45 = vadd.f32 %v10632_v56, %v3902_v44  ;;  %v3900_v28 = vadd.f32 %v3821_v54, %v3558_v59  ;;  %v4157_v30 = vshll.u32 %v10698_v32, 16  ;;  %v8626_v11 = vld [vmem:[%s11924_s5 + $0x50] sm:$0xff]   ;;  %v4106_v54 = vld [vmem:[#allocation6 + $0x48] sm:$0xff] }
 0x3ae   : > { %v8446_v38 = vpop.f32.mrf.mxu1  ;;  %v4155_v7 = vshrl.u32 %v10698_v32, 16  ;;  %4664 = vmatpush2.bf16.msra.mxu1 %v8627_v5  ;;  %4825 = vmatpush2.bf16.msra.mxu0 %v8626_v11  ;;  %v11965_v11 = vld [vmem:[#allocation21_spill] sm:$0xff] }
 0x3af   : > { %v3994_v16 = vmax.f32 %v3968_v13, %v3970_v20  ;;  %v3939_v49 = vadd.f32 %v10632_v56, %v3900_v28  ;;  %v3903_v22 = vadd.f32 %v8446_v38, %v3569_v63  ;;  %v3973_v47 = vmax.f32 %v3941_v45, 0.0  ;;  %4665 = vmatprep.subr.bf16.mxu1 %v11955_v24  ;;  %4826 = vmatprep.subr.bf16.mxu0 %v11955_v24 }
 0x3b0   : > { %v4023_v27 = vld [vmem:[#allocation3 + $0x20] ss:$2 sm:$0xff]  ;;  %v4039_v0 = vld [vmem:[#allocation3 + $0x21] ss:$2 sm:$0xff]  ;;  %v3824_v58 = vpop.f32.mrf.mxu1  ;;  %v4159_v41 = vrot.slane %v4157_v30, 1  ;;  %v3590_v45 = vadd.f32 %v11956_v29, %v10496_v53  ;;  %v4112_v29 = vld [vmem:[#allocation6 + $0x78] sm:$0xff] }
 0x3b1   : > { %v4052_v31 = vmax.f32 %v4023_v27, %v4039_v0  ;;  %4010 = vst.msk [vmem:[#allocation3 + $0x38] sm:$0xff] %vm2792_vm1, %v3994_v16  ;;  %v3971_v1 = vmax.f32 %v3939_v49, 0.0  ;;  %v3942_v15 = vadd.f32 %v10632_v56, %v3903_v22  ;;  %v3901_v26 = vadd.f32 %v3824_v58, %v3561_v51  ;;  %v8628_v30 = vld [vmem:[%s11924_s5 + $0xa0] sm:$0xff]   ;;  %v11957_v16 = vld [vmem:[#allocation11_spill] sm:$0xff] }
 0x3b2   : > { %v8449_v37 = vpop.f32.mrf.mxu1  ;;  %v4160_v14 = vor.u32 %v4159_v41, %v4155_v7  ;;  %v4104_v35 = vld [vmem:[#allocation6 + $0x38] sm:$0xff]  ;;  %4666 = vmatpush2.bf16.msra.mxu1 %v8628_v30  ;;  %v11960_v58 = vld [vmem:[#allocation17_spill] sm:$0xff] }
 0x3b3   : > { %4091 = vst.msk [vmem:[#allocation6 + $0x50] sm:$0xff] %vm2792_vm1, %v4052_v31  ;;  %v3995_v33 = vmax.f32 %v3971_v1, %v3973_v47  ;;  %v3940_v57 = vadd.f32 %v10632_v56, %v3901_v26  ;;  %v3906_v62 = vadd.f32 %v8449_v37, %v3582_v61  ;;  %v10726_v4 = vpack.c.bf16 %v4104_v35, %v4103_v52  ;;  %v11958_v49 = vld [vmem:[#allocation16_spill] sm:$0xff] }
 0x3b4   : > { %4205 = vrot.lane.b32.xlu0 %v4160_v14, %s9116_s15  ;;  %v3837_v36 = vpop.f32.mrf.mxu1  ;;  %v3974_v17 = vmax.f32 %v3942_v15, 0.0  ;;  %v3601_v22 = vadd.f32 %v11958_v49, %v11957_v16  ;;  %v11959_v47 = vld [vmem:[#allocation12_spill] sm:$0xff]  ;;  %5004 = vmatprep.subr.bf16.mxu1 %v11955_v24 }
 0x3b5   : > { %4011 = vst.msk [vmem:[#allocation3 + $0x40] sm:$0xff] %vm2792_vm1, %v3995_v33  ;;  %v3972_v8 = vmax.f32 %v3940_v57, 0.0  ;;  %v3945_v12 = vadd.f32 %v10632_v56, %v3906_v62  ;;  %v3904_v23 = vadd.f32 %v3837_v36, %v3574_v2  ;;  %v4162_v6 = vshrl.u32 %v10726_v4, 16 }
 0x3b6   : > { %v8450_v18 = vpop.f32.mrf.mxu1  ;;  %v4164_v3 = vshll.u32 %v10726_v4, 16  ;;  %v3593_v41 = vadd.f32 %v11960_v58, %v11959_v47 }
 0x3b7   : > { %v3996_v55 = vmax.f32 %v3972_v8, %v3974_v17  ;;  %v3977_v9 = vmax.f32 %v3945_v12, 0.0  ;;  %v3943_v21 = vadd.f32 %v10632_v56, %v3904_v23  ;;  %v3907_v39 = vadd.f32 %v8450_v18, %v3585_v34  ;;  %v4109_v17 = vld [vmem:[#allocation6 + $0x60] sm:$0xff]  ;;  %v11962_v18 = vld [vmem:[#allocation19_spill] sm:$0xff] }
 0x3b8   : > { %v4025_v19 = vld [vmem:[#allocation3 + $0x30] ss:$2 sm:$0xff]  ;;  %v4041_v50 = vld [vmem:[#allocation3 + $0x31] ss:$2 sm:$0xff]  ;;  %v3840_v10 = vpop.f32.mrf.mxu1  ;;  %v4166_v59 = vrot.slane %v4164_v3, 1 }
 0x3b9   : > { %v4053_v42 = vmax.f32 %v4025_v19, %v4041_v50  ;;  %4012 = vst.msk [vmem:[#allocation3 + $0x48] sm:$0xff] %vm2792_vm1, %v3996_v55  ;;  %v3975_v44 = vmax.f32 %v3943_v21, 0.0  ;;  %v3946_v46 = vadd.f32 %v10632_v56, %v3907_v39  ;;  %v3905_v63 = vadd.f32 %v3840_v10, %v3577_v48  ;;  %v11961_v48 = vld [vmem:[#allocation13_spill] sm:$0xff] }
 0x3ba   : > { %v8453_v20 = vpop.f32.mrf.mxu1  ;;  %v4167_v13 = vor.u32 %v4166_v59, %v4162_v6  ;;  %v4107_v25 = vld [vmem:[#allocation6 + $0x50] sm:$0xff]  ;;  %v3606_v6 = vadd.f32 %v11962_v18, %v11961_v48  ;;  %v4118_v48 = vld [vmem:[#allocation6 + $0xa8] sm:$0xff] }
 0x3bb   : > { %4092 = vst.msk [vmem:[#allocation6 + $0x68] sm:$0xff] %vm2792_vm1, %v4053_v42  ;;  %v3997_v28 = vmax.f32 %v3975_v44, %v3977_v9  ;;  %v3944_v51 = vadd.f32 %v10632_v56, %v3905_v63  ;;  %v3910_v38 = vadd.f32 %v8453_v20, %v3598_v60  ;;  %v10758_v40 = vpack.c.bf16 %v4107_v25, %v4106_v54  ;;  %v11963_v9 = vld [vmem:[#allocation18_spill] sm:$0xff]  ;;  %v11966_v20 = vld [vmem:[#allocation20_spill] sm:$0xff] }
 0x3bc   : > { %4207 = vrot.lane.b32.xlu1 %v4167_v13, %s9116_s15  ;;  %v3853_v7 = vpop.f32.mrf.mxu1  ;;  %v3978_v53 = vmax.f32 %v3946_v46, 0.0  ;;  %v11964_v59 = vld [vmem:[#allocation14_spill] sm:$0xff] }
 0x3bd   : > { %4013 = vst.msk [vmem:[#allocation3 + $0x50] sm:$0xff] %vm2792_vm1, %v3997_v28  ;;  %v3976_v61 = vmax.f32 %v3944_v51, 0.0  ;;  %v3949_v27 = vadd.f32 %v10632_v56, %v3910_v38  ;;  %v3908_v0 = vadd.f32 %v3853_v7, %v3590_v45  ;;  %v4171_v1 = vshll.u32 %v10758_v40, 16 }
 0x3be   : > { %v8454_v31 = vpop.f32.mrf.mxu1  ;;  %v4169_v37 = vshrl.u32 %v10758_v40, 16  ;;  %v3609_v42 = vadd.f32 %v11965_v11, %v11964_v59 }
 0x3bf   : > { %v3998_v15 = vmax.f32 %v3976_v61, %v3978_v53  ;;  %v3947_v26 = vadd.f32 %v10632_v56, %v3908_v0  ;;  %v3911_v52 = vadd.f32 %v8454_v31, %v3601_v22  ;;  %v3981_v2 = vmax.f32 %v3949_v27, 0.0 }
 0x3c0   : > { %v4027_v14 = vld [vmem:[#allocation3 + $0x40] ss:$2 sm:$0xff]  ;;  %v4043_v35 = vld [vmem:[#allocation3 + $0x41] ss:$2 sm:$0xff]  ;;  %v3856_v33 = vpop.f32.mrf.mxu1  ;;  %v4173_v57 = vrot.slane %v4171_v1, 1 }
 0x3c1   : > { %v4054_v62 = vmax.f32 %v4027_v14, %v4043_v35  ;;  %4014 = vst.msk [vmem:[#allocation3 + $0x58] sm:$0xff] %vm2792_vm1, %v3998_v15  ;;  %v3979_v43 = vmax.f32 %v3947_v26, 0.0  ;;  %v3950_v34 = vadd.f32 %v10632_v56, %v3911_v52  ;;  %v3909_v36 = vadd.f32 %v3856_v33, %v3593_v41  ;;  %v8630_v52 = vld [vmem:[%s11924_s5 + $0x48] sm:$0xff]   ;;  %v4115_v14 = vld [vmem:[#allocation6 + $0x90] sm:$0xff] }
 0x3c2   : > { %v8457_v8 = vpop.f32.mrf.mxu1  ;;  %v4174_v12 = vor.u32 %v4173_v57, %v4169_v37  ;;  %v4110_v23 = vld [vmem:[#allocation6 + $0x68] sm:$0xff]  ;;  %4827 = vmatpush2.bf16.msra.mxu0 %v8630_v52 }
 0x3c3   : > { %4093 = vst.msk [vmem:[#allocation6 + $0x80] sm:$0xff] %vm2792_vm1, %v4054_v62  ;;  %v3999_v3 = vmax.f32 %v3979_v43, %v3981_v2  ;;  %v3948_v55 = vadd.f32 %v10632_v56, %v3909_v36  ;;  %v3914_v21 = vadd.f32 %v8457_v8, %v11963_v9  ;;  %v10776_v5 = vpack.c.bf16 %v4110_v23, %v4109_v17  ;;  %v4097_v62 = vld [vmem:[#allocation6] sm:$0xff]  ;;  %v4098_v43 = vld [vmem:[#allocation6 + $0x8] sm:$0xff] }
 0x3c4   : > { %4209 = vrot.lane.b32.xlu0 %v4174_v12, %s9116_s15  ;;  %v3869_v39 = vpop.f32.mrf.mxu1  ;;  %v3982_v60 = vmax.f32 %v3950_v34, 0.0  ;;  %4828 = vmatprep.subr.bf16.mxu0 %v11955_v24  ;;  %v10807_v8 = vpack.c.bf16 %v4098_v43, %v4097_v62 }
 0x3c5   : > { %4015 = vst.msk [vmem:[#allocation3 + $0x60] sm:$0xff] %vm2792_vm1, %v3999_v3  ;;  %v3980_v19 = vmax.f32 %v3948_v55, 0.0  ;;  %v3953_v50 = vadd.f32 %v10632_v56, %v3914_v21  ;;  %v3912_v10 = vadd.f32 %v3869_v39, %v3606_v6  ;;  %v4178_v46 = vshll.u32 %v10776_v5, 16  ;;  %v4124_v21 = vld [vmem:[#allocation6 + $0xd8] sm:$0xff]  ;;  %v4125_v39 = vld [vmem:[#allocation6 + $0xe0] sm:$0xff] }
 0x3c6   : > { %v8458_v44 = vpop.f32.mrf.mxu1  ;;  %v4176_v25 = vshrl.u32 %v10776_v5, 16  ;;  %v4150_v9 = vshll.u32 %v10807_v8, 16  ;;  %v10817_v11 = vpack.c.bf16 %v4125_v39, %v4124_v21 }
 0x3c7   : > { %v4000_v63 = vmax.f32 %v3980_v19, %v3982_v60  ;;  %v3951_v54 = vadd.f32 %v10632_v56, %v3912_v10  ;;  %v3915_v13 = vadd.f32 %v8458_v44, %v11966_v20  ;;  %v3985_v51 = vmax.f32 %v3953_v50, 0.0 }
 0x3c8   : > { %v4029_v45 = vld [vmem:[#allocation3 + $0x50] ss:$2 sm:$0xff]  ;;  %v4045_v28 = vld [vmem:[#allocation3 + $0x51] ss:$2 sm:$0xff]  ;;  %v3872_v38 = vpop.f32.mrf.mxu1  ;;  %v4180_v30 = vrot.slane %v4178_v46, 1  ;;  %v4148_v19 = vshrl.u32 %v10807_v8, 16 }
 0x3c9   : > { %v4055_v16 = vmax.f32 %v4029_v45, %v4045_v28  ;;  %4016 = vst.msk [vmem:[#allocation3 + $0x68] sm:$0xff] %vm2792_vm1, %v4000_v63  ;;  %v3983_v49 = vmax.f32 %v3951_v54, 0.0  ;;  %v3954_v22 = vadd.f32 %v10632_v56, %v3915_v13  ;;  %v3913_v7 = vadd.f32 %v3872_v38, %v3609_v42  ;;  %v4121_v42 = vld [vmem:[#allocation6 + $0xc0] sm:$0xff] }
 0x3ca   : > { %v4181_v53 = vor.u32 %v4180_v30, %v4176_v25  ;;  %v4113_v61 = vld [vmem:[#allocation6 + $0x80] sm:$0xff]  ;;  %v4152_v59 = vrot.slane %v4150_v9, 1  ;;  %v4866_v20 = vshll.u32 %v10817_v11, 16  ;;  %v4864_v28 = vshrl.u32 %v10817_v11, 16 }
 0x3cb   : > { %4094 = vst.msk [vmem:[#allocation6 + $0x98] sm:$0xff] %vm2792_vm1, %v4055_v16  ;;  %v4001_v27 = vmax.f32 %v3983_v49, %v3985_v51  ;;  %v3952_v0 = vadd.f32 %v10632_v56, %v3913_v7  ;;  %v10790_v47 = vpack.c.bf16 %v4113_v61, %v4112_v29  ;;  %v3986_v58 = vmax.f32 %v3954_v22, 0.0  ;;  %v8636_v13 = vld [vmem:[%s11924_s5 + $0x40] sm:$0xff]   ;;  %v4102_v16 = vld [vmem:[#allocation6 + $0x28] sm:$0xff] }
 0x3cc   : > { %4211 = vrot.lane.b32.xlu1 %v4181_v53, %s9116_s15  ;;  %v4153_v63 = vor.u32 %v4152_v59, %v4148_v19  ;;  %4829 = vmatpush2.bf16.msra.mxu0 %v8636_v13  ;;  %v4868_v51 = vrot.slane %v4866_v20, 1  ;;  %v4130_v49 = vpack.c.bf16 %v4102_v16, %v4102_v16  ;;  %v4238_v22 = vrot.slane %v10698_v32, 1  ;;  %v4105_v53 = vld [vmem:[#allocation6 + $0x40] sm:$0xff] }
 0x3cd   : > { %4017 = vst.msk [vmem:[#allocation3 + $0x70] sm:$0xff] %vm2792_vm1, %v4001_v27  ;;  %v3984_v41 = vmax.f32 %v3952_v0, 0.0  ;;  %v4185_v31 = vshll.u32 %v10790_v47, 16  ;;  %v4183_v15 = vshrl.u32 %v10790_v47, 16  ;;  %v4247_v20 = vrot.slane %v10776_v5, 1 }
 0x3ce   : > { %v4869_v30 = vor.u32 %v4868_v51, %v4864_v28  ;;  %v4239_v7 = vrot.slane %v4130_v49, 1 }
 0x3cf   : > { %v4002_v1 = vmax.f32 %v3984_v41, %v3986_v58  ;;  %v4187_v26 = vrot.slane %v4185_v31, 1  ;;  %v4132_v58 = vpack.c.bf16 %v4105_v53, %v4105_v53  ;;  %v4241_v31 = vrot.slane %v10726_v4, 1 }
 0x3d0   : > { %v4031_v37 = vld [vmem:[#allocation3 + $0x60] ss:$2 sm:$0xff]  ;;  %v4047_v56 = vld [vmem:[#allocation3 + $0x61] ss:$2 sm:$0xff]  ;;  %v4240_v27 = vsel %vm2615_vm2, %v4238_v22, %v4239_v7  ;;  %v4250_v7 = vrot.slane %v10790_v47, 1 }
 0x3d1   : > { %v4056_v35 = vmax.f32 %v4031_v37, %v4047_v56  ;;  %4018 = vst.msk [vmem:[#allocation3 + $0x78] sm:$0xff] %vm2792_vm1, %v4002_v1  ;;  %v4188_v2 = vor.u32 %v4187_v26, %v4183_v15  ;;  %v4242_v1 = vrot.slane %v4132_v58, 1  ;;  %v4108_v26 = vld [vmem:[#allocation6 + $0x58] sm:$0xff] }
 0x3d2   : > { %v4116_v33 = vld [vmem:[#allocation6 + $0x98] sm:$0xff] }
 0x3d3   : > { %4095 = vst.msk [vmem:[#allocation6 + $0xb0] sm:$0xff] %vm2792_vm1, %v4056_v35  ;;  %4213 = vrot.lane.b32.xlu0 %v4188_v2, %s9116_s15  ;;  %v10803_v57 = vpack.c.bf16 %v4116_v33, %v4115_v14  ;;  %v4243_v56 = vsel %vm2615_vm2, %v4241_v31, %v4242_v1  ;;  %v4134_v35 = vpack.c.bf16 %v4108_v26, %v4108_v26  ;;  %v4117_v31 = vld [vmem:[#allocation6 + $0xa0] sm:$0xff] }
 0x3d5   : > { %v4192_v34 = vshll.u32 %v10803_v57, 16  ;;  %v4190_v36 = vshrl.u32 %v10803_v57, 16 }
 0x3d7   : > { %v4194_v17 = vrot.slane %v4192_v34, 1 }
 0x3d8   : > { %v4033_v12 = vld [vmem:[#allocation3 + $0x70] ss:$2 sm:$0xff]  ;;  %v4049_v23 = vld [vmem:[#allocation3 + $0x71] ss:$2 sm:$0xff] }
 0x3d9   : > { %v4057_v18 = vmax.f32 %v4033_v12, %v4049_v23  ;;  %v4195_v6 = vor.u32 %v4194_v17, %v4190_v36  ;;  %v4244_v17 = vrot.slane %v10758_v40, 1  ;;  %v4245_v12 = vrot.slane %v4134_v35, 1 }
 0x3da   : > { %v4119_v3 = vld [vmem:[#allocation6 + $0xb0] sm:$0xff] }
 0x3db   : > { %4096 = vst.msk [vmem:[#allocation6 + $0xc8] sm:$0xff] %vm2792_vm1, %v4057_v18  ;;  %4215 = vrot.lane.b32.xlu1 %v4195_v6, %s9116_s15  ;;  %v10811_v55 = vpack.c.bf16 %v4119_v3, %v4118_v48  ;;  %v4111_v6 = vld [vmem:[#allocation6 + $0x70] sm:$0xff] }
 0x3dc   : > { %v8646_v3 = vld [vmem:[%s11926_s7 + $0x170] ss:$8 sps:$4 sm:$0xff]  }
 0x3dd   : > { %v4199_v60 = vshll.u32 %v10811_v55, 16  ;;  %v4197_v50 = vshrl.u32 %v10811_v55, 16 }
 0x3df   : > { %v4201_v10 = vrot.slane %v4199_v60, 1  ;;  %v4246_v60 = vsel %vm2615_vm2, %v4244_v17, %v4245_v12  ;;  %v4253_v17 = vrot.slane %v10803_v57, 1 }
 0x3e1   : > { %v4202_v44 = vor.u32 %v4201_v10, %v4197_v50  ;;  %v4136_v50 = vpack.c.bf16 %v4111_v6, %v4111_v6 }
 0x3e2   : > { %v4122_v46 = vld [vmem:[#allocation6 + $0xc8] sm:$0xff] }
 0x3e3   : > { %4217 = vrot.lane.b32.xlu0 %v4202_v44, %s9116_s15  ;;  %v10820_v54 = vpack.c.bf16 %v4122_v46, %v4121_v42  ;;  %v4248_v13 = vrot.slane %v4136_v50, 1 }
 0x3e5   : > { %v4465_v25 = vshll.u32 %v10820_v54, 16  ;;  %v4463_v29 = vshrl.u32 %v10820_v54, 16 }
 0x3e7   : > { %4203 = vrot.lane.b32.xlu0 %v4153_v63, %s9116_s15  ;;  %v4467_v45 = vrot.slane %v4465_v25, 1  ;;  %v4114_v63 = vld [vmem:[#allocation6 + $0x88] sm:$0xff] }
 0x3e9   : > { %v4468_v38 = vor.u32 %v4467_v45, %v4463_v29  ;;  %v4138_v29 = vpack.c.bf16 %v4114_v63, %v4114_v63  ;;  %v8631_v45 = vld [vmem:[%s11924_s5 + $0xf0] sm:$0xff]  }
 0x3eb   : > { %4469 = vrot.lane.b32.xlu1 %v4468_v38, %s9116_s15  ;;  %v4249_v38 = vsel %vm2615_vm2, %v4247_v20, %v4248_v13  ;;  %v4251_v53 = vrot.slane %v4138_v29, 1  ;;  %v8637_v13 = vld [vmem:[%s11924_s5 + $0xc8] sm:$0xff]  }
 0x3ed   : > { %v4252_v26 = vsel %vm2615_vm2, %v4250_v7, %v4251_v53  ;;  %v8638_v53 = vld [vmem:[%s11924_s5 + $0xc0] sm:$0xff]  }
 0x3ef   : > { %4870 = vrot.lane.b32.xlu1 %v4869_v30, %s9116_s15 }
 0x426   : > { %v4206_v61 = vpop.permute.xlu0 %4205 }
 0x427   : > { %v4262_v0 = vsel %vm2792_vm1, %v10698_v32, %v4206_v61  ;;  %v8632_v61 = vld [vmem:[%s11924_s5 + $0xe8] sm:$0xff]  }
 0x428   : > { %v7607_v41 = vcombine.high %v4262_v0, %v4240_v27  ;;  %v7606_v52 = vcombine.low %v4262_v0, %v4240_v27 }
 0x42a   : > { %v4353_v15 = vshrl.u32 %v7607_v41, 16  ;;  %v4348_v32 = vshrl.u32 %v7606_v52, 16  ;;  %v4356_v43 = vshll.u32 %v7607_v41, 16 }
 0x42c   : > { %v4355_v2 = vrot.slane %v4353_v15, 7 }
 0x42e   : > { %v4208_v37 = vpop.permute.xlu1 %4207  ;;  %v4358_v23 = vor.u32 %v4356_v43, %v4355_v2 }
 0x42f   : > { %v4264_v14 = vsel %vm2792_vm1, %v10726_v4, %v4208_v37  ;;  %v7621_v4 = vrot.slane %v4348_v32, 11  ;;  %v4140_v37 = vpack.c.bf16 %v4117_v31, %v4117_v31 }
 0x430   : > { %v7608_v33 = vcombine.low %v4264_v14, %v4243_v56  ;;  %v7609_v62 = vcombine.high %v4264_v14, %v4243_v56  ;;  %v8633_v56 = vld [vmem:[%s11924_s5 + $0xe0] sm:$0xff]  }
 0x431   : > { %v10850_v10 = vsel %vm10841_vm8, %v7621_v4, %v4358_v23  ;;  %v4254_v12 = vrot.slane %v4140_v37, 1  ;;  %v8635_v4 = vld [vmem:[%s11924_s5 + $0xd0] sm:$0xff]   ;;  %v4473_v37 = vrot.slane %v10820_v54, 1 }
 0x432   : > { %v4361_v34 = vshrl.u32 %v7608_v33, 16  ;;  %v4366_v36 = vshrl.u32 %v7609_v62, 16  ;;  %v4369_v18 = vshll.u32 %v7609_v62, 16 }
 0x434   : > { %v4368_v48 = vrot.slane %v4366_v36, 7  ;;  %v7622_v9 = vrot.slane %v4361_v34, 11  ;;  %v8634_v36 = vld [vmem:[%s11924_s5 + $0xd8] sm:$0xff]  }
 0x436   : > { %v4371_v21 = vor.u32 %v4369_v18, %v4368_v48  ;;  %v4210_v39 = vpop.permute.xlu0 %4209  ;;  %v4120_v48 = vld [vmem:[#allocation6 + $0xb8] sm:$0xff] }
 0x437   : > { %v4266_v19 = vsel %vm2792_vm1, %v10758_v40, %v4210_v39  ;;  %v8629_v40 = vld [vmem:[%s11924_s5 + $0xf8] sm:$0xff]  }
 0x438   : > { %v10854_v59 = vsel %vm10841_vm8, %v7622_v9, %v4371_v21  ;;  %v7611_v42 = vcombine.high %v4266_v19, %v4246_v60  ;;  %v7610_v28 = vcombine.low %v4266_v19, %v4246_v60  ;;  %v4099_v9 = vld [vmem:[#allocation6 + $0x10] sm:$0xff]  ;;  %v4255_v21 = vsel %vm2615_vm2, %v4253_v17, %v4254_v12 }
 0x439   : > { %v7656_v44 = vcombine.high %v10850_v10, %v10854_v59  ;;  %v7655_v46 = vcombine.low %v10850_v10, %v10854_v59  ;;  %v4142_v60 = vpack.c.bf16 %v4120_v48, %v4120_v48 }
 0x43a   : > { %v4379_v25 = vshrl.u32 %v7611_v42, 16  ;;  %v4374_v27 = vshrl.u32 %v7610_v28, 16  ;;  %v4382_v0 = vshll.u32 %v7611_v42, 16 }
 0x43b   : > { %7675 = vmatprep.mubr.msk.bf16.mxu1 %vm2792_vm1, %v7656_v44  ;;  %v4128_v44 = vpack.c.bf16 %v4099_v9, %v4099_v9  ;;  %v4257_v29 = vrot.slane %v4142_v60, 1 }
 0x43c   : > { %4668 = vmatmul.mubr.bf16.vlgmr.msra.gmra.mxu1 %v7655_v46  ;;  %v4381_v16 = vrot.slane %v4379_v25, 7  ;;  %v7623_v14 = vrot.slane %v4374_v27, 11  ;;  %v4256_v25 = vrot.slane %v10811_v55, 1 }
 0x43d   : > { %5005 = vmatpush1.bf16.msra.mxu1 %v8629_v40 }
 0x43e   : > { %v4212_v51 = vpop.permute.xlu1 %4211  ;;  %5006 = vmatprep.subr.bf16.mxu1 %v11955_v24  ;;  %v4384_v1 = vor.u32 %v4382_v0, %v4381_v16 }
 0x43f   : > { %v4268_v30 = vsel %vm2792_vm1, %v10776_v5, %v4212_v51  ;;  %v4123_v51 = vld [vmem:[#allocation6 + $0xd0] sm:$0xff] }
 0x440   : > { %v7612_v49 = vcombine.low %v4268_v30, %v4249_v38  ;;  %v7613_v22 = vcombine.high %v4268_v30, %v4249_v38  ;;  %v10886_v32 = vsel %vm10841_vm8, %v7623_v14, %v4384_v1  ;;  %v4235_v38 = vrot.slane %v10807_v8, 1 }
 0x441   : > { %5007 = vmatpush1.bf16.msra.mxu1 %v8631_v45  ;;  %v4236_v30 = vrot.slane %v4128_v44, 1  ;;  %v4144_v0 = vpack.c.bf16 %v4123_v51, %v4123_v51 }
 0x442   : > { %v4387_v58 = vshrl.u32 %v7612_v49, 16  ;;  %v4392_v41 = vshrl.u32 %v7613_v22, 16  ;;  %5008 = vmatprep.subr.bf16.mxu1 %v11955_v24  ;;  %v4395_v15 = vshll.u32 %v7613_v22, 16 }
 0x443   : > { %v4237_v1 = vsel %vm2615_vm2, %v4235_v38, %v4236_v30  ;;  %v4874_v38 = vrot.slane %v10817_v11, 1 }
 0x444   : > { %v4394_v5 = vrot.slane %v4392_v41, 7  ;;  %v7624_v35 = vrot.slane %v4387_v58, 11 }
 0x445   : > { %v4214_v52 = vpop.permute.xlu0 %4213  ;;  %5009 = vmatpush1.bf16.msra.mxu1 %v8632_v61  ;;  %v4258_v61 = vsel %vm2615_vm2, %v4256_v25, %v4257_v29  ;;  %v8642_v25 = vld [vmem:[%s11924_s5 + $0x100] sm:$0xff]  }
 0x446   : > { %v4397_v2 = vor.u32 %v4395_v15, %v4394_v5  ;;  %v4270_v33 = vsel %vm2792_vm1, %v10790_v47, %v4214_v52  ;;  %5010 = vmatprep.subr.bf16.mxu1 %v11955_v24 }
 0x447   : > { %v7615_v62 = vcombine.high %v4270_v33, %v4252_v26  ;;  %v7614_v18 = vcombine.low %v4270_v33, %v4252_v26  ;;  %v8639_v26 = vld [vmem:[%s11924_s5 + $0x118] sm:$0xff]  }
 0x448   : > { %v10890_v43 = vsel %vm10841_vm8, %v7624_v35, %v4397_v2 }
 0x449   : > { %v7658_v34 = vcombine.high %v10886_v32, %v10890_v43  ;;  %5011 = vmatpush1.bf16.msra.mxu1 %v8633_v56  ;;  %v7657_v47 = vcombine.low %v10886_v32, %v10890_v43  ;;  %v4405_v23 = vshrl.u32 %v7615_v62, 16  ;;  %v4400_v46 = vshrl.u32 %v7614_v18, 16 }
 0x44a   : > { %5012 = vmatprep.subr.bf16.mxu1 %v11955_v24  ;;  %v4408_v40 = vshll.u32 %v7615_v62, 16  ;;  %v4474_v56 = vrot.slane %v4144_v0, 1 }
 0x44b   : > { %7676 = vmatprep.mubr.msk.bf16.mxu1 %vm2792_vm1, %v7658_v34  ;;  %v4407_v19 = vrot.slane %v4405_v23, 7  ;;  %v7625_v16 = vrot.slane %v4400_v46, 11 }
 0x44c   : > { %4676 = vmatmul.mubr.bf16.gmra.mxu1 %v7657_v47  ;;  %v4475_v17 = vsel %vm2615_vm2, %v4473_v37, %v4474_v56  ;;  %v8643_v37 = vld [vmem:[%s11926_s7 + $0x70] ss:$8 sps:$4 sm:$0xff]   ;;  %v8645_v56 = vld [vmem:[%s11926_s7 + $0x74] ss:$8 sps:$4 sm:$0xff]  }
 0x44d   : > { %v4216_v6 = vpop.permute.xlu1 %4215  ;;  %5013 = vmatpush1.bf16.msra.mxu1 %v8634_v36  ;;  %6699 = vmatprep.subr.bf16.mxu0 %v8645_v56  ;;  %v8744_v56 = vld [vmem:[%s11926_s7 + $0x374] ss:$8 sps:$4 sm:$0xff]  }
 0x44e   : > { %v4272_v39 = vsel %vm2792_vm1, %v10803_v57, %v4216_v6  ;;  %5014 = vmatprep.subr.bf16.mxu1 %v11955_v24  ;;  %v4410_v57 = vor.u32 %v4408_v40, %v4407_v19 }
 0x44f   : > { %v7616_v50 = vcombine.low %v4272_v39, %v4255_v21  ;;  %v7617_v42 = vcombine.high %v4272_v39, %v4255_v21  ;;  %v8641_v39 = vld [vmem:[%s11924_s5 + $0x108] sm:$0xff]  }
 0x450   : > { %v10924_v58 = vsel %vm10841_vm8, %v7625_v16, %v4410_v57 }
 0x451   : > { %v4413_v63 = vshrl.u32 %v7616_v50, 16  ;;  %v4418_v20 = vshrl.u32 %v7617_v42, 16  ;;  %5015 = vmatpush1.bf16.msra.mxu1 %v8635_v4  ;;  %v4421_v28 = vshll.u32 %v7617_v42, 16  ;;  %v4126_v42 = vld [vmem:[#allocation6 + $0xe8] sm:$0xff] }
 0x452   : > { %5016 = vmatprep.subr.bf16.mxu1 %v11955_v24 }
 0x453   : > { %v4420_v45 = vrot.slane %v4418_v20, 7  ;;  %v7626_v49 = vrot.slane %v4413_v63, 11 }
 0x455   : > { %v4423_v22 = vor.u32 %v4421_v28, %v4420_v45  ;;  %v4218_v7 = vpop.permute.xlu0 %4217  ;;  %5017 = vmatpush1.bf16.msra.mxu1 %v8637_v13  ;;  %v4146_v13 = vpack.c.bf16 %v4126_v42, %v4126_v42  ;;  %v7682_v28 = vcombine.high %v10854_v59, %v10886_v32  ;;  %v8684_v42 = vld [vmem:[%s11926_s7 + $0x114] ss:$8 sps:$4 sm:$0xff]  }
 0x456   : > { %v4274_v27 = vsel %vm2792_vm1, %v10811_v55, %v4218_v7  ;;  %5018 = vmatprep.subr.bf16.mxu1 %v11955_v24 }
 0x457   : > { %v10928_v41 = vsel %vm10841_vm8, %v7626_v49, %v4423_v22  ;;  %v7619_v31 = vcombine.high %v4274_v27, %v4258_v61  ;;  %v7618_v47 = vcombine.low %v4274_v27, %v4258_v61  ;;  %v4875_v30 = vrot.slane %v4146_v13, 1  ;;  %v8691_v13 = vld [vmem:[%s11926_s7 + $0xf0] ss:$8 sps:$4 sm:$0xff]  }
 0x458   : > { %v7660_v5 = vcombine.high %v10924_v58, %v10928_v41  ;;  %v7659_v55 = vcombine.low %v10924_v58, %v10928_v41  ;;  %v7684_v61 = vcombine.high %v10890_v43, %v10924_v58 }
 0x459   : > { %v4204_v15 = vpop.permute.xlu0 %4203  ;;  %5019 = vmatpush1.bf16.msra.mxu1 %v8638_v53  ;;  %v4431_v14 = vshrl.u32 %v7619_v31, 16  ;;  %v4434_v9 = vshll.u32 %v7619_v31, 16  ;;  %v4426_v60 = vshrl.u32 %v7618_v47, 16  ;;  %v7681_v53 = vcombine.low %v10854_v59, %v10886_v32  ;;  %v8661_v47 = vld [vmem:[%s11926_s7 + $0x40] ss:$8 sps:$4 sm:$0xff]  }
 0x45a   : > { %v4260_v52 = vsel %vm2792_vm1, %v10807_v8, %v4204_v15  ;;  %7677 = vmatprep.mubr.msk.bf16.mxu1 %vm2792_vm1, %v7660_v5  ;;  %5028 = vmatprep.subr.bf16.mxu1 %v11955_v24  ;;  %v8640_v8 = vld [vmem:[%s11924_s5 + $0x110] sm:$0xff]  }
 0x45b   : > { %v7604_v35 = vcombine.low %v4260_v52, %v4237_v1  ;;  %v7605_v2 = vcombine.high %v4260_v52, %v4237_v1  ;;  %4684 = vmatmul.mubr.bf16.gmra.mxu1 %v7659_v55  ;;  %v4433_v23 = vrot.slane %v4431_v14, 7  ;;  %v7627_v29 = vrot.slane %v4426_v60, 11  ;;  %v8649_v14 = vld [vmem:[%s11926_s7 + $0x60] ss:$8 sps:$4 sm:$0xff]  }
 0x45c   : > { %v8676_v60 = vld [vmem:[%s11926_s7 + $0x120] ss:$8 sps:$4 sm:$0xff]  }
 0x45d   : > { %v4335_v33 = vshrl.u32 %v7604_v35, 16  ;;  %v4340_v62 = vshrl.u32 %v7605_v2, 16  ;;  %v4343_v34 = vshll.u32 %v7605_v2, 16  ;;  %v4470_v36 = vpop.permute.xlu1 %4469  ;;  %5029 = vmatpush2.bf16.msra.mxu1 %v8639_v26  ;;  %v8651_v35 = vld [vmem:[%s11926_s7 + $0x64] ss:$8 sps:$4 sm:$0xff]  }
 0x45e   : > { %v4477_v12 = vsel %vm2792_vm1, %v10820_v54, %v4470_v36  ;;  %5030 = vmatprep.subr.bf16.mxu1 %v11955_v24  ;;  %v4436_v54 = vor.u32 %v4434_v9, %v4433_v23  ;;  %v8652_v2 = vld [vmem:[%s11926_s7 + $0x160] ss:$8 sps:$4 sm:$0xff]   ;;  %v8658_v36 = vld [vmem:[%s11926_s7 + $0x150] ss:$8 sps:$4 sm:$0xff]   ;;  %v8675_v9 = vld [vmem:[%s11926_s7 + $0x24] ss:$8 sps:$4 sm:$0xff]  }
 0x45f   : > { %v7620_v48 = vrot.slane %v4335_v33, 11  ;;  %v4342_v18 = vrot.slane %v4340_v62, 7  ;;  %v7628_v6 = vcombine.low %v4477_v12, %v4475_v17  ;;  %v7629_v4 = vcombine.high %v4477_v12, %v4475_v17  ;;  %v8654_v33 = vld [vmem:[%s11926_s7 + $0x164] ss:$8 sps:$4 sm:$0xff]   ;;  %v8655_v62 = vld [vmem:[%s11926_s7 + $0x50] ss:$8 sps:$4 sm:$0xff]  }
 0x460   : > { %v8663_v17 = vld [vmem:[%s11926_s7 + $0x44] ss:$8 sps:$4 sm:$0xff]   ;;  %v8664_v23 = vld [vmem:[%s11926_s7 + $0x140] ss:$8 sps:$4 sm:$0xff]  }
 0x461   : > { %v4345_v21 = vor.u32 %v4343_v34, %v4342_v18  ;;  %5031 = vmatpush2.bf16.msra.mxu1 %v8640_v8  ;;  %v4486_v19 = vshrl.u32 %v7628_v6, 16  ;;  %v4491_v50 = vshrl.u32 %v7629_v4, 16  ;;  %v4494_v63 = vshll.u32 %v7629_v4, 16  ;;  %v4871_v22 = vpop.permute.xlu1 %4870  ;;  %v8657_v34 = vld [vmem:[%s11926_s7 + $0x54] ss:$8 sps:$4 sm:$0xff]  }
 0x462   : > { %5032 = vmatprep.subr.bf16.mxu1 %v11955_v24  ;;  %v4878_v7 = vsel %vm2792_vm1, %v10817_v11, %v4871_v22  ;;  %v7683_v11 = vcombine.low %v10890_v43, %v10924_v58  ;;  %v8660_v8 = vld [vmem:[%s11926_s7 + $0x154] ss:$8 sps:$4 sm:$0xff]   ;;  %v8666_v12 = vld [vmem:[%s11926_s7 + $0x144] ss:$8 sps:$4 sm:$0xff]   ;;  %v8670_v4 = vld [vmem:[%s11926_s7 + $0x130] ss:$8 sps:$4 sm:$0xff]  }
 0x463   : > { %v4346_v44 = vsel %vm10841_vm8, %v7620_v48, %v4345_v21  ;;  %v4493_v40 = vrot.slane %v4491_v50, 7  ;;  %v7630_v57 = vrot.slane %v4486_v19, 11  ;;  %v8667_v48 = vld [vmem:[%s11926_s7 + $0x30] ss:$8 sps:$4 sm:$0xff]   ;;  %v8669_v18 = vld [vmem:[%s11926_s7 + $0x34] ss:$8 sps:$4 sm:$0xff]  }
 0x464   : > { %v7679_v46 = vcombine.low %v4346_v44, %v10850_v10  ;;  %v7680_v20 = vcombine.high %v4346_v44, %v10850_v10  ;;  %v4437_v10 = vsel %vm10841_vm8, %v7627_v29, %v4436_v54  ;;  %v8672_v6 = vld [vmem:[%s11926_s7 + $0x134] ss:$8 sps:$4 sm:$0xff]   ;;  %v8673_v21 = vld [vmem:[%s11926_s7 + $0x20] ss:$8 sps:$4 sm:$0xff]   ;;  %v8679_v19 = vld [vmem:[%s11926_s7 + $0x10] ss:$8 sps:$4 sm:$0xff]  }
 0x465   : > { %5033 = vmatpush2.bf16.msra.mxu1 %v8641_v39  ;;  %v4496_v45 = vor.u32 %v4494_v63, %v4493_v40  ;;  %v7686_v1 = vcombine.high %v10928_v41, %v4437_v10  ;;  %v7685_v26 = vcombine.low %v10928_v41, %v4437_v10  ;;  %v8648_v41 = vld [vmem:[%s11926_s7 + $0x174] ss:$8 sps:$4 sm:$0xff]   ;;  %v8678_v39 = vld [vmem:[%s11926_s7 + $0x124] ss:$8 sps:$4 sm:$0xff]   ;;  %v8682_v54 = vld [vmem:[%s11926_s7 + $0x110] ss:$8 sps:$4 sm:$0xff]  }
 0x466   : > { %7699 = vmatprep.mubr.msk.bf16.mxu0 %vm2792_vm1, %v7680_v20  ;;  %5034 = vmatprep.subr.bf16.mxu1 %v11955_v24  ;;  %v4876_v24 = vsel %vm2615_vm2, %v4874_v38, %v4875_v30  ;;  %v8681_v50 = vld [vmem:[%s11926_s7 + $0x14] ss:$8 sps:$4 sm:$0xff]   ;;  %v8687_v44 = vld [vmem:[%s11926_s7 + $0x4] ss:$8 sps:$4 sm:$0xff]   ;;  %v8688_v63 = vld [vmem:[%s11926_s7 + $0x100] ss:$8 sps:$4 sm:$0xff]  }
 0x467   : > { %4831 = vmatmul.mubr.bf16.vlgmr.msra.gmra.mxu0 %v7679_v46  ;;  %v4497_v51 = vsel %vm10841_vm8, %v7630_v57, %v4496_v45  ;;  %v7704_v27 = vcombine.high %v4878_v7, %v4876_v24  ;;  %v7703_v0 = vcombine.low %v4878_v7, %v4876_v24  ;;  %v8685_v46 = vld [vmem:[%s11926_s7] ss:$8 sps:$4 sm:$0xff]   ;;  %v8690_v40 = vld [vmem:[%s11926_s7 + $0x104] ss:$8 sps:$4 sm:$0xff]   ;;  %v8693_v20 = vld [vmem:[%s11926_s7 + $0xf4] ss:$8 sps:$4 sm:$0xff]  }
 0x468   : > { %7700 = vmatprep.mubr.msk.bf16.mxu0 %vm2792_vm1, %v7682_v28  ;;  %v7662_v16 = vcombine.high %v4437_v10, %v4497_v51  ;;  %v7661_v49 = vcombine.low %v4437_v10, %v4497_v51  ;;  %6700 = vmatpush1.bf16.msra.mxu0 %v8643_v37  ;;  %v8694_v29 = vld [vmem:[%s11926_s7 + $0x1f0] ss:$8 sps:$4 sm:$0xff]   ;;  %v8699_v57 = vld [vmem:[%s11926_s7 + $0xe4] ss:$8 sps:$4 sm:$0xff]   ;;  %v8697_v45 = vld [vmem:[%s11926_s7 + $0xe0] ss:$8 sps:$4 sm:$0xff]  }
 0x469   : > { %5035 = vmatpush2.bf16.msra.mxu1 %v8642_v25  ;;  %v4892_v31 = vshrl.u32 %v7704_v27, 16  ;;  %v4887_v5 = vshrl.u32 %v7703_v0, 16  ;;  %v4895_v32 = vshll.u32 %v7704_v27, 16  ;;  %6701 = vmatprep.subr.bf16.mxu0 %v8651_v35  ;;  %v8696_v25 = vld [vmem:[%s11926_s7 + $0x1f4] ss:$8 sps:$4 sm:$0xff]  }
 0x46a   : > { %7678 = vmatprep.mubr.msk.bf16.mxu1 %vm2792_vm1, %v7662_v16  ;;  %6740 = vmatprep.subr.bf16.mxu1 %v8648_v41  ;;  %v8700_v10 = vld [vmem:[%s11926_s7 + $0x1e0] ss:$8 sps:$4 sm:$0xff]   ;;  %v8705_v38 = vld [vmem:[%s11926_s7 + $0xd4] ss:$8 sps:$4 sm:$0xff]   ;;  %v8706_v16 = vld [vmem:[%s11926_s7 + $0x1d0] ss:$8 sps:$4 sm:$0xff]  }
 0x46b   : > { %4692 = vmatmul.mubr.bf16.gmra.mxu1 %v7661_v49  ;;  %v4894_v59 = vrot.slane %v4892_v31, 7  ;;  %v7705_v55 = vrot.slane %v4887_v5, 11  ;;  %v8708_v30 = vld [vmem:[%s11926_s7 + $0x1d4] ss:$8 sps:$4 sm:$0xff]   ;;  %v8711_v49 = vld [vmem:[%s11926_s7 + $0xc4] ss:$8 sps:$4 sm:$0xff]  }
 0x46c   : > { %7744 = vmatprep.mubr.msk.bf16.mxu1 %vm2792_vm1, %v7682_v28  ;;  %6702 = vmatpush1.bf16.msra.mxu0 %v8649_v14  ;;  %v8702_v28 = vld [vmem:[%s11926_s7 + $0x1e4] ss:$8 sps:$4 sm:$0xff]   ;;  %v8709_v22 = vld [vmem:[%s11926_s7 + $0xc0] ss:$8 sps:$4 sm:$0xff]   ;;  %v8720_v27 = vld [vmem:[%s11926_s7 + $0x1b4] ss:$8 sps:$4 sm:$0xff]  }
 0x46d   : > { %v4897_v15 = vor.u32 %v4895_v32, %v4894_v59  ;;  %6703 = vmatprep.subr.bf16.mxu0 %v8657_v34  ;;  %v8714_v24 = vld [vmem:[%s11926_s7 + $0x1c4] ss:$8 sps:$4 sm:$0xff]   ;;  %v8712_v7 = vld [vmem:[%s11926_s7 + $0x1c0] ss:$8 sps:$4 sm:$0xff]   ;;  %v8718_v0 = vld [vmem:[%s11926_s7 + $0x1b0] ss:$8 sps:$4 sm:$0xff]  }
 0x46e   : > { %v8723_v31 = vld [vmem:[%s11926_s7 + $0xa4] ss:$8 sps:$4 sm:$0xff]   ;;  %v8724_v5 = vld [vmem:[%s11926_s7 + $0x1a0] ss:$8 sps:$4 sm:$0xff]   ;;  %v8729_v59 = vld [vmem:[%s11926_s7 + $0x94] ss:$8 sps:$4 sm:$0xff]  }
 0x46f   : > { %4839 = vmatmul.mubr.bf16.gmra.mxu0 %v7681_v53  ;;  %v4898_v52 = vsel %vm10841_vm8, %v7705_v55, %v4897_v15  ;;  %v8727_v32 = vld [vmem:[%s11926_s7 + $0x90] ss:$8 sps:$4 sm:$0xff]   ;;  %v8732_v15 = vld [vmem:[%s11926_s7 + $0x194] ss:$8 sps:$4 sm:$0xff]  }
 0x470   : > { %7701 = vmatprep.mubr.msk.bf16.mxu0 %vm2792_vm1, %v7684_v61  ;;  %v7731_v43 = vcombine.high %v4497_v51, %v4898_v52  ;;  %v7730_v58 = vcombine.low %v4497_v51, %v4898_v52  ;;  %6704 = vmatpush1.bf16.msra.mxu0 %v8655_v62  ;;  %v8703_v51 = vld [vmem:[%s11926_s7 + $0xd0] ss:$8 sps:$4 sm:$0xff]   ;;  %v8735_v52 = vld [vmem:[%s11926_s7 + $0x84] ss:$8 sps:$4 sm:$0xff]   ;;  %v8741_v37 = vld [vmem:[%s11926_s7 + $0x274] ss:$8 sps:$4 sm:$0xff]  }
 0x471   : > { %6705 = vmatprep.subr.bf16.mxu0 %v8663_v17  ;;  %v8730_v55 = vld [vmem:[%s11926_s7 + $0x190] ss:$8 sps:$4 sm:$0xff]  }
 0x473   : > { %5037 = vmatmul.mubr.bf16.vlgmr.msra.gmra.mxu1 %v7681_v53  ;;  %v8717_v53 = vld [vmem:[%s11926_s7 + $0xb4] ss:$8 sps:$4 sm:$0xff]  }
 0x474   : > { %7745 = vmatprep.mubr.msk.bf16.mxu1 %vm2792_vm1, %v7684_v61  ;;  %6741 = vmatpush1.bf16.msra.mxu1 %v8646_v3  ;;  %v8715_v61 = vld [vmem:[%s11926_s7 + $0xb0] ss:$8 sps:$4 sm:$0xff]  }
 0x475   : > { %6742 = vmatprep.subr.bf16.mxu1 %v8654_v33  ;;  %6706 = vmatpush1.bf16.msra.mxu0 %v8661_v47 }
 0x476   : > { %6707 = vmatprep.subr.bf16.mxu0 %v8669_v18 }
 0x477   : > { %4847 = vmatmul.mubr.bf16.gmra.mxu0 %v7683_v11 }
 0x478   : > { %7702 = vmatprep.mubr.msk.bf16.mxu0 %vm2792_vm1, %v7686_v1  ;;  %6743 = vmatpush1.bf16.msra.mxu1 %v8652_v2 }
 0x479   : > { %6744 = vmatprep.subr.bf16.mxu1 %v8660_v8  ;;  %6708 = vmatpush1.bf16.msra.mxu0 %v8667_v48 }
 0x47a   : > { %6709 = vmatprep.subr.bf16.mxu0 %v8675_v9 }
 0x47b   : > { %5045 = vmatmul.mubr.bf16.gmra.mxu1 %v7683_v11  ;;  %v8721_v11 = vld [vmem:[%s11926_s7 + $0xa0] ss:$8 sps:$4 sm:$0xff]  }
 0x47c   : > { %7746 = vmatprep.mubr.msk.bf16.mxu1 %vm2792_vm1, %v7686_v1  ;;  %6745 = vmatpush1.bf16.msra.mxu1 %v8658_v36  ;;  %v8726_v1 = vld [vmem:[%s11926_s7 + $0x1a4] ss:$8 sps:$4 sm:$0xff]  }
 0x47d   : > { %6746 = vmatprep.subr.bf16.mxu1 %v8666_v12  ;;  %6710 = vmatpush1.bf16.msra.mxu0 %v8673_v21 }
 0x47e   : > { %6711 = vmatprep.subr.bf16.mxu0 %v8681_v50 }
 0x47f   : > { %4855 = vmatmul.mubr.bf16.gmra.mxu0 %v7685_v26 }
 0x480   : > { %6747 = vmatpush1.bf16.msra.mxu1 %v8664_v23 }
 0x481   : > { %6748 = vmatprep.subr.bf16.mxu1 %v8672_v6  ;;  %6712 = vmatpush1.bf16.msra.mxu0 %v8679_v19 }
 0x482   : > { %6713 = vmatprep.subr.bf16.mxu0 %v8687_v44 }
 0x483   : > { %5053 = vmatmul.mubr.bf16.gmra.mxu1 %v7685_v26  ;;  %v8733_v26 = vld [vmem:[%s11926_s7 + $0x80] ss:$8 sps:$4 sm:$0xff]  }
 0x484   : > { %7747 = vmatprep.mubr.msk.bf16.mxu1 %vm2792_vm1, %v7731_v43  ;;  %6749 = vmatpush1.bf16.msra.mxu1 %v8670_v4  ;;  %v8738_v43 = vld [vmem:[%s11926_s7 + $0x184] ss:$8 sps:$4 sm:$0xff]  }
 0x485   : > { %6750 = vmatprep.subr.bf16.mxu1 %v8678_v39  ;;  %6714 = vmatpush1.bf16.msra.mxu0 %v8685_v46  ;;  %v7748_v46 = vld [vmem:[%s11925_s6] ss:$0 sm:$0xff] }
 0x486   : > { %6715 = vmatprep.subr.bf16.mxu0 %v8693_v20 }
 0x488   : > { %6751 = vmatpush1.bf16.msra.mxu1 %v8676_v60 }
 0x489   : > { %6752 = vmatprep.subr.bf16.mxu1 %v8684_v42  ;;  %6716 = vmatpush2.bf16.msra.mxu0 %v8691_v13 }
 0x48a   : > { %6717 = vmatprep.subr.bf16.mxu0 %v8699_v57 }
 0x48b   : > { %5061 = vmatmul.mubr.bf16.gmra.mxu1 %v7730_v58  ;;  %v8736_v58 = vld [vmem:[%s11926_s7 + $0x180] ss:$8 sps:$4 sm:$0xff]  }
 0x48c   : > { %6753 = vmatpush1.bf16.msra.mxu1 %v8682_v54 }
 0x48d   : > { %6754 = vmatprep.subr.bf16.mxu1 %v8690_v40  ;;  %6718 = vmatpush2.bf16.msra.mxu0 %v8697_v45 }
 0x48e   : > { %6719 = vmatprep.subr.bf16.mxu0 %v8705_v38 }
 0x490   : > { %6755 = vmatpush1.bf16.msra.mxu1 %v8688_v63 }
 0x491   : > { %6756 = vmatprep.subr.bf16.mxu1 %v8696_v25  ;;  %6720 = vmatpush2.bf16.msra.mxu0 %v8703_v51 }
 0x492   : > { %6721 = vmatprep.subr.bf16.mxu0 %v8711_v49 }
 0x494   : > { %6757 = vmatpush2.bf16.msra.mxu1 %v8694_v29 }
 0x495   : > { %6758 = vmatprep.subr.bf16.mxu1 %v8702_v28  ;;  %6722 = vmatpush2.bf16.msra.mxu0 %v8709_v22 }
 0x496   : > { %6723 = vmatprep.subr.bf16.mxu0 %v8717_v53 }
 0x498   : > { %6759 = vmatpush2.bf16.msra.mxu1 %v8700_v10 }
 0x499   : > { %6760 = vmatprep.subr.bf16.mxu1 %v8708_v30  ;;  %6724 = vmatpush2.bf16.msra.mxu0 %v8715_v61 }
 0x49a   : > { %6725 = vmatprep.subr.bf16.mxu0 %v8723_v31 }
 0x49c   : > { %6761 = vmatpush2.bf16.msra.mxu1 %v8706_v16 }
 0x49d   : > { %6762 = vmatprep.subr.bf16.mxu1 %v8714_v24  ;;  %6726 = vmatpush2.bf16.msra.mxu0 %v8721_v11 }
 0x49e   : > { %6727 = vmatprep.subr.bf16.mxu0 %v8729_v59 }
 0x4a0   : > { %6763 = vmatpush2.bf16.msra.mxu1 %v8712_v7 }
 0x4a1   : > { %6764 = vmatprep.subr.bf16.mxu1 %v8720_v27  ;;  %6728 = vmatpush2.bf16.msra.mxu0 %v8727_v32 }
 0x4a2   : > { %6729 = vmatprep.subr.bf16.mxu0 %v8735_v52 }
 0x4a4   : > { %6765 = vmatpush2.bf16.msra.mxu1 %v8718_v0 }
 0x4a5   : > { %6766 = vmatprep.subr.bf16.mxu1 %v8726_v1  ;;  %6730 = vmatpush2.bf16.msra.mxu0 %v8733_v26 }
 0x4a6   : > { %6781 = vmatprep.subr.bf16.mxu0 %v8741_v37 }
 0x4a8   : > { %6767 = vmatpush2.bf16.msra.mxu1 %v8724_v5 }
 0x4a9   : > { %6768 = vmatprep.subr.bf16.mxu1 %v8732_v15 }
 0x4ac   : > { %6769 = vmatpush2.bf16.msra.mxu1 %v8730_v55 }
 0x4ad   : > { %6770 = vmatprep.subr.bf16.mxu1 %v8738_v43 }
 0x4b0   : > { %6771 = vmatpush2.bf16.msra.mxu1 %v8736_v58 }
 0x4b1   : > { %6822 = vmatprep.subr.bf16.mxu1 %v8744_v56 }
 0x4fc   : > { %v4669_v3 = vpop.f32.mrf.mxu1 }
 0x4fe   : > { %v4671_v41 = vpop.f32.mrf.mxu1 }
 0x500   : > { %v4672_v14 = vpop.f32.mrf.mxu1 }
 0x502   : > { %v4674_v35 = vpop.f32.mrf.mxu1 }
 0x50c   : > { %v4677_v2 = vpop.f32.mrf.mxu1 }
 0x50e   : > { %v4679_v33 = vpop.f32.mrf.mxu1 }
 0x510   : > { %v4680_v62 = vpop.f32.mrf.mxu1 }
 0x512   : > { %v4682_v34 = vpop.f32.mrf.mxu1 }
 0x51b   : > { %v4685_v36 = vpop.f32.mrf.mxu1 }
 0x51d   : > { %v4687_v8 = vpop.f32.mrf.mxu1 }
 0x51f   : > { %v4688_v47 = vpop.f32.mrf.mxu1 }
 0x521   : > { %v4690_v17 = vpop.f32.mrf.mxu1 }
 0x527   : > { %v4832_v12 = vpop.f32.mrf.mxu0 }
 0x528   : > { %v4833_v19 = vadd.f32 %v4832_v12, %v4669_v3 }
 0x529   : > { %v4834_v23 = vpop.f32.mrf.mxu0 }
 0x52b   : > { %v4835_v48 = vpop.f32.mrf.mxu0  ;;  %v4693_v18 = vpop.f32.mrf.mxu1 }
 0x52c   : > { %v4836_v63 = vadd.f32 %v4835_v48, %v4672_v14 }
 0x52d   : > { %v4837_v6 = vpop.f32.mrf.mxu0  ;;  %v4695_v4 = vpop.f32.mrf.mxu1 }
 0x52f   : > { %v4840_v9 = vpop.f32.mrf.mxu0  ;;  %v4696_v21 = vpop.f32.mrf.mxu1 }
 0x530   : > { %v4841_v28 = vadd.f32 %v4840_v9, %v4677_v2 }
 0x531   : > { %v4842_v39 = vpop.f32.mrf.mxu0  ;;  %v4698_v60 = vpop.f32.mrf.mxu1 }
 0x533   : > { %v4843_v50 = vpop.f32.mrf.mxu0  ;;  %v5038_v42 = vpop.f32.mrf.mxu1 }
 0x534   : > { %v5069_v54 = vadd.f32 %v5038_v42, %v4833_v19  ;;  %v4844_v7 = vadd.f32 %v4843_v50, %v4680_v62 }
 0x535   : > { %v4845_v44 = vpop.f32.mrf.mxu0  ;;  %v5040_v40 = vpop.f32.mrf.mxu1 }
 0x536   : > { %v5084_v25 = vadd.f32 %v7748_v46, %v5069_v54 }
 0x537   : > { %v4848_v20 = vpop.f32.mrf.mxu0  ;;  %v5041_v13 = vpop.f32.mrf.mxu1 }
 0x538   : > { %v5070_v29 = vadd.f32 %v5041_v13, %v4836_v63  ;;  %v5092_v30 = vmax.f32 %v5084_v25, 0.0  ;;  %v4849_v5 = vadd.f32 %v4848_v20, %v4685_v36  ;;  %v8739_v20 = vld [vmem:[%s11926_s7 + $0x270] ss:$8 sps:$4 sm:$0xff]  }
 0x539   : > { %v4850_v57 = vpop.f32.mrf.mxu0  ;;  %v5043_v45 = vpop.f32.mrf.mxu1  ;;  %v8742_v25 = vld [vmem:[%s11926_s7 + $0x370] ss:$8 sps:$4 sm:$0xff]  }
 0x53a   : > { %v5085_v10 = vadd.f32 %v7748_v46, %v5070_v29  ;;  %v8747_v29 = vld [vmem:[%s11926_s7 + $0x264] ss:$8 sps:$4 sm:$0xff]  }
 0x53b   : > { %v4851_v51 = vpop.f32.mrf.mxu0  ;;  %v5046_v38 = vpop.f32.mrf.mxu1  ;;  %v8750_v45 = vld [vmem:[%s11926_s7 + $0x364] ss:$8 sps:$4 sm:$0xff]  }
 0x53c   : > { %v5093_v16 = vmax.f32 %v5085_v10, 0.0  ;;  %v5071_v49 = vadd.f32 %v5046_v38, %v4841_v28  ;;  %v4852_v37 = vadd.f32 %v4851_v51, %v4688_v47  ;;  %v8745_v28 = vld [vmem:[%s11926_s7 + $0x260] ss:$8 sps:$4 sm:$0xff]   ;;  %v8753_v51 = vld [vmem:[%s11926_s7 + $0x254] ss:$8 sps:$4 sm:$0xff]  }
 0x53d   : > { %v4853_v22 = vpop.f32.mrf.mxu0  ;;  %v5048_v24 = vpop.f32.mrf.mxu1  ;;  %v8748_v38 = vld [vmem:[%s11926_s7 + $0x360] ss:$8 sps:$4 sm:$0xff]  }
 0x53e   : > { %v5100_v53 = vmax.f32 %v5092_v30, %v5093_v16  ;;  %v5086_v0 = vadd.f32 %v7748_v46, %v5071_v49  ;;  %v8756_v30 = vld [vmem:[%s11926_s7 + $0x354] ss:$8 sps:$4 sm:$0xff]   ;;  %v8751_v16 = vld [vmem:[%s11926_s7 + $0x250] ss:$8 sps:$4 sm:$0xff]   ;;  %v8759_v49 = vld [vmem:[%s11926_s7 + $0x244] ss:$8 sps:$4 sm:$0xff]  }
 0x53f   : > { %v4856_v61 = vpop.f32.mrf.mxu0  ;;  %v5049_v27 = vpop.f32.mrf.mxu1  ;;  %v8754_v22 = vld [vmem:[%s11926_s7 + $0x350] ss:$8 sps:$4 sm:$0xff]   ;;  %v8762_v24 = vld [vmem:[%s11926_s7 + $0x344] ss:$8 sps:$4 sm:$0xff]  }
 0x540   : > { %5104 = vst [vmem:[#allocation4] sm:$0xff] %v5100_v53  ;;  %v5072_v31 = vadd.f32 %v5049_v27, %v4844_v7  ;;  %v5094_v15 = vmax.f32 %v5086_v0, 0.0  ;;  %v4857_v2 = vadd.f32 %v4856_v61, %v4693_v18  ;;  %v8757_v7 = vld [vmem:[%s11926_s7 + $0x240] ss:$8 sps:$4 sm:$0xff]   ;;  %v8765_v53 = vld [vmem:[%s11926_s7 + $0x234] ss:$8 sps:$4 sm:$0xff]  }
 0x541   : > { %v4858_v11 = vpop.f32.mrf.mxu0  ;;  %v5051_v1 = vpop.f32.mrf.mxu1  ;;  %v8760_v61 = vld [vmem:[%s11926_s7 + $0x340] ss:$8 sps:$4 sm:$0xff]   ;;  %v8768_v27 = vld [vmem:[%s11926_s7 + $0x334] ss:$8 sps:$4 sm:$0xff]   ;;  %v8763_v0 = vld [vmem:[%s11926_s7 + $0x230] ss:$8 sps:$4 sm:$0xff]  }
 0x542   : > { %v5087_v59 = vadd.f32 %v7748_v46, %v5072_v31  ;;  %v8771_v31 = vld [vmem:[%s11926_s7 + $0x224] ss:$8 sps:$4 sm:$0xff]   ;;  %v8766_v11 = vld [vmem:[%s11926_s7 + $0x330] ss:$8 sps:$4 sm:$0xff]  }
 0x543   : > { %v4859_v32 = vpop.f32.mrf.mxu0  ;;  %v5054_v55 = vpop.f32.mrf.mxu1  ;;  %v8774_v1 = vld [vmem:[%s11926_s7 + $0x324] ss:$8 sps:$4 sm:$0xff]  }
 0x544   : > { %v5095_v26 = vmax.f32 %v5087_v59, 0.0  ;;  %v5073_v52 = vadd.f32 %v5054_v55, %v4849_v5  ;;  %v4860_v12 = vadd.f32 %v4859_v32, %v4696_v21  ;;  %v8769_v5 = vld [vmem:[%s11926_s7 + $0x220] ss:$8 sps:$4 sm:$0xff]   ;;  %v8777_v59 = vld [vmem:[%s11926_s7 + $0x214] ss:$8 sps:$4 sm:$0xff]  }
 0x545   : > { %v4861_v43 = vpop.f32.mrf.mxu0  ;;  %v5056_v58 = vpop.f32.mrf.mxu1  ;;  %v8772_v32 = vld [vmem:[%s11926_s7 + $0x320] ss:$8 sps:$4 sm:$0xff]   ;;  %v8780_v55 = vld [vmem:[%s11926_s7 + $0x314] ss:$8 sps:$4 sm:$0xff]  }
 0x546   : > { %v5101_v56 = vmax.f32 %v5094_v15, %v5095_v26  ;;  %v5088_v41 = vadd.f32 %v7748_v46, %v5073_v52  ;;  %v8775_v15 = vld [vmem:[%s11926_s7 + $0x210] ss:$8 sps:$4 sm:$0xff]   ;;  %v8783_v26 = vld [vmem:[%s11926_s7 + $0x204] ss:$8 sps:$4 sm:$0xff]   ;;  %v8781_v58 = vld [vmem:[%s11926_s7 + $0x200] ss:$8 sps:$4 sm:$0xff]  }
 0x547   : > { %v5057_v3 = vpop.f32.mrf.mxu1  ;;  %v8778_v52 = vld [vmem:[%s11926_s7 + $0x310] ss:$8 sps:$4 sm:$0xff]   ;;  %v8786_v43 = vld [vmem:[%s11926_s7 + $0x304] ss:$8 sps:$4 sm:$0xff]  }
 0x548   : > { %5105 = vst [vmem:[#allocation4 + $0x8] sm:$0xff] %v5101_v56  ;;  %v5074_v14 = vadd.f32 %v5057_v3, %v4852_v37  ;;  %v5096_v34 = vmax.f32 %v5088_v41, 0.0  ;;  %v8789_v37 = vld [vmem:[%s11926_s7 + $0x2f4] ss:$8 sps:$4 sm:$0xff]   ;;  %v8784_v56 = vld [vmem:[%s11926_s7 + $0x300] ss:$8 sps:$4 sm:$0xff]  }
 0x549   : > { %v5059_v35 = vpop.f32.mrf.mxu1  ;;  %v8792_v3 = vld [vmem:[%s11926_s7 + $0x3f4] ss:$8 sps:$4 sm:$0xff]   ;;  %v8787_v41 = vld [vmem:[%s11926_s7 + $0x2f0] ss:$8 sps:$4 sm:$0xff]  }
 0x54a   : > { %v5089_v33 = vadd.f32 %v7748_v46, %v5074_v14  ;;  %v8795_v14 = vld [vmem:[%s11926_s7 + $0x2e4] ss:$8 sps:$4 sm:$0xff]   ;;  %v8790_v35 = vld [vmem:[%s11926_s7 + $0x3f0] ss:$8 sps:$4 sm:$0xff]  }
 0x54b   : > { %v5062_v62 = vpop.f32.mrf.mxu1 }
 0x54c   : > { %v5097_v36 = vmax.f32 %v5089_v33, 0.0  ;;  %v5075_v8 = vadd.f32 %v5062_v62, %v4857_v2  ;;  %v8798_v2 = vld [vmem:[%s11926_s7 + $0x3e4] ss:$8 sps:$4 sm:$0xff]   ;;  %v8793_v33 = vld [vmem:[%s11926_s7 + $0x2e0] ss:$8 sps:$4 sm:$0xff]  }
 0x54d   : > { %v5064_v17 = vpop.f32.mrf.mxu1  ;;  %v8801_v62 = vld [vmem:[%s11926_s7 + $0x2d4] ss:$8 sps:$4 sm:$0xff]  }
 0x54e   : > { %v5102_v23 = vmax.f32 %v5096_v34, %v5097_v36  ;;  %v5090_v6 = vadd.f32 %v7748_v46, %v5075_v8  ;;  %v8796_v34 = vld [vmem:[%s11926_s7 + $0x3e0] ss:$8 sps:$4 sm:$0xff]   ;;  %v8804_v36 = vld [vmem:[%s11926_s7 + $0x3d4] ss:$8 sps:$4 sm:$0xff]   ;;  %v8799_v8 = vld [vmem:[%s11926_s7 + $0x2d0] ss:$8 sps:$4 sm:$0xff]  }
 0x54f   : > { %v5065_v48 = vpop.f32.mrf.mxu1  ;;  %v5108_v50 = vld [vmem:[#allocation4] ss:$2 sm:$0xff]  ;;  %v5112_v18 = vld [vmem:[#allocation4 + $0x1] ss:$2 sm:$0xff] }
 0x550   : > { %5106 = vst [vmem:[#allocation4 + $0x10] sm:$0xff] %v5102_v23  ;;  %v5076_v4 = vadd.f32 %v5065_v48, %v4860_v12  ;;  %v5098_v39 = vmax.f32 %v5090_v6, 0.0  ;;  %v5115_v44 = vmax.f32 %v5108_v50, %v5112_v18  ;;  %v8807_v17 = vld [vmem:[%s11926_s7 + $0x2c4] ss:$8 sps:$4 sm:$0xff]   ;;  %v8802_v12 = vld [vmem:[%s11926_s7 + $0x3d0] ss:$8 sps:$4 sm:$0xff]  }
 0x551   : > { %v5067_v47 = vpop.f32.mrf.mxu1  ;;  %v8810_v23 = vld [vmem:[%s11926_s7 + $0x3c4] ss:$8 sps:$4 sm:$0xff]   ;;  %v8805_v48 = vld [vmem:[%s11926_s7 + $0x2c0] ss:$8 sps:$4 sm:$0xff]   ;;  %v8813_v6 = vld [vmem:[%s11926_s7 + $0x2b4] ss:$8 sps:$4 sm:$0xff]  }
 0x552   : > { %v5091_v9 = vadd.f32 %v7748_v46, %v5076_v4  ;;  %v8808_v4 = vld [vmem:[%s11926_s7 + $0x3c0] ss:$8 sps:$4 sm:$0xff]   ;;  %v8816_v47 = vld [vmem:[%s11926_s7 + $0x3b4] ss:$8 sps:$4 sm:$0xff]  }
 0x553   : > { %v8817_v50 = vld [vmem:[%s11926_s7 + $0x2a0] ss:$8 sps:$4 sm:$0xff]   ;;  %v8825_v18 = vld [vmem:[%s11926_s7 + $0x294] ss:$8 sps:$4 sm:$0xff]  }
 0x554   : > { %v5099_v60 = vmax.f32 %v5091_v9, 0.0  ;;  %v8811_v9 = vld [vmem:[%s11926_s7 + $0x2b0] ss:$8 sps:$4 sm:$0xff]  }
 0x556   : > { %v5103_v19 = vmax.f32 %v5098_v39, %v5099_v60  ;;  %v8819_v39 = vld [vmem:[%s11926_s7 + $0x2a4] ss:$8 sps:$4 sm:$0xff]   ;;  %v8814_v60 = vld [vmem:[%s11926_s7 + $0x3b0] ss:$8 sps:$4 sm:$0xff]  }
 0x558   : > { %5107 = vst [vmem:[#allocation4 + $0x18] sm:$0xff] %v5103_v19  ;;  %v8822_v19 = vld [vmem:[%s11926_s7 + $0x3a4] ss:$8 sps:$4 sm:$0xff]  }
 0x55f   : > { %v5110_v42 = vld [vmem:[#allocation4 + $0x10] ss:$2 sm:$0xff]  ;;  %v5114_v54 = vld [vmem:[#allocation4 + $0x11] ss:$2 sm:$0xff] }
 0x560   : > { %v5116_v40 = vmax.f32 %v5110_v42, %v5114_v54  ;;  %v8820_v42 = vld [vmem:[%s11926_s7 + $0x3a0] ss:$8 sps:$4 sm:$0xff]   ;;  %v8828_v54 = vld [vmem:[%s11926_s7 + $0x394] ss:$8 sps:$4 sm:$0xff]  }
 0x562   : > { %v11192_v63 = vpack.c.bf16 %v5116_v40, %v5115_v44  ;;  %v8823_v44 = vld [vmem:[%s11926_s7 + $0x290] ss:$8 sps:$4 sm:$0xff]   ;;  %v8831_v40 = vld [vmem:[%s11926_s7 + $0x284] ss:$8 sps:$4 sm:$0xff]  }
 0x564   : > { %v11195_v21 = vshrl.u32 %v11192_v63, 16  ;;  %v5123_v57 = vrot.slane %v11192_v63, 1 }
 0x566   : > { %6731 = vmatprep.mubr.bf16.mxu0 %v11195_v21  ;;  %v5125_v46 = vrot.slane %v11195_v21, 1  ;;  %v5129_v13 = vrot.slane %v11195_v21, 2  ;;  %v5133_v10 = vrot.slane %v11195_v21, 3 }
 0x567   : > { %6732 = vmatmul.mubr.bf16.vlgmr.msra.gmra.mxu0 %v11192_v63 }
 0x568   : > { %6782 = vmatpush1.bf16.msra.mxu0 %v8739_v20  ;;  %6772 = vmatprep.mubr.bf16.mxu1 %v5125_v46  ;;  %v8826_v20 = vld [vmem:[%s11926_s7 + $0x390] ss:$8 sps:$4 sm:$0xff]   ;;  %v8834_v46 = vld [vmem:[%s11926_s7 + $0x384] ss:$8 sps:$4 sm:$0xff]  }
 0x569   : > { %6813 = vmatprep.mubr.bf16.mxu0 %v5129_v13  ;;  %6773 = vmatmul.mubr.bf16.vlgmr.msra.gmra.mxu1 %v5123_v57  ;;  %v8829_v13 = vld [vmem:[%s11926_s7 + $0x280] ss:$8 sps:$4 sm:$0xff]   ;;  %v8840_v57 = vld [vmem:[%s11926_s7 + $0x574] ss:$8 sps:$4 sm:$0xff]  }
 0x56a   : > { %6823 = vmatpush1.bf16.msra.mxu1 %v8742_v25  ;;  %6783 = vmatprep.subr.bf16.mxu0 %v8747_v29  ;;  %v8837_v25 = vld [vmem:[%s11926_s7 + $0x474] ss:$8 sps:$4 sm:$0xff]   ;;  %v8832_v29 = vld [vmem:[%s11926_s7 + $0x380] ss:$8 sps:$4 sm:$0xff]  }
 0x56b   : > { %6854 = vmatprep.mubr.bf16.mxu1 %v5133_v10  ;;  %6824 = vmatprep.subr.bf16.mxu1 %v8750_v45  ;;  %v8835_v45 = vld [vmem:[%s11926_s7 + $0x470] ss:$8 sps:$4 sm:$0xff]   ;;  %v8843_v10 = vld [vmem:[%s11926_s7 + $0x464] ss:$8 sps:$4 sm:$0xff]  }
 0x56c   : > { %6784 = vmatpush1.bf16.msra.mxu0 %v8745_v28  ;;  %v5127_v28 = vrot.slane %v11192_v63, 2 }
 0x56d   : > { %6785 = vmatprep.subr.bf16.mxu0 %v8753_v51  ;;  %v5137_v51 = vrot.slane %v11195_v21, 4 }
 0x56e   : > { %6825 = vmatpush1.bf16.msra.mxu1 %v8748_v38  ;;  %v8838_v38 = vld [vmem:[%s11926_s7 + $0x570] ss:$8 sps:$4 sm:$0xff]  }
 0x56f   : > { %6826 = vmatprep.subr.bf16.mxu1 %v8756_v30  ;;  %v5131_v30 = vrot.slane %v11192_v63, 3 }
 0x570   : > { %6786 = vmatpush1.bf16.msra.mxu0 %v8751_v16  ;;  %v8846_v16 = vld [vmem:[%s11926_s7 + $0x564] ss:$8 sps:$4 sm:$0xff]  }
 0x571   : > { %6787 = vmatprep.subr.bf16.mxu0 %v8759_v49  ;;  %v5141_v49 = vrot.slane %v11195_v21, 5 }
 0x572   : > { %6827 = vmatpush1.bf16.msra.mxu1 %v8754_v22  ;;  %v8841_v22 = vld [vmem:[%s11926_s7 + $0x460] ss:$8 sps:$4 sm:$0xff]  }
 0x573   : > { %6828 = vmatprep.subr.bf16.mxu1 %v8762_v24  ;;  %v8849_v24 = vld [vmem:[%s11926_s7 + $0x454] ss:$8 sps:$4 sm:$0xff]  }
 0x574   : > { %6788 = vmatpush1.bf16.msra.mxu0 %v8757_v7  ;;  %v8844_v7 = vld [vmem:[%s11926_s7 + $0x560] ss:$8 sps:$4 sm:$0xff]  }
 0x575   : > { %6789 = vmatprep.subr.bf16.mxu0 %v8765_v53  ;;  %v8852_v53 = vld [vmem:[%s11926_s7 + $0x554] ss:$8 sps:$4 sm:$0xff]  }
 0x576   : > { %6829 = vmatpush1.bf16.msra.mxu1 %v8760_v61  ;;  %v8847_v61 = vld [vmem:[%s11926_s7 + $0x450] ss:$8 sps:$4 sm:$0xff]  }
 0x577   : > { %6830 = vmatprep.subr.bf16.mxu1 %v8768_v27  ;;  %v8855_v27 = vld [vmem:[%s11926_s7 + $0x444] ss:$8 sps:$4 sm:$0xff]  }
 0x578   : > { %6790 = vmatpush1.bf16.msra.mxu0 %v8763_v0  ;;  %v8850_v0 = vld [vmem:[%s11926_s7 + $0x550] ss:$8 sps:$4 sm:$0xff]  }
 0x579   : > { %6791 = vmatprep.subr.bf16.mxu0 %v8771_v31  ;;  %v8858_v31 = vld [vmem:[%s11926_s7 + $0x544] ss:$8 sps:$4 sm:$0xff]  }
 0x57a   : > { %6831 = vmatpush1.bf16.msra.mxu1 %v8766_v11  ;;  %v8853_v11 = vld [vmem:[%s11926_s7 + $0x440] ss:$8 sps:$4 sm:$0xff]  }
 0x57b   : > { %6832 = vmatprep.subr.bf16.mxu1 %v8774_v1  ;;  %v8861_v1 = vld [vmem:[%s11926_s7 + $0x434] ss:$8 sps:$4 sm:$0xff]  }
 0x57c   : > { %6792 = vmatpush1.bf16.msra.mxu0 %v8769_v5  ;;  %v8856_v5 = vld [vmem:[%s11926_s7 + $0x540] ss:$8 sps:$4 sm:$0xff]  }
 0x57d   : > { %6793 = vmatprep.subr.bf16.mxu0 %v8777_v59  ;;  %v8864_v59 = vld [vmem:[%s11926_s7 + $0x534] ss:$8 sps:$4 sm:$0xff]  }
 0x57e   : > { %6833 = vmatpush1.bf16.msra.mxu1 %v8772_v32  ;;  %v8859_v32 = vld [vmem:[%s11926_s7 + $0x430] ss:$8 sps:$4 sm:$0xff]  }
 0x57f   : > { %6834 = vmatprep.subr.bf16.mxu1 %v8780_v55  ;;  %v8867_v55 = vld [vmem:[%s11926_s7 + $0x424] ss:$8 sps:$4 sm:$0xff]  }
 0x580   : > { %6794 = vmatpush1.bf16.msra.mxu0 %v8775_v15  ;;  %v8862_v15 = vld [vmem:[%s11926_s7 + $0x530] ss:$8 sps:$4 sm:$0xff]  }
 0x581   : > { %6795 = vmatprep.subr.bf16.mxu0 %v8783_v26  ;;  %v8870_v26 = vld [vmem:[%s11926_s7 + $0x524] ss:$8 sps:$4 sm:$0xff]  }
 0x582   : > { %6835 = vmatpush1.bf16.msra.mxu1 %v8778_v52  ;;  %v8865_v52 = vld [vmem:[%s11926_s7 + $0x420] ss:$8 sps:$4 sm:$0xff]  }
 0x583   : > { %6836 = vmatprep.subr.bf16.mxu1 %v8786_v43  ;;  %v8873_v43 = vld [vmem:[%s11926_s7 + $0x414] ss:$8 sps:$4 sm:$0xff]  }
 0x584   : > { %6796 = vmatpush1.bf16.msra.mxu0 %v8781_v58  ;;  %v8868_v58 = vld [vmem:[%s11926_s7 + $0x520] ss:$8 sps:$4 sm:$0xff]  }
 0x585   : > { %6797 = vmatprep.subr.bf16.mxu0 %v8789_v37  ;;  %v8876_v37 = vld [vmem:[%s11926_s7 + $0x514] ss:$8 sps:$4 sm:$0xff]  }
 0x586   : > { %6837 = vmatpush1.bf16.msra.mxu1 %v8784_v56  ;;  %v8871_v56 = vld [vmem:[%s11926_s7 + $0x410] ss:$8 sps:$4 sm:$0xff]  }
 0x587   : > { %6838 = vmatprep.subr.bf16.mxu1 %v8792_v3  ;;  %v8879_v3 = vld [vmem:[%s11926_s7 + $0x404] ss:$8 sps:$4 sm:$0xff]  }
 0x588   : > { %6798 = vmatpush2.bf16.msra.mxu0 %v8787_v41  ;;  %v8874_v41 = vld [vmem:[%s11926_s7 + $0x510] ss:$8 sps:$4 sm:$0xff]  }
 0x589   : > { %6799 = vmatprep.subr.bf16.mxu0 %v8795_v14  ;;  %v8882_v14 = vld [vmem:[%s11926_s7 + $0x504] ss:$8 sps:$4 sm:$0xff]  }
 0x58a   : > { %6839 = vmatpush2.bf16.msra.mxu1 %v8790_v35  ;;  %v8877_v35 = vld [vmem:[%s11926_s7 + $0x400] ss:$8 sps:$4 sm:$0xff]  }
 0x58b   : > { %6840 = vmatprep.subr.bf16.mxu1 %v8798_v2  ;;  %v8885_v2 = vld [vmem:[%s11926_s7 + $0x4f4] ss:$8 sps:$4 sm:$0xff]  }
 0x58c   : > { %6800 = vmatpush2.bf16.msra.mxu0 %v8793_v33  ;;  %v8880_v33 = vld [vmem:[%s11926_s7 + $0x500] ss:$8 sps:$4 sm:$0xff]  }
 0x58d   : > { %6801 = vmatprep.subr.bf16.mxu0 %v8801_v62  ;;  %v8888_v62 = vld [vmem:[%s11926_s7 + $0x5f4] ss:$8 sps:$4 sm:$0xff]  }
 0x58e   : > { %6841 = vmatpush2.bf16.msra.mxu1 %v8796_v34  ;;  %v8883_v34 = vld [vmem:[%s11926_s7 + $0x4f0] ss:$8 sps:$4 sm:$0xff]  }
 0x58f   : > { %6842 = vmatprep.subr.bf16.mxu1 %v8804_v36  ;;  %v8891_v36 = vld [vmem:[%s11926_s7 + $0x4e4] ss:$8 sps:$4 sm:$0xff]  }
 0x590   : > { %6802 = vmatpush2.bf16.msra.mxu0 %v8799_v8  ;;  %v8886_v8 = vld [vmem:[%s11926_s7 + $0x5f0] ss:$8 sps:$4 sm:$0xff]  }
 0x591   : > { %6803 = vmatprep.subr.bf16.mxu0 %v8807_v17  ;;  %v8894_v17 = vld [vmem:[%s11926_s7 + $0x5e4] ss:$8 sps:$4 sm:$0xff]  }
 0x592   : > { %6843 = vmatpush2.bf16.msra.mxu1 %v8802_v12  ;;  %v8889_v12 = vld [vmem:[%s11926_s7 + $0x4e0] ss:$8 sps:$4 sm:$0xff]  }
 0x593   : > { %6844 = vmatprep.subr.bf16.mxu1 %v8810_v23  ;;  %v8897_v23 = vld [vmem:[%s11926_s7 + $0x4d4] ss:$8 sps:$4 sm:$0xff]  }
 0x594   : > { %6804 = vmatpush2.bf16.msra.mxu0 %v8805_v48  ;;  %v8892_v48 = vld [vmem:[%s11926_s7 + $0x5e0] ss:$8 sps:$4 sm:$0xff]  }
 0x595   : > { %6805 = vmatprep.subr.bf16.mxu0 %v8813_v6  ;;  %v8900_v6 = vld [vmem:[%s11926_s7 + $0x5d4] ss:$8 sps:$4 sm:$0xff]  }
 0x596   : > { %6845 = vmatpush2.bf16.msra.mxu1 %v8808_v4  ;;  %v8895_v4 = vld [vmem:[%s11926_s7 + $0x4d0] ss:$8 sps:$4 sm:$0xff]  }
 0x597   : > { %6846 = vmatprep.subr.bf16.mxu1 %v8816_v47  ;;  %v8903_v47 = vld [vmem:[%s11926_s7 + $0x4c4] ss:$8 sps:$4 sm:$0xff]  }
 0x598   : > { %6806 = vmatpush2.bf16.msra.mxu0 %v8811_v9  ;;  %v8898_v9 = vld [vmem:[%s11926_s7 + $0x5d0] ss:$8 sps:$4 sm:$0xff]  }
 0x599   : > { %6807 = vmatprep.subr.bf16.mxu0 %v8819_v39  ;;  %v8906_v39 = vld [vmem:[%s11926_s7 + $0x5c4] ss:$8 sps:$4 sm:$0xff]  }
 0x59a   : > { %6847 = vmatpush2.bf16.msra.mxu1 %v8814_v60  ;;  %v8901_v60 = vld [vmem:[%s11926_s7 + $0x4c0] ss:$8 sps:$4 sm:$0xff]  }
 0x59b   : > { %6848 = vmatprep.subr.bf16.mxu1 %v8822_v19  ;;  %v8909_v19 = vld [vmem:[%s11926_s7 + $0x4b4] ss:$8 sps:$4 sm:$0xff]  }
 0x59c   : > { %6808 = vmatpush2.bf16.msra.mxu0 %v8817_v50  ;;  %v8904_v50 = vld [vmem:[%s11926_s7 + $0x5c0] ss:$8 sps:$4 sm:$0xff]  }
 0x59d   : > { %6809 = vmatprep.subr.bf16.mxu0 %v8825_v18  ;;  %v8912_v18 = vld [vmem:[%s11926_s7 + $0x5b4] ss:$8 sps:$4 sm:$0xff]  }
 0x59e   : > { %6849 = vmatpush2.bf16.msra.mxu1 %v8820_v42  ;;  %v8907_v42 = vld [vmem:[%s11926_s7 + $0x4b0] ss:$8 sps:$4 sm:$0xff]  }
 0x59f   : > { %6850 = vmatprep.subr.bf16.mxu1 %v8828_v54  ;;  %v8915_v54 = vld [vmem:[%s11926_s7 + $0x4a4] ss:$8 sps:$4 sm:$0xff]  }
 0x5a0   : > { %6810 = vmatpush2.bf16.msra.mxu0 %v8823_v44  ;;  %v8910_v44 = vld [vmem:[%s11926_s7 + $0x5b0] ss:$8 sps:$4 sm:$0xff]  }
 0x5a1   : > { %6811 = vmatprep.subr.bf16.mxu0 %v8831_v40  ;;  %v8918_v40 = vld [vmem:[%s11926_s7 + $0x5a4] ss:$8 sps:$4 sm:$0xff]  }
 0x5a2   : > { %6851 = vmatpush2.bf16.msra.mxu1 %v8826_v20  ;;  %v8913_v20 = vld [vmem:[%s11926_s7 + $0x4a0] ss:$8 sps:$4 sm:$0xff]  }
 0x5a3   : > { %6852 = vmatprep.subr.bf16.mxu1 %v8834_v46  ;;  %v8921_v46 = vld [vmem:[%s11926_s7 + $0x494] ss:$8 sps:$4 sm:$0xff]  }
 0x5a4   : > { %6812 = vmatpush2.bf16.msra.mxu0 %v8829_v13  ;;  %v8916_v13 = vld [vmem:[%s11926_s7 + $0x5a0] ss:$8 sps:$4 sm:$0xff]  }
 0x5a5   : > { %6863 = vmatprep.subr.bf16.mxu0 %v8837_v25  ;;  %v8924_v25 = vld [vmem:[%s11926_s7 + $0x594] ss:$8 sps:$4 sm:$0xff]  }
 0x5a6   : > { %6853 = vmatpush2.bf16.msra.mxu1 %v8832_v29  ;;  %v8919_v29 = vld [vmem:[%s11926_s7 + $0x490] ss:$8 sps:$4 sm:$0xff]  }
 0x5a7   : > { %6814 = vmatmul.mubr.bf16.vlgmr.msra.gmra.mxu0 %v5127_v28  ;;  %6904 = vmatprep.subr.bf16.mxu1 %v8840_v57  ;;  %v8927_v57 = vld [vmem:[%s11926_s7 + $0x484] ss:$8 sps:$4 sm:$0xff]  }
 0x5a8   : > { %6864 = vmatpush1.bf16.msra.mxu0 %v8835_v45  ;;  %6895 = vmatprep.mubr.bf16.mxu0 %v5137_v51  ;;  %v8922_v45 = vld [vmem:[%s11926_s7 + $0x590] ss:$8 sps:$4 sm:$0xff]   ;;  %v8930_v28 = vld [vmem:[%s11926_s7 + $0x584] ss:$8 sps:$4 sm:$0xff]   ;;  %v8933_v51 = vld [vmem:[%s11926_s7 + $0x674] ss:$8 sps:$4 sm:$0xff]  }
 0x5a9   : > { %6855 = vmatmul.mubr.bf16.vlgmr.msra.gmra.mxu1 %v5131_v30  ;;  %6865 = vmatprep.subr.bf16.mxu0 %v8843_v10  ;;  %v8925_v10 = vld [vmem:[%s11926_s7 + $0x480] ss:$8 sps:$4 sm:$0xff]   ;;  %v8936_v30 = vld [vmem:[%s11926_s7 + $0x774] ss:$8 sps:$4 sm:$0xff]  }
 0x5aa   : > { %6905 = vmatpush1.bf16.msra.mxu1 %v8838_v38  ;;  %6936 = vmatprep.mubr.bf16.mxu1 %v5141_v49  ;;  %v8928_v38 = vld [vmem:[%s11926_s7 + $0x580] ss:$8 sps:$4 sm:$0xff]   ;;  %v5135_v49 = vrot.slane %v11192_v63, 4 }
 0x5ab   : > { %6906 = vmatprep.subr.bf16.mxu1 %v8846_v16  ;;  %v8931_v16 = vld [vmem:[%s11926_s7 + $0x670] ss:$8 sps:$4 sm:$0xff]  }
 0x5ac   : > { %6866 = vmatpush1.bf16.msra.mxu0 %v8841_v22  ;;  %v8939_v22 = vld [vmem:[%s11926_s7 + $0x664] ss:$8 sps:$4 sm:$0xff]  }
 0x5ad   : > { %6867 = vmatprep.subr.bf16.mxu0 %v8849_v24  ;;  %v5145_v24 = vrot.slane %v11195_v21, 6 }
 0x5ae   : > { %6907 = vmatpush1.bf16.msra.mxu1 %v8844_v7  ;;  %v8934_v7 = vld [vmem:[%s11926_s7 + $0x770] ss:$8 sps:$4 sm:$0xff]  }
 0x5af   : > { %6908 = vmatprep.subr.bf16.mxu1 %v8852_v53  ;;  %v5139_v53 = vrot.slane %v11192_v63, 5 }
 0x5b0   : > { %6868 = vmatpush1.bf16.msra.mxu0 %v8847_v61  ;;  %v8942_v61 = vld [vmem:[%s11926_s7 + $0x764] ss:$8 sps:$4 sm:$0xff]  }
 0x5b1   : > { %6869 = vmatprep.subr.bf16.mxu0 %v8855_v27  ;;  %v5149_v27 = vrot.slane %v11195_v21, 7  ;;  %v8948_v21 = vld [vmem:[%s11926_s7 + $0x754] ss:$8 sps:$4 sm:$0xff]  }
 0x5b2   : > { %6909 = vmatpush1.bf16.msra.mxu1 %v8850_v0  ;;  %v8937_v0 = vld [vmem:[%s11926_s7 + $0x660] ss:$8 sps:$4 sm:$0xff]  }
 0x5b3   : > { %6910 = vmatprep.subr.bf16.mxu1 %v8858_v31  ;;  %v8945_v31 = vld [vmem:[%s11926_s7 + $0x654] ss:$8 sps:$4 sm:$0xff]  }
 0x5b4   : > { %6870 = vmatpush1.bf16.msra.mxu0 %v8853_v11  ;;  %v8940_v11 = vld [vmem:[%s11926_s7 + $0x760] ss:$8 sps:$4 sm:$0xff]  }
 0x5b5   : > { %6871 = vmatprep.subr.bf16.mxu0 %v8861_v1  ;;  %v8943_v1 = vld [vmem:[%s11926_s7 + $0x650] ss:$8 sps:$4 sm:$0xff]  }
 0x5b6   : > { %6911 = vmatpush1.bf16.msra.mxu1 %v8856_v5  ;;  %v8951_v5 = vld [vmem:[%s11926_s7 + $0x644] ss:$8 sps:$4 sm:$0xff]  }
 0x5b7   : > { %6912 = vmatprep.subr.bf16.mxu1 %v8864_v59  ;;  %v8946_v59 = vld [vmem:[%s11926_s7 + $0x750] ss:$8 sps:$4 sm:$0xff]  }
 0x5b8   : > { %6872 = vmatpush1.bf16.msra.mxu0 %v8859_v32  ;;  %v8954_v32 = vld [vmem:[%s11926_s7 + $0x744] ss:$8 sps:$4 sm:$0xff]  }
 0x5b9   : > { %6873 = vmatprep.subr.bf16.mxu0 %v8867_v55  ;;  %v8949_v55 = vld [vmem:[%s11926_s7 + $0x640] ss:$8 sps:$4 sm:$0xff]  }
 0x5ba   : > { %6913 = vmatpush1.bf16.msra.mxu1 %v8862_v15  ;;  %v8957_v15 = vld [vmem:[%s11926_s7 + $0x634] ss:$8 sps:$4 sm:$0xff]  }
 0x5bb   : > { %6914 = vmatprep.subr.bf16.mxu1 %v8870_v26  ;;  %v8952_v26 = vld [vmem:[%s11926_s7 + $0x740] ss:$8 sps:$4 sm:$0xff]  }
 0x5bc   : > { %6874 = vmatpush1.bf16.msra.mxu0 %v8865_v52  ;;  %v8960_v52 = vld [vmem:[%s11926_s7 + $0x734] ss:$8 sps:$4 sm:$0xff]  }
 0x5bd   : > { %6875 = vmatprep.subr.bf16.mxu0 %v8873_v43  ;;  %v8955_v43 = vld [vmem:[%s11926_s7 + $0x630] ss:$8 sps:$4 sm:$0xff]  }
 0x5be   : > { %6915 = vmatpush1.bf16.msra.mxu1 %v8868_v58  ;;  %v8963_v58 = vld [vmem:[%s11926_s7 + $0x624] ss:$8 sps:$4 sm:$0xff]  }
 0x5bf   : > { %6916 = vmatprep.subr.bf16.mxu1 %v8876_v37  ;;  %v8958_v37 = vld [vmem:[%s11926_s7 + $0x730] ss:$8 sps:$4 sm:$0xff]  }
 0x5c0   : > { %6876 = vmatpush1.bf16.msra.mxu0 %v8871_v56  ;;  %v8966_v56 = vld [vmem:[%s11926_s7 + $0x724] ss:$8 sps:$4 sm:$0xff]  }
 0x5c1   : > { %6877 = vmatprep.subr.bf16.mxu0 %v8879_v3  ;;  %v8961_v3 = vld [vmem:[%s11926_s7 + $0x620] ss:$8 sps:$4 sm:$0xff]  }
 0x5c2   : > { %6917 = vmatpush1.bf16.msra.mxu1 %v8874_v41  ;;  %v8969_v41 = vld [vmem:[%s11926_s7 + $0x614] ss:$8 sps:$4 sm:$0xff]  }
 0x5c3   : > { %6918 = vmatprep.subr.bf16.mxu1 %v8882_v14  ;;  %v8964_v14 = vld [vmem:[%s11926_s7 + $0x720] ss:$8 sps:$4 sm:$0xff]  }
 0x5c4   : > { %6878 = vmatpush1.bf16.msra.mxu0 %v8877_v35  ;;  %v8972_v35 = vld [vmem:[%s11926_s7 + $0x714] ss:$8 sps:$4 sm:$0xff]  }
 0x5c5   : > { %6879 = vmatprep.subr.bf16.mxu0 %v8885_v2  ;;  %v8967_v2 = vld [vmem:[%s11926_s7 + $0x610] ss:$8 sps:$4 sm:$0xff]  }
 0x5c6   : > { %6919 = vmatpush1.bf16.msra.mxu1 %v8880_v33  ;;  %v8975_v33 = vld [vmem:[%s11926_s7 + $0x604] ss:$8 sps:$4 sm:$0xff]  }
 0x5c7   : > { %6920 = vmatprep.subr.bf16.mxu1 %v8888_v62  ;;  %v8970_v62 = vld [vmem:[%s11926_s7 + $0x710] ss:$8 sps:$4 sm:$0xff]  }
 0x5c8   : > { %6880 = vmatpush2.bf16.msra.mxu0 %v8883_v34  ;;  %v8978_v34 = vld [vmem:[%s11926_s7 + $0x704] ss:$8 sps:$4 sm:$0xff]  }
 0x5c9   : > { %6881 = vmatprep.subr.bf16.mxu0 %v8891_v36  ;;  %v8973_v36 = vld [vmem:[%s11926_s7 + $0x600] ss:$8 sps:$4 sm:$0xff]  }
 0x5ca   : > { %6921 = vmatpush2.bf16.msra.mxu1 %v8886_v8  ;;  %v8981_v8 = vld [vmem:[%s11926_s7 + $0x6f4] ss:$8 sps:$4 sm:$0xff]  }
 0x5cb   : > { %6922 = vmatprep.subr.bf16.mxu1 %v8894_v17  ;;  %v8976_v17 = vld [vmem:[%s11926_s7 + $0x700] ss:$8 sps:$4 sm:$0xff]  }
 0x5cc   : > { %6882 = vmatpush2.bf16.msra.mxu0 %v8889_v12  ;;  %v8984_v12 = vld [vmem:[%s11926_s7 + $0x7f4] ss:$8 sps:$4 sm:$0xff]  }
 0x5cd   : > { %6883 = vmatprep.subr.bf16.mxu0 %v8897_v23  ;;  %v8979_v23 = vld [vmem:[%s11926_s7 + $0x6f0] ss:$8 sps:$4 sm:$0xff]  }
 0x5ce   : > { %6923 = vmatpush2.bf16.msra.mxu1 %v8892_v48  ;;  %v8987_v48 = vld [vmem:[%s11926_s7 + $0x6e4] ss:$8 sps:$4 sm:$0xff]  }
 0x5cf   : > { %6924 = vmatprep.subr.bf16.mxu1 %v8900_v6  ;;  %v8982_v6 = vld [vmem:[%s11926_s7 + $0x7f0] ss:$8 sps:$4 sm:$0xff]  }
 0x5d0   : > { %6884 = vmatpush2.bf16.msra.mxu0 %v8895_v4  ;;  %v8990_v4 = vld [vmem:[%s11926_s7 + $0x7e4] ss:$8 sps:$4 sm:$0xff]  }
 0x5d1   : > { %6885 = vmatprep.subr.bf16.mxu0 %v8903_v47  ;;  %v8985_v47 = vld [vmem:[%s11926_s7 + $0x6e0] ss:$8 sps:$4 sm:$0xff]  }
 0x5d2   : > { %6925 = vmatpush2.bf16.msra.mxu1 %v8898_v9  ;;  %v8993_v9 = vld [vmem:[%s11926_s7 + $0x6d4] ss:$8 sps:$4 sm:$0xff]  }
 0x5d3   : > { %6926 = vmatprep.subr.bf16.mxu1 %v8906_v39  ;;  %v8988_v39 = vld [vmem:[%s11926_s7 + $0x7e0] ss:$8 sps:$4 sm:$0xff]  }
 0x5d4   : > { %6886 = vmatpush2.bf16.msra.mxu0 %v8901_v60  ;;  %v8996_v60 = vld [vmem:[%s11926_s7 + $0x7d4] ss:$8 sps:$4 sm:$0xff]  }
 0x5d5   : > { %6887 = vmatprep.subr.bf16.mxu0 %v8909_v19  ;;  %v8991_v19 = vld [vmem:[%s11926_s7 + $0x6d0] ss:$8 sps:$4 sm:$0xff]  }
 0x5d6   : > { %6927 = vmatpush2.bf16.msra.mxu1 %v8904_v50  ;;  %v8999_v50 = vld [vmem:[%s11926_s7 + $0x6c4] ss:$8 sps:$4 sm:$0xff]  }
 0x5d7   : > { %6928 = vmatprep.subr.bf16.mxu1 %v8912_v18  ;;  %v8994_v18 = vld [vmem:[%s11926_s7 + $0x7d0] ss:$8 sps:$4 sm:$0xff]  }
 0x5d8   : > { %6888 = vmatpush2.bf16.msra.mxu0 %v8907_v42  ;;  %v9002_v42 = vld [vmem:[%s11926_s7 + $0x7c4] ss:$8 sps:$4 sm:$0xff]  }
 0x5d9   : > { %6889 = vmatprep.subr.bf16.mxu0 %v8915_v54  ;;  %v8997_v54 = vld [vmem:[%s11926_s7 + $0x6c0] ss:$8 sps:$4 sm:$0xff]  }
 0x5da   : > { %6929 = vmatpush2.bf16.msra.mxu1 %v8910_v44  ;;  %v9005_v44 = vld [vmem:[%s11926_s7 + $0x6b4] ss:$8 sps:$4 sm:$0xff]  }
 0x5db   : > { %6930 = vmatprep.subr.bf16.mxu1 %v8918_v40  ;;  %v9000_v40 = vld [vmem:[%s11926_s7 + $0x7c0] ss:$8 sps:$4 sm:$0xff]  }
 0x5dc   : > { %6890 = vmatpush2.bf16.msra.mxu0 %v8913_v20  ;;  %v9008_v20 = vld [vmem:[%s11926_s7 + $0x7b4] ss:$8 sps:$4 sm:$0xff]  }
 0x5dd   : > { %6891 = vmatprep.subr.bf16.mxu0 %v8921_v46  ;;  %v9003_v46 = vld [vmem:[%s11926_s7 + $0x6b0] ss:$8 sps:$4 sm:$0xff]  }
 0x5de   : > { %6931 = vmatpush2.bf16.msra.mxu1 %v8916_v13  ;;  %v9011_v13 = vld [vmem:[%s11926_s7 + $0x6a4] ss:$8 sps:$4 sm:$0xff]  }
 0x5df   : > { %6932 = vmatprep.subr.bf16.mxu1 %v8924_v25  ;;  %v9006_v25 = vld [vmem:[%s11926_s7 + $0x7b0] ss:$8 sps:$4 sm:$0xff]  }
 0x5e0   : > { %6892 = vmatpush2.bf16.msra.mxu0 %v8919_v29  ;;  %v9014_v29 = vld [vmem:[%s11926_s7 + $0x7a4] ss:$8 sps:$4 sm:$0xff]  }
 0x5e1   : > { %6893 = vmatprep.subr.bf16.mxu0 %v8927_v57  ;;  %v9009_v57 = vld [vmem:[%s11926_s7 + $0x6a0] ss:$8 sps:$4 sm:$0xff]  }
 0x5e2   : > { %6933 = vmatpush2.bf16.msra.mxu1 %v8922_v45  ;;  %v6689_v45 = vlaneseq }
 0x5e3   : > { %6934 = vmatprep.subr.bf16.mxu1 %v8930_v28  ;;  %v9017_v28 = vld [vmem:[%s11926_s7 + $0x694] ss:$8 sps:$4 sm:$0xff]  }
 0x5e4   : > { %6894 = vmatpush2.bf16.msra.mxu0 %v8925_v10  ;;  %v9012_v10 = vld [vmem:[%s11926_s7 + $0x7a0] ss:$8 sps:$4 sm:$0xff]  }
 0x5e5   : > { %6945 = vmatprep.subr.bf16.mxu0 %v8933_v51  ;;  %v9020_v51 = vld [vmem:[%s11926_s7 + $0x794] ss:$8 sps:$4 sm:$0xff]  }
 0x5e6   : > { %6935 = vmatpush2.bf16.msra.mxu1 %v8928_v38  ;;  %v9015_v38 = vld [vmem:[%s11926_s7 + $0x690] ss:$8 sps:$4 sm:$0xff]  }
 0x5e7   : > { %6896 = vmatmul.mubr.bf16.vlgmr.msra.gmra.mxu0 %v5135_v49  ;;  %6986 = vmatprep.subr.bf16.mxu1 %v8936_v30  ;;  %v6690_v30 = vshrl.u32 %v6689_v45, 7  ;;  %v9018_v49 = vld [vmem:[%s11926_s7 + $0x790] ss:$8 sps:$4 sm:$0xff]  }
 0x5e8   : > { %6946 = vmatpush1.bf16.msra.mxu0 %v8931_v16  ;;  %6977 = vmatprep.mubr.bf16.mxu0 %v5145_v24  ;;  %v9023_v16 = vld [vmem:[%s11926_s7 + $0x684] ss:$8 sps:$4 sm:$0xff]   ;;  %v9021_v24 = vld [vmem:[%s11926_s7 + $0x680] ss:$8 sps:$4 sm:$0xff]  }
 0x5e9   : > { %6937 = vmatmul.mubr.bf16.vlgmr.msra.gmra.mxu1 %v5139_v53  ;;  %6947 = vmatprep.subr.bf16.mxu0 %v8939_v22  ;;  %v9026_v22 = vld [vmem:[%s11926_s7 + $0x784] ss:$8 sps:$4 sm:$0xff]   ;;  %v5407_v53 = vld [vmem:[%s11927_s8] sm:$0x3] }
 0x5ea   : > { %6987 = vmatpush1.bf16.msra.mxu1 %v8934_v7  ;;  %7018 = vmatprep.mubr.bf16.mxu1 %v5149_v27  ;;  %v6691_v7 = vsub.s32 0, %v6690_v30  ;;  %v6695_v27 = vsub.s32 1, %v6690_v30 }
 0x5eb   : > { %6988 = vmatprep.subr.bf16.mxu1 %v8942_v61  ;;  %v9024_v61 = vld [vmem:[%s11926_s7 + $0x780] ss:$8 sps:$4 sm:$0xff]  }
 0x5ec   : > { %6948 = vmatpush1.bf16.msra.mxu0 %v8937_v0  ;;  %v6692_v0 = vrot.slane %v5407_v53, %v6691_v7 }
 0x5ed   : > { %6949 = vmatprep.subr.bf16.mxu0 %v8945_v31  ;;  %v5143_v31 = vrot.slane %v11192_v63, 6 }
 0x5ee   : > { %6989 = vmatpush1.bf16.msra.mxu1 %v8940_v11  ;;  %v6696_v11 = vrot.slane %v5407_v53, %v6695_v27 }
 0x5ef   : > { %6990 = vmatprep.subr.bf16.mxu1 %v8948_v21 }
 0x5f0   : > { %6950 = vmatpush1.bf16.msra.mxu0 %v8943_v1  ;;  %v5147_v1 = vrot.slane %v11192_v63, 7  ;;  %v9028_v63 = vld [vmem:[%s11928_s9 + $0x38] sm:$0xff]  }
 0x5f1   : > { %6951 = vmatprep.subr.bf16.mxu0 %v8951_v5  ;;  %v11969_v5 = vmov 0.0  }
 0x5f2   : > { %6991 = vmatpush1.bf16.msra.mxu1 %v8946_v59 }
 0x5f3   : > { %6992 = vmatprep.subr.bf16.mxu1 %v8954_v32 }
 0x5f4   : > { %6952 = vmatpush1.bf16.msra.mxu0 %v8949_v55 }
 0x5f5   : > { %6953 = vmatprep.subr.bf16.mxu0 %v8957_v15 }
 0x5f6   : > { %6993 = vmatpush1.bf16.msra.mxu1 %v8952_v26 }
 0x5f7   : > { %6994 = vmatprep.subr.bf16.mxu1 %v8960_v52 }
 0x5f8   : > { %6954 = vmatpush1.bf16.msra.mxu0 %v8955_v43 }
 0x5f9   : > { %6955 = vmatprep.subr.bf16.mxu0 %v8963_v58 }
 0x5fa   : > { %6995 = vmatpush1.bf16.msra.mxu1 %v8958_v37 }
 0x5fb   : > { %6996 = vmatprep.subr.bf16.mxu1 %v8966_v56 }
 0x5fc   : > { %6956 = vmatpush1.bf16.msra.mxu0 %v8961_v3 }
 0x5fd   : > { %6957 = vmatprep.subr.bf16.mxu0 %v8969_v41  ;;  %v9027_v41 = vld [vmem:[%s11928_s9 + $0x78] sm:$0xff]  }
 0x5fe   : > { %6997 = vmatpush1.bf16.msra.mxu1 %v8964_v14  ;;  %v9029_v14 = vld [vmem:[%s11928_s9 + $0x70] sm:$0xff]  }
 0x5ff   : > { %6998 = vmatprep.subr.bf16.mxu1 %v8972_v35  ;;  %v9030_v35 = vld [vmem:[%s11928_s9 + $0x30] sm:$0xff]  }
 0x600   : > { %6958 = vmatpush1.bf16.msra.mxu0 %v8967_v2  ;;  %v9031_v2 = vld [vmem:[%s11928_s9 + $0x68] sm:$0xff]  }
 0x601   : > { %6959 = vmatprep.subr.bf16.mxu0 %v8975_v33  ;;  %v9032_v33 = vld [vmem:[%s11928_s9 + $0x28] sm:$0xff]  }
 0x602   : > { %6999 = vmatpush1.bf16.msra.mxu1 %v8970_v62  ;;  %v9033_v62 = vld [vmem:[%s11928_s9 + $0x60] sm:$0xff]  }
 0x603   : > { %7000 = vmatprep.subr.bf16.mxu1 %v8978_v34  ;;  %v9034_v34 = vld [vmem:[%s11928_s9 + $0x20] sm:$0xff]  }
 0x604   : > { %6960 = vmatpush1.bf16.msra.mxu0 %v8973_v36  ;;  %v9035_v36 = vld [vmem:[%s11928_s9 + $0x58] sm:$0xff]  }
 0x605   : > { %6961 = vmatprep.subr.bf16.mxu0 %v8981_v8  ;;  %v9036_v8 = vld [vmem:[%s11928_s9 + $0x18] sm:$0xff]  }
 0x606   : > { %7001 = vmatpush1.bf16.msra.mxu1 %v8976_v17 }
 0x607   : > { %7002 = vmatprep.subr.bf16.mxu1 %v8984_v12 }
 0x608   : > { %6962 = vmatpush2.bf16.msra.mxu0 %v8979_v23  ;;  %v9037_v23 = vld [vmem:[%s11928_s9 + $0x50] sm:$0xff]  }
 0x609   : > { %6963 = vmatprep.subr.bf16.mxu0 %v8987_v48  ;;  %v9038_v48 = vld [vmem:[%s11928_s9 + $0x10] sm:$0xff]  }
 0x60a   : > { %7003 = vmatpush2.bf16.msra.mxu1 %v8982_v6 }
 0x60b   : > { %7004 = vmatprep.subr.bf16.mxu1 %v8990_v4 }
 0x60c   : > { %6964 = vmatpush2.bf16.msra.mxu0 %v8985_v47 }
 0x60d   : > { %6965 = vmatprep.subr.bf16.mxu0 %v8993_v9 }
 0x60e   : > { %7005 = vmatpush2.bf16.msra.mxu1 %v8988_v39 }
 0x60f   : > { %7006 = vmatprep.subr.bf16.mxu1 %v8996_v60 }
 0x610   : > { %6966 = vmatpush2.bf16.msra.mxu0 %v8991_v19 }
 0x611   : > { %6967 = vmatprep.subr.bf16.mxu0 %v8999_v50  ;;  %v9039_v50 = vld [vmem:[%s11928_s9 + $0x48] sm:$0xff]  }
 0x612   : > { %7007 = vmatpush2.bf16.msra.mxu1 %v8994_v18 }
 0x613   : > { %7008 = vmatprep.subr.bf16.mxu1 %v9002_v42 }
 0x614   : > { %6968 = vmatpush2.bf16.msra.mxu0 %v8997_v54  ;;  %v9040_v54 = vld [vmem:[%s11928_s9 + $0x8] sm:$0xff]  }
 0x615   : > { %6969 = vmatprep.subr.bf16.mxu0 %v9005_v44 }
 0x616   : > { %7009 = vmatpush2.bf16.msra.mxu1 %v9000_v40  ;;  %v9041_v40 = vld [vmem:[%s11928_s9 + $0x40] sm:$0xff]  }
 0x617   : > { %7010 = vmatprep.subr.bf16.mxu1 %v9008_v20  ;;  %v9042_v20 = vld [vmem:[%s11928_s9] sm:$0xff]  }
 0x618   : > { %6970 = vmatpush2.bf16.msra.mxu0 %v9003_v46  ;;  %v9043_v46 = vld [vmem:[%s11930_s11 + $0x38] sm:$0xff]  }
 0x619   : > { %6971 = vmatprep.subr.bf16.mxu0 %v9011_v13  ;;  %v9044_v13 = vld [vmem:[%s11930_s11 + $0x30] sm:$0xff]  }
 0x61a   : > { %7011 = vmatpush2.bf16.msra.mxu1 %v9006_v25  ;;  %v9045_v25 = vld [vmem:[%s11930_s11 + $0x28] sm:$0xff]  }
 0x61b   : > { %7012 = vmatprep.subr.bf16.mxu1 %v9014_v29  ;;  %v9046_v29 = vld [vmem:[%s11930_s11 + $0x20] sm:$0xff]  }
 0x61c   : > { %6972 = vmatpush2.bf16.msra.mxu0 %v9009_v57  ;;  %v9047_v57 = vld [vmem:[%s11930_s11 + $0x18] sm:$0xff]  }
 0x61d   : > { %6973 = vmatprep.subr.bf16.mxu0 %v9017_v28 }
 0x61e   : > { %7013 = vmatpush2.bf16.msra.mxu1 %v9012_v10 }
 0x61f   : > { %7014 = vmatprep.subr.bf16.mxu1 %v9020_v51 }
 0x620   : > { %6974 = vmatpush2.bf16.msra.mxu0 %v9015_v38 }
 0x621   : > { %6975 = vmatprep.subr.bf16.mxu0 %v9023_v16 }
 0x622   : > { %7015 = vmatpush2.bf16.msra.mxu1 %v9018_v49 }
 0x623   : > { %7016 = vmatprep.subr.bf16.mxu1 %v9026_v22 }
 0x624   : > { %6976 = vmatpush2.bf16.msra.mxu0 %v9021_v24 }
 0x625   : > { %8164 = vmatprep.subr.bf16.mxu0 %v9027_v41  ;;  %v9050_v41 = vld [vmem:[%s11930_s11] sm:$0xff]  }
 0x626   : > { %7017 = vmatpush2.bf16.msra.mxu1 %v9024_v61 }
 0x627   : > { %6978 = vmatmul.mubr.bf16.vlgmr.msra.gmra.mxu0 %v5143_v31  ;;  %v6733_v21 = vpop.f32.mrf.mxu0  ;;  %8459 = vmatprep.subr.bf16.mxu1 %v11969_v5 }
 0x628   : > { %v6734_v59 = vadd.f32 %v6733_v21, %v6692_v0  ;;  %8165 = vmatpush3.bf16.msra.mxu0 %v9028_v63 }
 0x629   : > { %7019 = vmatmul.mubr.bf16.vlgmr.msra.gmra.mxu1 %v5147_v1  ;;  %v6735_v32 = vpop.f32.mrf.mxu0  ;;  %v6774_v55 = vpop.f32.mrf.mxu1  ;;  %8166 = vmatprep.subr.bf16.mxu0 %v9029_v14  ;;  %v7063_v14 = vld [vmem:[%s11929_s10] sm:$0x1] }
 0x62a   : > { %v6736_v15 = vadd.f32 %v6735_v32, %v6696_v11  ;;  %v6775_v26 = vadd.f32 %v6774_v55, %v6734_v59  ;;  %8460 = vmatpush3.bf16.msra.mxu1 %v9043_v46  ;;  %8475 = vmatprep.mubr.msk.bf16.mxu1 %vm9119_vm9, %v11969_v5 }
 0x62b   : > { %v6737_v52 = vpop.f32.mrf.mxu0  ;;  %v6776_v43 = vpop.f32.mrf.mxu1  ;;  %8461 = vmatprep.subr.bf16.mxu1 %v11969_v5 }
 0x62c   : > { %v6777_v58 = vadd.f32 %v6776_v43, %v6736_v15  ;;  %8167 = vmatpush3.bf16.msra.mxu0 %v9030_v35 }
 0x62d   : > { %v6738_v37 = vpop.f32.mrf.mxu0  ;;  %v6778_v56 = vpop.f32.mrf.mxu1  ;;  %8168 = vmatprep.subr.bf16.mxu0 %v9031_v2 }
 0x62e   : > { %8462 = vmatpush3.bf16.msra.mxu1 %v9044_v13  ;;  %v9048_v56 = vld [vmem:[%s11930_s11 + $0x10] sm:$0xff]  }
 0x62f   : > { %v6779_v3 = vpop.f32.mrf.mxu1  ;;  %8463 = vmatprep.subr.bf16.mxu1 %v11969_v5 }
 0x630   : > { %8169 = vmatpush3.bf16.msra.mxu0 %v9032_v33  ;;  %v9049_v3 = vld [vmem:[%s11930_s11 + $0x8] sm:$0xff]  }
 0x631   : > { %8170 = vmatprep.subr.bf16.mxu0 %v9033_v62 }
 0x632   : > { %8464 = vmatpush3.bf16.msra.mxu1 %v9045_v25 }
 0x633   : > { %8465 = vmatprep.subr.bf16.mxu1 %v11969_v5 }
 0x634   : > { %8171 = vmatpush3.bf16.msra.mxu0 %v9034_v34 }
 0x635   : > { %8172 = vmatprep.subr.bf16.mxu0 %v9035_v36 }
 0x636   : > { %8466 = vmatpush3.bf16.msra.mxu1 %v9046_v29 }
 0x637   : > { %8467 = vmatprep.subr.bf16.mxu1 %v11969_v5 }
 0x638   : > { %8173 = vmatpush3.bf16.msra.mxu0 %v9036_v8 }
 0x639   : > { %8174 = vmatprep.subr.bf16.mxu0 %v9037_v23 }
 0x63a   : > { %8468 = vmatpush3.bf16.msra.mxu1 %v9047_v57 }
 0x63b   : > { %8469 = vmatprep.subr.bf16.mxu1 %v11969_v5 }
 0x63c   : > { %8175 = vmatpush3.bf16.msra.mxu0 %v9038_v48 }
 0x63d   : > { %8176 = vmatprep.subr.bf16.mxu0 %v9039_v50 }
 0x63e   : > { %8470 = vmatpush3.bf16.msra.mxu1 %v9048_v56 }
 0x63f   : > { %8471 = vmatprep.subr.bf16.mxu1 %v11969_v5 }
 0x640   : > { %8177 = vmatpush3.bf16.msra.mxu0 %v9040_v54 }
 0x641   : > { %8178 = vmatprep.subr.bf16.mxu0 %v9041_v40 }
 0x642   : > { %8472 = vmatpush3.bf16.msra.mxu1 %v9049_v3 }
 0x643   : > { %8473 = vmatprep.subr.bf16.mxu1 %v11969_v5  ;;  %v7218_v5 = vld [vmem:[%s11931_s12] sm:$0x1] }
 0x644   : > { %8179 = vmatpush3.bf16.msra.mxu0 %v9042_v20 }
 0x646   : > { %8474 = vmatpush3.bf16.msra.mxu1 %v9050_v41 }
 0x667   : > { %v6815_v17 = vpop.f32.mrf.mxu0 }
 0x668   : > { %v6816_v12 = vadd.f32 %v6815_v17, %v6775_v26 }
 0x669   : > { %v6817_v6 = vpop.f32.mrf.mxu0  ;;  %v6856_v4 = vpop.f32.mrf.mxu1 }
 0x66a   : > { %v6818_v47 = vadd.f32 %v6817_v6, %v6777_v58  ;;  %v6857_v9 = vadd.f32 %v6856_v4, %v6816_v12 }
 0x66b   : > { %v6819_v39 = vpop.f32.mrf.mxu0  ;;  %v6858_v60 = vpop.f32.mrf.mxu1 }
 0x66c   : > { %v6859_v19 = vadd.f32 %v6858_v60, %v6818_v47 }
 0x66d   : > { %v6820_v18 = vpop.f32.mrf.mxu0  ;;  %v6860_v42 = vpop.f32.mrf.mxu1 }
 0x66f   : > { %v6861_v44 = vpop.f32.mrf.mxu1 }
 0x6a7   : > { %v6897_v45 = vpop.f32.mrf.mxu0 }
 0x6a8   : > { %v6898_v22 = vadd.f32 %v6897_v45, %v6857_v9 }
 0x6a9   : > { %v6899_v28 = vpop.f32.mrf.mxu0  ;;  %v6938_v10 = vpop.f32.mrf.mxu1 }
 0x6aa   : > { %v6900_v24 = vadd.f32 %v6899_v28, %v6859_v19  ;;  %v6939_v7 = vadd.f32 %v6938_v10, %v6898_v22 }
 0x6ab   : > { %v6901_v51 = vpop.f32.mrf.mxu0  ;;  %v6940_v38 = vpop.f32.mrf.mxu1 }
 0x6ac   : > { %v6941_v61 = vadd.f32 %v6940_v38, %v6900_v24 }
 0x6ad   : > { %v6902_v30 = vpop.f32.mrf.mxu0  ;;  %v6942_v16 = vpop.f32.mrf.mxu1 }
 0x6af   : > { %v6943_v49 = vpop.f32.mrf.mxu1 }
 0x6e7   : > { %v6979_v53 = vpop.f32.mrf.mxu0 }
 0x6e8   : > { %v6980_v27 = vadd.f32 %v6979_v53, %v6939_v7 }
 0x6e9   : > { %v6981_v0 = vpop.f32.mrf.mxu0  ;;  %v7020_v31 = vpop.f32.mrf.mxu1 }
 0x6ea   : > { %v6982_v11 = vadd.f32 %v6981_v0, %v6941_v61  ;;  %v7021_v21 = vadd.f32 %v7020_v31, %v6980_v27 }
 0x6eb   : > { %v6983_v1 = vpop.f32.mrf.mxu0  ;;  %v7022_v59 = vpop.f32.mrf.mxu1 }
 0x6ec   : > { %v7023_v32 = vadd.f32 %v7022_v59, %v6982_v11  ;;  %v7027_v55 = vmax.f32 %v7021_v21, 0.0 }
 0x6ed   : > { %v6984_v15 = vpop.f32.mrf.mxu0  ;;  %v7024_v26 = vpop.f32.mrf.mxu1 }
 0x6ee   : > { %v7028_v52 = vmax.f32 %v7023_v32, 0.0  ;;  %v7029_v37 = vpack.c.bf16 %v7027_v55, %v7027_v55 }
 0x6ef   : > { %v7025_v43 = vpop.f32.mrf.mxu1 }
 0x6f0   : > { %v7030_v58 = vpack.c.bf16 %v7028_v52, %v7028_v52 }
 0x6f2   : > { %7192 = vmatprep.mubr.bf16.mxu0 %v7030_v58 }
 0x6f3   : > { %7193 = vmatmul.mubr.bf16.vlgmr.msra.gmra.mxu0 %v7029_v37 }
 0x7b3   : > { %v8180_v63 = vpop.f32.mrf.mxu0 }
 0x7b5   : > { %v8181_v35 = vpop.f32.mrf.mxu0 }
 0x7b6   : > { %v8182_v2 = vadd.f32 %v8181_v35, %v8180_v63 }
 0x7b7   : > { %v8183_v33 = vpop.f32.mrf.mxu0 }
 0x7b8   : > { %v7195_v62 = vadd.f32 %v8182_v2, %v7063_v14 }
 0x7b9   : > { %v8184_v34 = vpop.f32.mrf.mxu0 }
 0x7ba   : > { %v7200_v36 = vmax.f32 %v7195_v62, 0.0 }
 0x7bc   : > { %v7201_v8 = vpack.c.bf16 %v7200_v36, %v7200_v36 }
 0x7be   : > { %8476 = vmatmul.mubr.bf16.vlgmr.msra.gmra.mxu1 %v7201_v8 }
 0x87e   : > { %v7301_v17 = vpop.f32.mrf.mxu1 }
 0x87f   : > { %v7302_v12 = vadd.f32 %v7301_v17, %v7218_v5 }
 0x880   : > { %v8477_v23 = vpop.f32.mrf.mxu1 }
 0x881   : > { %7307 = vst [vmem:[%s433_s24] sm:$0x1] %v7302_v12 }
 0x882   : > { %v7304_v48 = vpop.f32.mrf.mxu1 }
 0x883   : > { %9066 = shalt.err (!%p9063_p3)
}
 0x884   : > { %s9067_s21 = scalar_lea.hbm %s11878_s20, 16  ;;  %s9071_s15 = scalar_lea.hbm %s11932_s13, 32 }
 0x885   : > { %p9068_p4 = scmp.ne.s32.totalorder %s11878_s20, %s9067_s21  ;;  %p9072_p9 = scmp.lt.s32.totalorder %s11878_s20, %s11932_s13 }
 0x886   : > { %p9073_p10 = scmp.lt.s32.totalorder %s9071_s15, %s9067_s21 }
 0x887   : > { %p9069_p7 = pnand %p9068_p4, %p9229_p5 }
 0x888   : > { %p9074_p11 = por %p9073_p10, %p9072_p9 }
 0x889   : > { %p9070_p8 = pneg %p9069_p7 }
 0x88b   : > { %p9075_p12 = pnand %p9074_p11, %p9070_p8 }
 0x88d   : > { %9078 = shalt.err (!%p9075_p12)
}
 0x88e   : > { %8479 = dma.vmem_to_hbm [thread:$0]  (%p9229_p5), %s11880_s30, 16, %s11878_s20, %s7309_s22   ;;  %v8478_v6 = vpop.f32.mrf.mxu1 }
 0x88f PF: > { %p8485_p13 = scmp.ge.s32.totalorder %s9113_s28, 2  ;;  %s7333_s0 = sand.u32 1, %s9101_s25  }
 0x890   : > { %s7334_s1 = scalar_lea.sflag [#allocation8], %s7333_s0 }
 0x891   : > { %p8482_p0 = pnand %p8485_p13, %p9233_p6 }
 0x893   : > { %p8483_p1 = pneg %p8482_p0 }
 0x895   : > { %9096 = dma.done.wait (%p8483_p1), %s7334_s1, 16  }
 0x896   : > { %9098 = vsyncadd (%p8483_p1), %s7334_s1, 4294967280  ;;  %s11970_s18 = sld [smem:[#allocation10_spill]]  ;;  %p23_p2 = scmp.ge.s32.totalorder %s9216_s14, 4  }
 0x897   : > { %s11971_s25 = smov %s9105_s26  ;;  %s11972_s26 = smov %s9109_s27 }
 0x898   : > { %s11974_s28 = smov %s9216_s14  ;;  %25 = sbr.rel (!%p23_p2) target bundleno = 6 (0x6), region = 194 }
 0x89c   : > { %s11973_s27 = smov %s11970_s18 }
 0x89d   :  { %7338 = vsyncpa [#allocation8], 1 }
 0x89e   :  { %7340 = vsyncpa [#allocation8 + $0x1], 1 }

</bundles_post_ra>
